<compile_context>
chip_gen: v7x
topology: tpu7x:2x2x1
jax: 0.10.0
libtpu: 0.0.40
codegen_flags: <defaults>
</compile_context>

<pallas_src>
import jax
import jax.numpy as jnp
from jax import lax
from jax.experimental import pallas as pl
from jax.experimental.pallas import tpu as pltpu

HIDDEN = 32
NUM_LAYERS = 8


def _rnn_wavefront_kernel(x_ref, h0_ref, wf_ref, b_ref, wout_ref, bout_ref,
                          y_ref, hout_ref):
    """Wavefront-scheduled stacked tanh-RNN + per-timestep Linear(H, 1).

    x_ref   : (T, B, H)  f32   inputs, features zero-padded from IN to H lanes
    h0_ref  : (L, B, H)  f32   initial hidden state
    wf_ref  : (L, 2H, H) bf16  fused [W_ih; W_hh]^T per layer
    b_ref   : (L, 1, H)  f32   fused bias (b_ih + b_hh) per layer
    wout_ref: (1, H)     f32   output-head weight
    bout_ref: (1, 1)     f32   output-head bias (SMEM scalar)
    y_ref   : (B, T)     f32   per-timestep scalar outputs, time on the lane axis
    hout_ref: (L, B, H)  f32   final hidden state
    """
    L, B, H = h0_ref.shape
    T = x_ref.shape[0]
    S = T + L - 1                              # number of wavefront steps

    # Hoisted (loop-invariant) loads.
    wf = wf_ref[...]                           # (L, 2H, H) bf16
    bias = b_ref[...]                          # (L, 1, H)  f32
    wout = wout_ref[...]                       # (1, H)     f32
    bout = bout_ref[0, 0]                      # scalar     f32

    lidx = lax.broadcasted_iota(jnp.int32, (L, B, H), 0)
    tidx = lax.broadcasted_iota(jnp.int32, (B, T), 1)

    def wave(s, carry):
        # A[l] holds a[l][t_l - 1] (its previous-wave output), frozen to h0[l]
        # before layer l starts and to a[l][T-1] after it finishes.
        A, y_acc = carry
        x_t = x_ref[jnp.minimum(s, T - 1)]                       # (B, H)
        feed = jnp.concatenate([x_t[None], A[:-1]], axis=0)      # (L, B, H)
        zin = jnp.concatenate([feed, A], axis=-1)                # (L, B, 2H)
        pre = jnp.einsum("lbi,lih->lbh",
                         zin.astype(jnp.bfloat16), wf,
                         preferred_element_type=jnp.float32) + bias
        cand = jnp.tanh(pre)                                     # (L, B, H) f32
        active = (lidx <= s) & (s <= lidx + (T - 1))
        A_new = jnp.where(active, cand, A)

        # Output head for the top layer; wave s corresponds to timestep s-(L-1).
        # For s < L-1 the time mask matches nothing, so no guard is needed.
        y_val = jnp.sum(A_new[L - 1] * wout, axis=-1, keepdims=True) + bout  # (B, 1)
        y_acc = jnp.where(tidx == (s - (L - 1)), y_val, y_acc)
        return A_new, y_acc

    A0 = h0_ref[...]
    y0 = jnp.zeros((B, T), jnp.float32)
    A_fin, y_fin = lax.fori_loop(0, S, wave, (A0, y0), unroll=True)

    y_ref[...] = y_fin
    hout_ref[...] = A_fin


def radar_rnn4_forward(x, h_state, params):
    """x: (B, T, IN) f32, h_state: (L, B, H) f32 -> ((B, T, 1), (L, B, H))."""
    B, T, IN = x.shape
    L, _, H = h_state.shape
    assert L == NUM_LAYERS and H == HIDDEN and IN <= H

    # Time-major input, features zero-padded to H lanes so every layer consumes a
    # uniform (B, 2H) fused operand.
    x_t = jnp.transpose(x, (1, 0, 2))                                    # (T, B, IN)
    x_pad = jnp.zeros((T, B, H), jnp.float32).at[:, :, :IN].set(x_t)     # (T, B, H)

    # Fused per-layer weight [W_ih; W_hh]^T -> (L, 2H, H); layer 0's W_ih rows are
    # zero-padded from IN to H (the padded input lanes are zero anyway).
    wih0_t = jnp.zeros((H, H), jnp.float32).at[:IN, :].set(params["wih0"].T)
    win_t = jnp.concatenate(
        [wih0_t[None], jnp.transpose(params["wih"], (0, 2, 1))], axis=0)  # (L, H, H)
    whh_t = jnp.transpose(params["whh"], (0, 2, 1))                        # (L, H, H)
    wf = jnp.concatenate([win_t, whh_t], axis=1).astype(jnp.bfloat16)      # (L, 2H, H)

    bias = (params["bih"] + params["bhh"]).reshape(L, 1, H).astype(jnp.float32)
    wout = params["wout"].astype(jnp.float32)                              # (1, H)
    bout = params["bout"].reshape(1, 1).astype(jnp.float32)                # (1, 1)

    y_bt, h_out = pl.pallas_call(
        _rnn_wavefront_kernel,
        out_shape=(
            jax.ShapeDtypeStruct((B, T), jnp.float32),
            jax.ShapeDtypeStruct((L, B, H), jnp.float32),
        ),
        in_specs=[
            pl.BlockSpec(memory_space=pltpu.MemorySpace.VMEM),   # x (whole sequence)
            pl.BlockSpec(memory_space=pltpu.MemorySpace.VMEM),   # h0
            pl.BlockSpec(memory_space=pltpu.MemorySpace.VMEM),   # fused weights
            pl.BlockSpec(memory_space=pltpu.MemorySpace.VMEM),   # fused bias
            pl.BlockSpec(memory_space=pltpu.MemorySpace.VMEM),   # head weight
            pl.BlockSpec(memory_space=pltpu.MemorySpace.SMEM),   # head bias scalar
        ],
        out_specs=(
            pl.BlockSpec(memory_space=pltpu.MemorySpace.VMEM),   # y (B, T) lane-dense
            pl.BlockSpec(memory_space=pltpu.MemorySpace.VMEM),   # final hidden state
        ),
    )(x_pad, h_state, wf, bias, wout, bout)

    return y_bt[:, :, None], h_out


def init_params(key, input_size, hidden=HIDDEN, num_layers=NUM_LAYERS):
    """Deterministic init mirroring nn.RNN / nn.Linear parameter shapes."""
    ks = jax.random.split(key, 7)
    bound = 1.0 / jnp.sqrt(hidden)
    u = lambda k, shape: jax.random.uniform(k, shape, jnp.float32, -bound, bound)
    return {
        "wih0": u(ks[0], (hidden, input_size)),             # layer 0 W_ih
        "wih": u(ks[1], (num_layers - 1, hidden, hidden)),  # layers 1..L-1 W_ih
        "whh": u(ks[2], (num_layers, hidden, hidden)),
        "bih": u(ks[3], (num_layers, hidden)),
        "bhh": u(ks[4], (num_layers, hidden)),
        "wout": u(ks[5], (1, hidden)),                      # nn.Linear(32, 1) weight
        "bout": u(ks[6], (1,)),
    }


def reference_forward(x, h_state, params):
    """Pure-JAX f32 reference matching PyTorch nn.RNN(tanh) + Linear semantics."""
    B, T, IN = x.shape
    L = h_state.shape[0]
    h = [h_state[l] for l in range(L)]
    ys = []
    for t in range(T):
        inp = x[:, t, :]
        for l in range(L):
            wih = params["wih0"] if l == 0 else params["wih"][l - 1]
            h_new = jnp.tanh(inp @ wih.T + params["bih"][l]
                             + h[l] @ params["whh"][l].T + params["bhh"][l])
            h[l] = h_new
            inp = h_new
        ys.append(inp @ params["wout"].T + params["bout"])
    return jnp.stack(ys, axis=1), jnp.stack(h, axis=0)


if __name__ == "__main__":
    INPUT_SIZE = 4
    B, T = 2, 8

    key = jax.random.PRNGKey(0)
    k_x, k_h, k_p = jax.random.split(key, 3)
    x = jax.random.normal(k_x, (B, T, INPUT_SIZE), jnp.float32)
    h0 = jax.random.normal(k_h, (NUM_LAYERS, B, HIDDEN), jnp.float32)
    params = init_params(k_p, INPUT_SIZE)

    y, h_out = radar_rnn4_forward(x, h0, params)
    y = jax.block_until_ready(y)
    h_out = jax.block_until_ready(h_out)

    y_ref, h_ref = reference_forward(x, h0, params)
    assert y.shape == (B, T, 1) and h_out.shape == (NUM_LAYERS, B, HIDDEN)
    # bf16 MXU operands (per perf review); tolerance matches the original test.
    assert jnp.allclose(y, y_ref, atol=3e-2, rtol=3e-2)
    assert jnp.allclose(h_out, h_ref, atol=3e-2, rtol=3e-2)

    print("KERNEL_OK")
</pallas_src>

<mosaic_0001>
module attributes {stable_mosaic.version = 11 : i64} {
  func.func @_rnn_wavefront_kernel(%arg0: memref<8x2x32xf32, #tpu.memory_space<vmem>>, %arg1: memref<8x2x32xf32, #tpu.memory_space<vmem>>, %arg2: memref<8x64x32xbf16, #tpu.memory_space<vmem>>, %arg3: memref<8x1x32xf32, #tpu.memory_space<vmem>>, %arg4: memref<1x32xf32, #tpu.memory_space<vmem>>, %arg5: memref<1x1xf32, #tpu.memory_space<smem>>, %arg6: memref<2x8xf32, #tpu.memory_space<vmem>>, %arg7: memref<8x2x32xf32, #tpu.memory_space<vmem>>) attributes {dimension_semantics = [], scalar_prefetch = 0 : i64, scratch_operands = 0 : i64, tpu.core_type = #tpu.core_type<tc>} {
    %c0 = arith.constant 0 : index
    %c0_0 = arith.constant 0 : index
    %c0_1 = arith.constant 0 : index
    %0 = vector.load %arg2[%c0, %c0_0, %c0_1] : memref<8x64x32xbf16, #tpu.memory_space<vmem>>, vector<8x64x32xbf16>
    %c0_2 = arith.constant 0 : index
    %c0_3 = arith.constant 0 : index
    %c0_4 = arith.constant 0 : index
    %1 = vector.load %arg3[%c0_2, %c0_3, %c0_4] : memref<8x1x32xf32, #tpu.memory_space<vmem>>, vector<8x1x32xf32>
    %c0_5 = arith.constant 0 : index
    %c0_6 = arith.constant 0 : index
    %2 = vector.load %arg4[%c0_5, %c0_6] : memref<1x32xf32, #tpu.memory_space<vmem>>, vector<1x32xf32>
    %c0_7 = arith.constant 0 : index
    %c0_8 = arith.constant 0 : index
    %3 = memref.load %arg5[%c0_7, %c0_8] : memref<1x1xf32, #tpu.memory_space<smem>>
    %4 = tpu.iota {dimensions = array<i32: 0>} : vector<8x2x32xi32>
    %5 = tpu.iota {dimensions = array<i32: 1>} : vector<2x8xi32>
    %c0_9 = arith.constant 0 : index
    %c0_10 = arith.constant 0 : index
    %c0_11 = arith.constant 0 : index
    %6 = vector.load %arg1[%c0_9, %c0_10, %c0_11] : memref<8x2x32xf32, #tpu.memory_space<vmem>>, vector<8x2x32xf32>
    %cst = arith.constant 0.000000e+00 : f32
    %7 = vector.broadcast %cst : f32 to vector<2x8xf32>
    %c0_i32 = arith.constant 0 : i32
    %c7_i32 = arith.constant 7 : i32
    %8 = arith.minsi %c0_i32, %c7_i32 : i32
    %9 = arith.index_cast %8 : i32 to index
    %c0_12 = arith.constant 0 : index
    %c0_13 = arith.constant 0 : index
    %10 = vector.load %arg0[%9, %c0_12, %c0_13] : memref<8x2x32xf32, #tpu.memory_space<vmem>>, vector<1x2x32xf32>
    %11 = vector.shape_cast %10 : vector<1x2x32xf32> to vector<2x32xf32>
    %12 = vector.shape_cast %11 : vector<2x32xf32> to vector<1x2x32xf32>
    %13 = vector.extract_strided_slice %6 {offsets = [0, 0, 0], sizes = [7, 2, 32], strides = [1, 1, 1]} : vector<8x2x32xf32> to vector<7x2x32xf32>
    %14 = tpu.concatenate %12, %13 in 0 : vector<1x2x32xf32>, vector<7x2x32xf32> -> vector<8x2x32xf32>
    %15 = tpu.concatenate %14, %6 in 2 : vector<8x2x32xf32>, vector<8x2x32xf32> -> vector<8x2x64xf32>
    %16 = arith.truncf %15 : vector<8x2x64xf32> to vector<8x2x64xbf16>
    "tpu.trace_start"() <{level = 10 : i32, message = "lbi,lih->lbh"}> : () -> ()
    %cst_14 = arith.constant dense<0.000000e+00> : vector<8x2x32xf32>
    %17 = tpu.matmul %16, %0, %cst_14 {dimension_numbers = #tpu.dot_dimension_numbers<[2], [1], [1], [2], [0, 0, 0, 1, 1, 2], [0], [0]>} : vector<8x2x64xbf16>, vector<8x64x32xbf16>, vector<8x2x32xf32> -> vector<8x2x32xf32>
    "tpu.trace_stop"() : () -> ()
    %18 = vector.broadcast %1 : vector<8x1x32xf32> to vector<8x2x32xf32>
    %19 = arith.addf %17, %18 : vector<8x2x32xf32>
    %20 = math.tanh %19 : vector<8x2x32xf32>
    %21 = vector.broadcast %c0_i32 : i32 to vector<8x2x32xi32>
    %22 = arith.cmpi sle, %4, %21 : vector<8x2x32xi32>
    %c7_i32_15 = arith.constant 7 : i32
    %23 = vector.broadcast %c7_i32_15 : i32 to vector<8x2x32xi32>
    %24 = arith.addi %4, %23 : vector<8x2x32xi32>
    %25 = vector.broadcast %c0_i32 : i32 to vector<8x2x32xi32>
    %26 = arith.cmpi sle, %25, %24 : vector<8x2x32xi32>
    %27 = arith.andi %22, %26 : vector<8x2x32xi1>
    %28 = arith.select %27, %20, %6 : vector<8x2x32xi1>, vector<8x2x32xf32>
    %29 = vector.extract_strided_slice %28 {offsets = [7, 0, 0], sizes = [1, 2, 32], strides = [1, 1, 1]} : vector<8x2x32xf32> to vector<1x2x32xf32>
    %30 = vector.shape_cast %29 : vector<1x2x32xf32> to vector<2x32xf32>
    %31 = vector.broadcast %2 : vector<1x32xf32> to vector<2x32xf32>
    %32 = arith.mulf %30, %31 : vector<2x32xf32>
    %cst_16 = arith.constant dense<0.000000e+00> : vector<2xf32>
    %33 = vector.multi_reduction <add>, %32, %cst_16 [1] : vector<2x32xf32> to vector<2xf32>
    %34 = vector.shape_cast %33 : vector<2xf32> to vector<2x1xf32>
    %35 = vector.broadcast %3 : f32 to vector<2x1xf32>
    %36 = arith.addf %34, %35 : vector<2x1xf32>
    %c7_i32_17 = arith.constant 7 : i32
    %37 = arith.subi %c0_i32, %c7_i32_17 : i32
    %38 = vector.broadcast %37 : i32 to vector<2x8xi32>
    %39 = arith.cmpi eq, %5, %38 : vector<2x8xi32>
    %40 = vector.shape_cast %36 : vector<2x1xf32> to vector<2x1xf32>
    %41 = vector.broadcast %40 : vector<2x1xf32> to vector<2x8xf32>
    %42 = arith.select %39, %41, %7 : vector<2x8xi1>, vector<2x8xf32>
    %c1_i32 = arith.constant 1 : i32
    %c7_i32_18 = arith.constant 7 : i32
    %43 = arith.minsi %c1_i32, %c7_i32_18 : i32
    %44 = arith.index_cast %43 : i32 to index
    %c0_19 = arith.constant 0 : index
    %c0_20 = arith.constant 0 : index
    %45 = vector.load %arg0[%44, %c0_19, %c0_20] : memref<8x2x32xf32, #tpu.memory_space<vmem>>, vector<1x2x32xf32>
    %46 = vector.shape_cast %45 : vector<1x2x32xf32> to vector<2x32xf32>
    %47 = vector.shape_cast %46 : vector<2x32xf32> to vector<1x2x32xf32>
    %48 = vector.extract_strided_slice %28 {offsets = [0, 0, 0], sizes = [7, 2, 32], strides = [1, 1, 1]} : vector<8x2x32xf32> to vector<7x2x32xf32>
    %49 = tpu.concatenate %47, %48 in 0 : vector<1x2x32xf32>, vector<7x2x32xf32> -> vector<8x2x32xf32>
    %50 = tpu.concatenate %49, %28 in 2 : vector<8x2x32xf32>, vector<8x2x32xf32> -> vector<8x2x64xf32>
    %51 = arith.truncf %50 : vector<8x2x64xf32> to vector<8x2x64xbf16>
    "tpu.trace_start"() <{level = 10 : i32, message = "lbi,lih->lbh"}> : () -> ()
    %cst_21 = arith.constant dense<0.000000e+00> : vector<8x2x32xf32>
    %52 = tpu.matmul %51, %0, %cst_21 {dimension_numbers = #tpu.dot_dimension_numbers<[2], [1], [1], [2], [0, 0, 0, 1, 1, 2], [0], [0]>} : vector<8x2x64xbf16>, vector<8x64x32xbf16>, vector<8x2x32xf32> -> vector<8x2x32xf32>
    "tpu.trace_stop"() : () -> ()
    %53 = vector.broadcast %1 : vector<8x1x32xf32> to vector<8x2x32xf32>
    %54 = arith.addf %52, %53 : vector<8x2x32xf32>
    %55 = math.tanh %54 : vector<8x2x32xf32>
    %56 = vector.broadcast %c1_i32 : i32 to vector<8x2x32xi32>
    %57 = arith.cmpi sle, %4, %56 : vector<8x2x32xi32>
    %c7_i32_22 = arith.constant 7 : i32
    %58 = vector.broadcast %c7_i32_22 : i32 to vector<8x2x32xi32>
    %59 = arith.addi %4, %58 : vector<8x2x32xi32>
    %60 = vector.broadcast %c1_i32 : i32 to vector<8x2x32xi32>
    %61 = arith.cmpi sle, %60, %59 : vector<8x2x32xi32>
    %62 = arith.andi %57, %61 : vector<8x2x32xi1>
    %63 = arith.select %62, %55, %28 : vector<8x2x32xi1>, vector<8x2x32xf32>
    %64 = vector.extract_strided_slice %63 {offsets = [7, 0, 0], sizes = [1, 2, 32], strides = [1, 1, 1]} : vector<8x2x32xf32> to vector<1x2x32xf32>
    %65 = vector.shape_cast %64 : vector<1x2x32xf32> to vector<2x32xf32>
    %66 = vector.broadcast %2 : vector<1x32xf32> to vector<2x32xf32>
    %67 = arith.mulf %65, %66 : vector<2x32xf32>
    %cst_23 = arith.constant dense<0.000000e+00> : vector<2xf32>
    %68 = vector.multi_reduction <add>, %67, %cst_23 [1] : vector<2x32xf32> to vector<2xf32>
    %69 = vector.shape_cast %68 : vector<2xf32> to vector<2x1xf32>
    %70 = vector.broadcast %3 : f32 to vector<2x1xf32>
    %71 = arith.addf %69, %70 : vector<2x1xf32>
    %c7_i32_24 = arith.constant 7 : i32
    %72 = arith.subi %c1_i32, %c7_i32_24 : i32
    %73 = vector.broadcast %72 : i32 to vector<2x8xi32>
    %74 = arith.cmpi eq, %5, %73 : vector<2x8xi32>
    %75 = vector.shape_cast %71 : vector<2x1xf32> to vector<2x1xf32>
    %76 = vector.broadcast %75 : vector<2x1xf32> to vector<2x8xf32>
    %77 = arith.select %74, %76, %42 : vector<2x8xi1>, vector<2x8xf32>
    %c2_i32 = arith.constant 2 : i32
    %c7_i32_25 = arith.constant 7 : i32
    %78 = arith.minsi %c2_i32, %c7_i32_25 : i32
    %79 = arith.index_cast %78 : i32 to index
    %c0_26 = arith.constant 0 : index
    %c0_27 = arith.constant 0 : index
    %80 = vector.load %arg0[%79, %c0_26, %c0_27] : memref<8x2x32xf32, #tpu.memory_space<vmem>>, vector<1x2x32xf32>
    %81 = vector.shape_cast %80 : vector<1x2x32xf32> to vector<2x32xf32>
    %82 = vector.shape_cast %81 : vector<2x32xf32> to vector<1x2x32xf32>
    %83 = vector.extract_strided_slice %63 {offsets = [0, 0, 0], sizes = [7, 2, 32], strides = [1, 1, 1]} : vector<8x2x32xf32> to vector<7x2x32xf32>
    %84 = tpu.concatenate %82, %83 in 0 : vector<1x2x32xf32>, vector<7x2x32xf32> -> vector<8x2x32xf32>
    %85 = tpu.concatenate %84, %63 in 2 : vector<8x2x32xf32>, vector<8x2x32xf32> -> vector<8x2x64xf32>
    %86 = arith.truncf %85 : vector<8x2x64xf32> to vector<8x2x64xbf16>
    "tpu.trace_start"() <{level = 10 : i32, message = "lbi,lih->lbh"}> : () -> ()
    %cst_28 = arith.constant dense<0.000000e+00> : vector<8x2x32xf32>
    %87 = tpu.matmul %86, %0, %cst_28 {dimension_numbers = #tpu.dot_dimension_numbers<[2], [1], [1], [2], [0, 0, 0, 1, 1, 2], [0], [0]>} : vector<8x2x64xbf16>, vector<8x64x32xbf16>, vector<8x2x32xf32> -> vector<8x2x32xf32>
    "tpu.trace_stop"() : () -> ()
    %88 = vector.broadcast %1 : vector<8x1x32xf32> to vector<8x2x32xf32>
    %89 = arith.addf %87, %88 : vector<8x2x32xf32>
    %90 = math.tanh %89 : vector<8x2x32xf32>
    %91 = vector.broadcast %c2_i32 : i32 to vector<8x2x32xi32>
    %92 = arith.cmpi sle, %4, %91 : vector<8x2x32xi32>
    %c7_i32_29 = arith.constant 7 : i32
    %93 = vector.broadcast %c7_i32_29 : i32 to vector<8x2x32xi32>
    %94 = arith.addi %4, %93 : vector<8x2x32xi32>
    %95 = vector.broadcast %c2_i32 : i32 to vector<8x2x32xi32>
    %96 = arith.cmpi sle, %95, %94 : vector<8x2x32xi32>
    %97 = arith.andi %92, %96 : vector<8x2x32xi1>
    %98 = arith.select %97, %90, %63 : vector<8x2x32xi1>, vector<8x2x32xf32>
    %99 = vector.extract_strided_slice %98 {offsets = [7, 0, 0], sizes = [1, 2, 32], strides = [1, 1, 1]} : vector<8x2x32xf32> to vector<1x2x32xf32>
    %100 = vector.shape_cast %99 : vector<1x2x32xf32> to vector<2x32xf32>
    %101 = vector.broadcast %2 : vector<1x32xf32> to vector<2x32xf32>
    %102 = arith.mulf %100, %101 : vector<2x32xf32>
    %cst_30 = arith.constant dense<0.000000e+00> : vector<2xf32>
    %103 = vector.multi_reduction <add>, %102, %cst_30 [1] : vector<2x32xf32> to vector<2xf32>
    %104 = vector.shape_cast %103 : vector<2xf32> to vector<2x1xf32>
    %105 = vector.broadcast %3 : f32 to vector<2x1xf32>
    %106 = arith.addf %104, %105 : vector<2x1xf32>
    %c7_i32_31 = arith.constant 7 : i32
    %107 = arith.subi %c2_i32, %c7_i32_31 : i32
    %108 = vector.broadcast %107 : i32 to vector<2x8xi32>
    %109 = arith.cmpi eq, %5, %108 : vector<2x8xi32>
    %110 = vector.shape_cast %106 : vector<2x1xf32> to vector<2x1xf32>
    %111 = vector.broadcast %110 : vector<2x1xf32> to vector<2x8xf32>
    %112 = arith.select %109, %111, %77 : vector<2x8xi1>, vector<2x8xf32>
    %c3_i32 = arith.constant 3 : i32
    %c7_i32_32 = arith.constant 7 : i32
    %113 = arith.minsi %c3_i32, %c7_i32_32 : i32
    %114 = arith.index_cast %113 : i32 to index
    %c0_33 = arith.constant 0 : index
    %c0_34 = arith.constant 0 : index
    %115 = vector.load %arg0[%114, %c0_33, %c0_34] : memref<8x2x32xf32, #tpu.memory_space<vmem>>, vector<1x2x32xf32>
    %116 = vector.shape_cast %115 : vector<1x2x32xf32> to vector<2x32xf32>
    %117 = vector.shape_cast %116 : vector<2x32xf32> to vector<1x2x32xf32>
    %118 = vector.extract_strided_slice %98 {offsets = [0, 0, 0], sizes = [7, 2, 32], strides = [1, 1, 1]} : vector<8x2x32xf32> to vector<7x2x32xf32>
    %119 = tpu.concatenate %117, %118 in 0 : vector<1x2x32xf32>, vector<7x2x32xf32> -> vector<8x2x32xf32>
    %120 = tpu.concatenate %119, %98 in 2 : vector<8x2x32xf32>, vector<8x2x32xf32> -> vector<8x2x64xf32>
    %121 = arith.truncf %120 : vector<8x2x64xf32> to vector<8x2x64xbf16>
    "tpu.trace_start"() <{level = 10 : i32, message = "lbi,lih->lbh"}> : () -> ()
    %cst_35 = arith.constant dense<0.000000e+00> : vector<8x2x32xf32>
    %122 = tpu.matmul %121, %0, %cst_35 {dimension_numbers = #tpu.dot_dimension_numbers<[2], [1], [1], [2], [0, 0, 0, 1, 1, 2], [0], [0]>} : vector<8x2x64xbf16>, vector<8x64x32xbf16>, vector<8x2x32xf32> -> vector<8x2x32xf32>
    "tpu.trace_stop"() : () -> ()
    %123 = vector.broadcast %1 : vector<8x1x32xf32> to vector<8x2x32xf32>
    %124 = arith.addf %122, %123 : vector<8x2x32xf32>
    %125 = math.tanh %124 : vector<8x2x32xf32>
    %126 = vector.broadcast %c3_i32 : i32 to vector<8x2x32xi32>
    %127 = arith.cmpi sle, %4, %126 : vector<8x2x32xi32>
    %c7_i32_36 = arith.constant 7 : i32
    %128 = vector.broadcast %c7_i32_36 : i32 to vector<8x2x32xi32>
    %129 = arith.addi %4, %128 : vector<8x2x32xi32>
    %130 = vector.broadcast %c3_i32 : i32 to vector<8x2x32xi32>
    %131 = arith.cmpi sle, %130, %129 : vector<8x2x32xi32>
    %132 = arith.andi %127, %131 : vector<8x2x32xi1>
    %133 = arith.select %132, %125, %98 : vector<8x2x32xi1>, vector<8x2x32xf32>
    %134 = vector.extract_strided_slice %133 {offsets = [7, 0, 0], sizes = [1, 2, 32], strides = [1, 1, 1]} : vector<8x2x32xf32> to vector<1x2x32xf32>
    %135 = vector.shape_cast %134 : vector<1x2x32xf32> to vector<2x32xf32>
    %136 = vector.broadcast %2 : vector<1x32xf32> to vector<2x32xf32>
    %137 = arith.mulf %135, %136 : vector<2x32xf32>
    %cst_37 = arith.constant dense<0.000000e+00> : vector<2xf32>
    %138 = vector.multi_reduction <add>, %137, %cst_37 [1] : vector<2x32xf32> to vector<2xf32>
    %139 = vector.shape_cast %138 : vector<2xf32> to vector<2x1xf32>
    %140 = vector.broadcast %3 : f32 to vector<2x1xf32>
    %141 = arith.addf %139, %140 : vector<2x1xf32>
    %c7_i32_38 = arith.constant 7 : i32
    %142 = arith.subi %c3_i32, %c7_i32_38 : i32
    %143 = vector.broadcast %142 : i32 to vector<2x8xi32>
    %144 = arith.cmpi eq, %5, %143 : vector<2x8xi32>
    %145 = vector.shape_cast %141 : vector<2x1xf32> to vector<2x1xf32>
    %146 = vector.broadcast %145 : vector<2x1xf32> to vector<2x8xf32>
    %147 = arith.select %144, %146, %112 : vector<2x8xi1>, vector<2x8xf32>
    %c4_i32 = arith.constant 4 : i32
    %c7_i32_39 = arith.constant 7 : i32
    %148 = arith.minsi %c4_i32, %c7_i32_39 : i32
    %149 = arith.index_cast %148 : i32 to index
    %c0_40 = arith.constant 0 : index
    %c0_41 = arith.constant 0 : index
    %150 = vector.load %arg0[%149, %c0_40, %c0_41] : memref<8x2x32xf32, #tpu.memory_space<vmem>>, vector<1x2x32xf32>
    %151 = vector.shape_cast %150 : vector<1x2x32xf32> to vector<2x32xf32>
    %152 = vector.shape_cast %151 : vector<2x32xf32> to vector<1x2x32xf32>
    %153 = vector.extract_strided_slice %133 {offsets = [0, 0, 0], sizes = [7, 2, 32], strides = [1, 1, 1]} : vector<8x2x32xf32> to vector<7x2x32xf32>
    %154 = tpu.concatenate %152, %153 in 0 : vector<1x2x32xf32>, vector<7x2x32xf32> -> vector<8x2x32xf32>
    %155 = tpu.concatenate %154, %133 in 2 : vector<8x2x32xf32>, vector<8x2x32xf32> -> vector<8x2x64xf32>
    %156 = arith.truncf %155 : vector<8x2x64xf32> to vector<8x2x64xbf16>
    "tpu.trace_start"() <{level = 10 : i32, message = "lbi,lih->lbh"}> : () -> ()
    %cst_42 = arith.constant dense<0.000000e+00> : vector<8x2x32xf32>
    %157 = tpu.matmul %156, %0, %cst_42 {dimension_numbers = #tpu.dot_dimension_numbers<[2], [1], [1], [2], [0, 0, 0, 1, 1, 2], [0], [0]>} : vector<8x2x64xbf16>, vector<8x64x32xbf16>, vector<8x2x32xf32> -> vector<8x2x32xf32>
    "tpu.trace_stop"() : () -> ()
    %158 = vector.broadcast %1 : vector<8x1x32xf32> to vector<8x2x32xf32>
    %159 = arith.addf %157, %158 : vector<8x2x32xf32>
    %160 = math.tanh %159 : vector<8x2x32xf32>
    %161 = vector.broadcast %c4_i32 : i32 to vector<8x2x32xi32>
    %162 = arith.cmpi sle, %4, %161 : vector<8x2x32xi32>
    %c7_i32_43 = arith.constant 7 : i32
    %163 = vector.broadcast %c7_i32_43 : i32 to vector<8x2x32xi32>
    %164 = arith.addi %4, %163 : vector<8x2x32xi32>
    %165 = vector.broadcast %c4_i32 : i32 to vector<8x2x32xi32>
    %166 = arith.cmpi sle, %165, %164 : vector<8x2x32xi32>
    %167 = arith.andi %162, %166 : vector<8x2x32xi1>
    %168 = arith.select %167, %160, %133 : vector<8x2x32xi1>, vector<8x2x32xf32>
    %169 = vector.extract_strided_slice %168 {offsets = [7, 0, 0], sizes = [1, 2, 32], strides = [1, 1, 1]} : vector<8x2x32xf32> to vector<1x2x32xf32>
    %170 = vector.shape_cast %169 : vector<1x2x32xf32> to vector<2x32xf32>
    %171 = vector.broadcast %2 : vector<1x32xf32> to vector<2x32xf32>
    %172 = arith.mulf %170, %171 : vector<2x32xf32>
    %cst_44 = arith.constant dense<0.000000e+00> : vector<2xf32>
    %173 = vector.multi_reduction <add>, %172, %cst_44 [1] : vector<2x32xf32> to vector<2xf32>
    %174 = vector.shape_cast %173 : vector<2xf32> to vector<2x1xf32>
    %175 = vector.broadcast %3 : f32 to vector<2x1xf32>
    %176 = arith.addf %174, %175 : vector<2x1xf32>
    %c7_i32_45 = arith.constant 7 : i32
    %177 = arith.subi %c4_i32, %c7_i32_45 : i32
    %178 = vector.broadcast %177 : i32 to vector<2x8xi32>
    %179 = arith.cmpi eq, %5, %178 : vector<2x8xi32>
    %180 = vector.shape_cast %176 : vector<2x1xf32> to vector<2x1xf32>
    %181 = vector.broadcast %180 : vector<2x1xf32> to vector<2x8xf32>
    %182 = arith.select %179, %181, %147 : vector<2x8xi1>, vector<2x8xf32>
    %c5_i32 = arith.constant 5 : i32
    %c7_i32_46 = arith.constant 7 : i32
    %183 = arith.minsi %c5_i32, %c7_i32_46 : i32
    %184 = arith.index_cast %183 : i32 to index
    %c0_47 = arith.constant 0 : index
    %c0_48 = arith.constant 0 : index
    %185 = vector.load %arg0[%184, %c0_47, %c0_48] : memref<8x2x32xf32, #tpu.memory_space<vmem>>, vector<1x2x32xf32>
    %186 = vector.shape_cast %185 : vector<1x2x32xf32> to vector<2x32xf32>
    %187 = vector.shape_cast %186 : vector<2x32xf32> to vector<1x2x32xf32>
    %188 = vector.extract_strided_slice %168 {offsets = [0, 0, 0], sizes = [7, 2, 32], strides = [1, 1, 1]} : vector<8x2x32xf32> to vector<7x2x32xf32>
    %189 = tpu.concatenate %187, %188 in 0 : vector<1x2x32xf32>, vector<7x2x32xf32> -> vector<8x2x32xf32>
    %190 = tpu.concatenate %189, %168 in 2 : vector<8x2x32xf32>, vector<8x2x32xf32> -> vector<8x2x64xf32>
    %191 = arith.truncf %190 : vector<8x2x64xf32> to vector<8x2x64xbf16>
    "tpu.trace_start"() <{level = 10 : i32, message = "lbi,lih->lbh"}> : () -> ()
    %cst_49 = arith.constant dense<0.000000e+00> : vector<8x2x32xf32>
    %192 = tpu.matmul %191, %0, %cst_49 {dimension_numbers = #tpu.dot_dimension_numbers<[2], [1], [1], [2], [0, 0, 0, 1, 1, 2], [0], [0]>} : vector<8x2x64xbf16>, vector<8x64x32xbf16>, vector<8x2x32xf32> -> vector<8x2x32xf32>
    "tpu.trace_stop"() : () -> ()
    %193 = vector.broadcast %1 : vector<8x1x32xf32> to vector<8x2x32xf32>
    %194 = arith.addf %192, %193 : vector<8x2x32xf32>
    %195 = math.tanh %194 : vector<8x2x32xf32>
    %196 = vector.broadcast %c5_i32 : i32 to vector<8x2x32xi32>
    %197 = arith.cmpi sle, %4, %196 : vector<8x2x32xi32>
    %c7_i32_50 = arith.constant 7 : i32
    %198 = vector.broadcast %c7_i32_50 : i32 to vector<8x2x32xi32>
    %199 = arith.addi %4, %198 : vector<8x2x32xi32>
    %200 = vector.broadcast %c5_i32 : i32 to vector<8x2x32xi32>
    %201 = arith.cmpi sle, %200, %199 : vector<8x2x32xi32>
    %202 = arith.andi %197, %201 : vector<8x2x32xi1>
    %203 = arith.select %202, %195, %168 : vector<8x2x32xi1>, vector<8x2x32xf32>
    %204 = vector.extract_strided_slice %203 {offsets = [7, 0, 0], sizes = [1, 2, 32], strides = [1, 1, 1]} : vector<8x2x32xf32> to vector<1x2x32xf32>
    %205 = vector.shape_cast %204 : vector<1x2x32xf32> to vector<2x32xf32>
    %206 = vector.broadcast %2 : vector<1x32xf32> to vector<2x32xf32>
    %207 = arith.mulf %205, %206 : vector<2x32xf32>
    %cst_51 = arith.constant dense<0.000000e+00> : vector<2xf32>
    %208 = vector.multi_reduction <add>, %207, %cst_51 [1] : vector<2x32xf32> to vector<2xf32>
    %209 = vector.shape_cast %208 : vector<2xf32> to vector<2x1xf32>
    %210 = vector.broadcast %3 : f32 to vector<2x1xf32>
    %211 = arith.addf %209, %210 : vector<2x1xf32>
    %c7_i32_52 = arith.constant 7 : i32
    %212 = arith.subi %c5_i32, %c7_i32_52 : i32
    %213 = vector.broadcast %212 : i32 to vector<2x8xi32>
    %214 = arith.cmpi eq, %5, %213 : vector<2x8xi32>
    %215 = vector.shape_cast %211 : vector<2x1xf32> to vector<2x1xf32>
    %216 = vector.broadcast %215 : vector<2x1xf32> to vector<2x8xf32>
    %217 = arith.select %214, %216, %182 : vector<2x8xi1>, vector<2x8xf32>
    %c6_i32 = arith.constant 6 : i32
    %c7_i32_53 = arith.constant 7 : i32
    %218 = arith.minsi %c6_i32, %c7_i32_53 : i32
    %219 = arith.index_cast %218 : i32 to index
    %c0_54 = arith.constant 0 : index
    %c0_55 = arith.constant 0 : index
    %220 = vector.load %arg0[%219, %c0_54, %c0_55] : memref<8x2x32xf32, #tpu.memory_space<vmem>>, vector<1x2x32xf32>
    %221 = vector.shape_cast %220 : vector<1x2x32xf32> to vector<2x32xf32>
    %222 = vector.shape_cast %221 : vector<2x32xf32> to vector<1x2x32xf32>
    %223 = vector.extract_strided_slice %203 {offsets = [0, 0, 0], sizes = [7, 2, 32], strides = [1, 1, 1]} : vector<8x2x32xf32> to vector<7x2x32xf32>
    %224 = tpu.concatenate %222, %223 in 0 : vector<1x2x32xf32>, vector<7x2x32xf32> -> vector<8x2x32xf32>
    %225 = tpu.concatenate %224, %203 in 2 : vector<8x2x32xf32>, vector<8x2x32xf32> -> vector<8x2x64xf32>
    %226 = arith.truncf %225 : vector<8x2x64xf32> to vector<8x2x64xbf16>
    "tpu.trace_start"() <{level = 10 : i32, message = "lbi,lih->lbh"}> : () -> ()
    %cst_56 = arith.constant dense<0.000000e+00> : vector<8x2x32xf32>
    %227 = tpu.matmul %226, %0, %cst_56 {dimension_numbers = #tpu.dot_dimension_numbers<[2], [1], [1], [2], [0, 0, 0, 1, 1, 2], [0], [0]>} : vector<8x2x64xbf16>, vector<8x64x32xbf16>, vector<8x2x32xf32> -> vector<8x2x32xf32>
    "tpu.trace_stop"() : () -> ()
    %228 = vector.broadcast %1 : vector<8x1x32xf32> to vector<8x2x32xf32>
    %229 = arith.addf %227, %228 : vector<8x2x32xf32>
    %230 = math.tanh %229 : vector<8x2x32xf32>
    %231 = vector.broadcast %c6_i32 : i32 to vector<8x2x32xi32>
    %232 = arith.cmpi sle, %4, %231 : vector<8x2x32xi32>
    %c7_i32_57 = arith.constant 7 : i32
    %233 = vector.broadcast %c7_i32_57 : i32 to vector<8x2x32xi32>
    %234 = arith.addi %4, %233 : vector<8x2x32xi32>
    %235 = vector.broadcast %c6_i32 : i32 to vector<8x2x32xi32>
    %236 = arith.cmpi sle, %235, %234 : vector<8x2x32xi32>
    %237 = arith.andi %232, %236 : vector<8x2x32xi1>
    %238 = arith.select %237, %230, %203 : vector<8x2x32xi1>, vector<8x2x32xf32>
    %239 = vector.extract_strided_slice %238 {offsets = [7, 0, 0], sizes = [1, 2, 32], strides = [1, 1, 1]} : vector<8x2x32xf32> to vector<1x2x32xf32>
    %240 = vector.shape_cast %239 : vector<1x2x32xf32> to vector<2x32xf32>
    %241 = vector.broadcast %2 : vector<1x32xf32> to vector<2x32xf32>
    %242 = arith.mulf %240, %241 : vector<2x32xf32>
    %cst_58 = arith.constant dense<0.000000e+00> : vector<2xf32>
    %243 = vector.multi_reduction <add>, %242, %cst_58 [1] : vector<2x32xf32> to vector<2xf32>
    %244 = vector.shape_cast %243 : vector<2xf32> to vector<2x1xf32>
    %245 = vector.broadcast %3 : f32 to vector<2x1xf32>
    %246 = arith.addf %244, %245 : vector<2x1xf32>
    %c7_i32_59 = arith.constant 7 : i32
    %247 = arith.subi %c6_i32, %c7_i32_59 : i32
    %248 = vector.broadcast %247 : i32 to vector<2x8xi32>
    %249 = arith.cmpi eq, %5, %248 : vector<2x8xi32>
    %250 = vector.shape_cast %246 : vector<2x1xf32> to vector<2x1xf32>
    %251 = vector.broadcast %250 : vector<2x1xf32> to vector<2x8xf32>
    %252 = arith.select %249, %251, %217 : vector<2x8xi1>, vector<2x8xf32>
    %c7_i32_60 = arith.constant 7 : i32
    %c7_i32_61 = arith.constant 7 : i32
    %253 = arith.minsi %c7_i32_60, %c7_i32_61 : i32
    %254 = arith.index_cast %253 : i32 to index
    %c0_62 = arith.constant 0 : index
    %c0_63 = arith.constant 0 : index
    %255 = vector.load %arg0[%254, %c0_62, %c0_63] : memref<8x2x32xf32, #tpu.memory_space<vmem>>, vector<1x2x32xf32>
    %256 = vector.shape_cast %255 : vector<1x2x32xf32> to vector<2x32xf32>
    %257 = vector.shape_cast %256 : vector<2x32xf32> to vector<1x2x32xf32>
    %258 = vector.extract_strided_slice %238 {offsets = [0, 0, 0], sizes = [7, 2, 32], strides = [1, 1, 1]} : vector<8x2x32xf32> to vector<7x2x32xf32>
    %259 = tpu.concatenate %257, %258 in 0 : vector<1x2x32xf32>, vector<7x2x32xf32> -> vector<8x2x32xf32>
    %260 = tpu.concatenate %259, %238 in 2 : vector<8x2x32xf32>, vector<8x2x32xf32> -> vector<8x2x64xf32>
    %261 = arith.truncf %260 : vector<8x2x64xf32> to vector<8x2x64xbf16>
    "tpu.trace_start"() <{level = 10 : i32, message = "lbi,lih->lbh"}> : () -> ()
    %cst_64 = arith.constant dense<0.000000e+00> : vector<8x2x32xf32>
    %262 = tpu.matmul %261, %0, %cst_64 {dimension_numbers = #tpu.dot_dimension_numbers<[2], [1], [1], [2], [0, 0, 0, 1, 1, 2], [0], [0]>} : vector<8x2x64xbf16>, vector<8x64x32xbf16>, vector<8x2x32xf32> -> vector<8x2x32xf32>
    "tpu.trace_stop"() : () -> ()
    %263 = vector.broadcast %1 : vector<8x1x32xf32> to vector<8x2x32xf32>
    %264 = arith.addf %262, %263 : vector<8x2x32xf32>
    %265 = math.tanh %264 : vector<8x2x32xf32>
    %266 = vector.broadcast %c7_i32_60 : i32 to vector<8x2x32xi32>
    %267 = arith.cmpi sle, %4, %266 : vector<8x2x32xi32>
    %c7_i32_65 = arith.constant 7 : i32
    %268 = vector.broadcast %c7_i32_65 : i32 to vector<8x2x32xi32>
    %269 = arith.addi %4, %268 : vector<8x2x32xi32>
    %270 = vector.broadcast %c7_i32_60 : i32 to vector<8x2x32xi32>
    %271 = arith.cmpi sle, %270, %269 : vector<8x2x32xi32>
    %272 = arith.andi %267, %271 : vector<8x2x32xi1>
    %273 = arith.select %272, %265, %238 : vector<8x2x32xi1>, vector<8x2x32xf32>
    %274 = vector.extract_strided_slice %273 {offsets = [7, 0, 0], sizes = [1, 2, 32], strides = [1, 1, 1]} : vector<8x2x32xf32> to vector<1x2x32xf32>
    %275 = vector.shape_cast %274 : vector<1x2x32xf32> to vector<2x32xf32>
    %276 = vector.broadcast %2 : vector<1x32xf32> to vector<2x32xf32>
    %277 = arith.mulf %275, %276 : vector<2x32xf32>
    %cst_66 = arith.constant dense<0.000000e+00> : vector<2xf32>
    %278 = vector.multi_reduction <add>, %277, %cst_66 [1] : vector<2x32xf32> to vector<2xf32>
    %279 = vector.shape_cast %278 : vector<2xf32> to vector<2x1xf32>
    %280 = vector.broadcast %3 : f32 to vector<2x1xf32>
    %281 = arith.addf %279, %280 : vector<2x1xf32>
    %c7_i32_67 = arith.constant 7 : i32
    %282 = arith.subi %c7_i32_60, %c7_i32_67 : i32
    %283 = vector.broadcast %282 : i32 to vector<2x8xi32>
    %284 = arith.cmpi eq, %5, %283 : vector<2x8xi32>
    %285 = vector.shape_cast %281 : vector<2x1xf32> to vector<2x1xf32>
    %286 = vector.broadcast %285 : vector<2x1xf32> to vector<2x8xf32>
    %287 = arith.select %284, %286, %252 : vector<2x8xi1>, vector<2x8xf32>
    %c8_i32 = arith.constant 8 : i32
    %c7_i32_68 = arith.constant 7 : i32
    %288 = arith.minsi %c8_i32, %c7_i32_68 : i32
    %289 = arith.index_cast %288 : i32 to index
    %c0_69 = arith.constant 0 : index
    %c0_70 = arith.constant 0 : index
    %290 = vector.load %arg0[%289, %c0_69, %c0_70] : memref<8x2x32xf32, #tpu.memory_space<vmem>>, vector<1x2x32xf32>
    %291 = vector.shape_cast %290 : vector<1x2x32xf32> to vector<2x32xf32>
    %292 = vector.shape_cast %291 : vector<2x32xf32> to vector<1x2x32xf32>
    %293 = vector.extract_strided_slice %273 {offsets = [0, 0, 0], sizes = [7, 2, 32], strides = [1, 1, 1]} : vector<8x2x32xf32> to vector<7x2x32xf32>
    %294 = tpu.concatenate %292, %293 in 0 : vector<1x2x32xf32>, vector<7x2x32xf32> -> vector<8x2x32xf32>
    %295 = tpu.concatenate %294, %273 in 2 : vector<8x2x32xf32>, vector<8x2x32xf32> -> vector<8x2x64xf32>
    %296 = arith.truncf %295 : vector<8x2x64xf32> to vector<8x2x64xbf16>
    "tpu.trace_start"() <{level = 10 : i32, message = "lbi,lih->lbh"}> : () -> ()
    %cst_71 = arith.constant dense<0.000000e+00> : vector<8x2x32xf32>
    %297 = tpu.matmul %296, %0, %cst_71 {dimension_numbers = #tpu.dot_dimension_numbers<[2], [1], [1], [2], [0, 0, 0, 1, 1, 2], [0], [0]>} : vector<8x2x64xbf16>, vector<8x64x32xbf16>, vector<8x2x32xf32> -> vector<8x2x32xf32>
    "tpu.trace_stop"() : () -> ()
    %298 = vector.broadcast %1 : vector<8x1x32xf32> to vector<8x2x32xf32>
    %299 = arith.addf %297, %298 : vector<8x2x32xf32>
    %300 = math.tanh %299 : vector<8x2x32xf32>
    %301 = vector.broadcast %c8_i32 : i32 to vector<8x2x32xi32>
    %302 = arith.cmpi sle, %4, %301 : vector<8x2x32xi32>
    %c7_i32_72 = arith.constant 7 : i32
    %303 = vector.broadcast %c7_i32_72 : i32 to vector<8x2x32xi32>
    %304 = arith.addi %4, %303 : vector<8x2x32xi32>
    %305 = vector.broadcast %c8_i32 : i32 to vector<8x2x32xi32>
    %306 = arith.cmpi sle, %305, %304 : vector<8x2x32xi32>
    %307 = arith.andi %302, %306 : vector<8x2x32xi1>
    %308 = arith.select %307, %300, %273 : vector<8x2x32xi1>, vector<8x2x32xf32>
    %309 = vector.extract_strided_slice %308 {offsets = [7, 0, 0], sizes = [1, 2, 32], strides = [1, 1, 1]} : vector<8x2x32xf32> to vector<1x2x32xf32>
    %310 = vector.shape_cast %309 : vector<1x2x32xf32> to vector<2x32xf32>
    %311 = vector.broadcast %2 : vector<1x32xf32> to vector<2x32xf32>
    %312 = arith.mulf %310, %311 : vector<2x32xf32>
    %cst_73 = arith.constant dense<0.000000e+00> : vector<2xf32>
    %313 = vector.multi_reduction <add>, %312, %cst_73 [1] : vector<2x32xf32> to vector<2xf32>
    %314 = vector.shape_cast %313 : vector<2xf32> to vector<2x1xf32>
    %315 = vector.broadcast %3 : f32 to vector<2x1xf32>
    %316 = arith.addf %314, %315 : vector<2x1xf32>
    %c7_i32_74 = arith.constant 7 : i32
    %317 = arith.subi %c8_i32, %c7_i32_74 : i32
    %318 = vector.broadcast %317 : i32 to vector<2x8xi32>
    %319 = arith.cmpi eq, %5, %318 : vector<2x8xi32>
    %320 = vector.shape_cast %316 : vector<2x1xf32> to vector<2x1xf32>
    %321 = vector.broadcast %320 : vector<2x1xf32> to vector<2x8xf32>
    %322 = arith.select %319, %321, %287 : vector<2x8xi1>, vector<2x8xf32>
    %c9_i32 = arith.constant 9 : i32
    %c7_i32_75 = arith.constant 7 : i32
    %323 = arith.minsi %c9_i32, %c7_i32_75 : i32
    %324 = arith.index_cast %323 : i32 to index
    %c0_76 = arith.constant 0 : index
    %c0_77 = arith.constant 0 : index
    %325 = vector.load %arg0[%324, %c0_76, %c0_77] : memref<8x2x32xf32, #tpu.memory_space<vmem>>, vector<1x2x32xf32>
    %326 = vector.shape_cast %325 : vector<1x2x32xf32> to vector<2x32xf32>
    %327 = vector.shape_cast %326 : vector<2x32xf32> to vector<1x2x32xf32>
    %328 = vector.extract_strided_slice %308 {offsets = [0, 0, 0], sizes = [7, 2, 32], strides = [1, 1, 1]} : vector<8x2x32xf32> to vector<7x2x32xf32>
    %329 = tpu.concatenate %327, %328 in 0 : vector<1x2x32xf32>, vector<7x2x32xf32> -> vector<8x2x32xf32>
    %330 = tpu.concatenate %329, %308 in 2 : vector<8x2x32xf32>, vector<8x2x32xf32> -> vector<8x2x64xf32>
    %331 = arith.truncf %330 : vector<8x2x64xf32> to vector<8x2x64xbf16>
    "tpu.trace_start"() <{level = 10 : i32, message = "lbi,lih->lbh"}> : () -> ()
    %cst_78 = arith.constant dense<0.000000e+00> : vector<8x2x32xf32>
    %332 = tpu.matmul %331, %0, %cst_78 {dimension_numbers = #tpu.dot_dimension_numbers<[2], [1], [1], [2], [0, 0, 0, 1, 1, 2], [0], [0]>} : vector<8x2x64xbf16>, vector<8x64x32xbf16>, vector<8x2x32xf32> -> vector<8x2x32xf32>
    "tpu.trace_stop"() : () -> ()
    %333 = vector.broadcast %1 : vector<8x1x32xf32> to vector<8x2x32xf32>
    %334 = arith.addf %332, %333 : vector<8x2x32xf32>
    %335 = math.tanh %334 : vector<8x2x32xf32>
    %336 = vector.broadcast %c9_i32 : i32 to vector<8x2x32xi32>
    %337 = arith.cmpi sle, %4, %336 : vector<8x2x32xi32>
    %c7_i32_79 = arith.constant 7 : i32
    %338 = vector.broadcast %c7_i32_79 : i32 to vector<8x2x32xi32>
    %339 = arith.addi %4, %338 : vector<8x2x32xi32>
    %340 = vector.broadcast %c9_i32 : i32 to vector<8x2x32xi32>
    %341 = arith.cmpi sle, %340, %339 : vector<8x2x32xi32>
    %342 = arith.andi %337, %341 : vector<8x2x32xi1>
    %343 = arith.select %342, %335, %308 : vector<8x2x32xi1>, vector<8x2x32xf32>
    %344 = vector.extract_strided_slice %343 {offsets = [7, 0, 0], sizes = [1, 2, 32], strides = [1, 1, 1]} : vector<8x2x32xf32> to vector<1x2x32xf32>
    %345 = vector.shape_cast %344 : vector<1x2x32xf32> to vector<2x32xf32>
    %346 = vector.broadcast %2 : vector<1x32xf32> to vector<2x32xf32>
    %347 = arith.mulf %345, %346 : vector<2x32xf32>
    %cst_80 = arith.constant dense<0.000000e+00> : vector<2xf32>
    %348 = vector.multi_reduction <add>, %347, %cst_80 [1] : vector<2x32xf32> to vector<2xf32>
    %349 = vector.shape_cast %348 : vector<2xf32> to vector<2x1xf32>
    %350 = vector.broadcast %3 : f32 to vector<2x1xf32>
    %351 = arith.addf %349, %350 : vector<2x1xf32>
    %c7_i32_81 = arith.constant 7 : i32
    %352 = arith.subi %c9_i32, %c7_i32_81 : i32
    %353 = vector.broadcast %352 : i32 to vector<2x8xi32>
    %354 = arith.cmpi eq, %5, %353 : vector<2x8xi32>
    %355 = vector.shape_cast %351 : vector<2x1xf32> to vector<2x1xf32>
    %356 = vector.broadcast %355 : vector<2x1xf32> to vector<2x8xf32>
    %357 = arith.select %354, %356, %322 : vector<2x8xi1>, vector<2x8xf32>
    %c10_i32 = arith.constant 10 : i32
    %c7_i32_82 = arith.constant 7 : i32
    %358 = arith.minsi %c10_i32, %c7_i32_82 : i32
    %359 = arith.index_cast %358 : i32 to index
    %c0_83 = arith.constant 0 : index
    %c0_84 = arith.constant 0 : index
    %360 = vector.load %arg0[%359, %c0_83, %c0_84] : memref<8x2x32xf32, #tpu.memory_space<vmem>>, vector<1x2x32xf32>
    %361 = vector.shape_cast %360 : vector<1x2x32xf32> to vector<2x32xf32>
    %362 = vector.shape_cast %361 : vector<2x32xf32> to vector<1x2x32xf32>
    %363 = vector.extract_strided_slice %343 {offsets = [0, 0, 0], sizes = [7, 2, 32], strides = [1, 1, 1]} : vector<8x2x32xf32> to vector<7x2x32xf32>
    %364 = tpu.concatenate %362, %363 in 0 : vector<1x2x32xf32>, vector<7x2x32xf32> -> vector<8x2x32xf32>
    %365 = tpu.concatenate %364, %343 in 2 : vector<8x2x32xf32>, vector<8x2x32xf32> -> vector<8x2x64xf32>
    %366 = arith.truncf %365 : vector<8x2x64xf32> to vector<8x2x64xbf16>
    "tpu.trace_start"() <{level = 10 : i32, message = "lbi,lih->lbh"}> : () -> ()
    %cst_85 = arith.constant dense<0.000000e+00> : vector<8x2x32xf32>
    %367 = tpu.matmul %366, %0, %cst_85 {dimension_numbers = #tpu.dot_dimension_numbers<[2], [1], [1], [2], [0, 0, 0, 1, 1, 2], [0], [0]>} : vector<8x2x64xbf16>, vector<8x64x32xbf16>, vector<8x2x32xf32> -> vector<8x2x32xf32>
    "tpu.trace_stop"() : () -> ()
    %368 = vector.broadcast %1 : vector<8x1x32xf32> to vector<8x2x32xf32>
    %369 = arith.addf %367, %368 : vector<8x2x32xf32>
    %370 = math.tanh %369 : vector<8x2x32xf32>
    %371 = vector.broadcast %c10_i32 : i32 to vector<8x2x32xi32>
    %372 = arith.cmpi sle, %4, %371 : vector<8x2x32xi32>
    %c7_i32_86 = arith.constant 7 : i32
    %373 = vector.broadcast %c7_i32_86 : i32 to vector<8x2x32xi32>
    %374 = arith.addi %4, %373 : vector<8x2x32xi32>
    %375 = vector.broadcast %c10_i32 : i32 to vector<8x2x32xi32>
    %376 = arith.cmpi sle, %375, %374 : vector<8x2x32xi32>
    %377 = arith.andi %372, %376 : vector<8x2x32xi1>
    %378 = arith.select %377, %370, %343 : vector<8x2x32xi1>, vector<8x2x32xf32>
    %379 = vector.extract_strided_slice %378 {offsets = [7, 0, 0], sizes = [1, 2, 32], strides = [1, 1, 1]} : vector<8x2x32xf32> to vector<1x2x32xf32>
    %380 = vector.shape_cast %379 : vector<1x2x32xf32> to vector<2x32xf32>
    %381 = vector.broadcast %2 : vector<1x32xf32> to vector<2x32xf32>
    %382 = arith.mulf %380, %381 : vector<2x32xf32>
    %cst_87 = arith.constant dense<0.000000e+00> : vector<2xf32>
    %383 = vector.multi_reduction <add>, %382, %cst_87 [1] : vector<2x32xf32> to vector<2xf32>
    %384 = vector.shape_cast %383 : vector<2xf32> to vector<2x1xf32>
    %385 = vector.broadcast %3 : f32 to vector<2x1xf32>
    %386 = arith.addf %384, %385 : vector<2x1xf32>
    %c7_i32_88 = arith.constant 7 : i32
    %387 = arith.subi %c10_i32, %c7_i32_88 : i32
    %388 = vector.broadcast %387 : i32 to vector<2x8xi32>
    %389 = arith.cmpi eq, %5, %388 : vector<2x8xi32>
    %390 = vector.shape_cast %386 : vector<2x1xf32> to vector<2x1xf32>
    %391 = vector.broadcast %390 : vector<2x1xf32> to vector<2x8xf32>
    %392 = arith.select %389, %391, %357 : vector<2x8xi1>, vector<2x8xf32>
    %c11_i32 = arith.constant 11 : i32
    %c7_i32_89 = arith.constant 7 : i32
    %393 = arith.minsi %c11_i32, %c7_i32_89 : i32
    %394 = arith.index_cast %393 : i32 to index
    %c0_90 = arith.constant 0 : index
    %c0_91 = arith.constant 0 : index
    %395 = vector.load %arg0[%394, %c0_90, %c0_91] : memref<8x2x32xf32, #tpu.memory_space<vmem>>, vector<1x2x32xf32>
    %396 = vector.shape_cast %395 : vector<1x2x32xf32> to vector<2x32xf32>
    %397 = vector.shape_cast %396 : vector<2x32xf32> to vector<1x2x32xf32>
    %398 = vector.extract_strided_slice %378 {offsets = [0, 0, 0], sizes = [7, 2, 32], strides = [1, 1, 1]} : vector<8x2x32xf32> to vector<7x2x32xf32>
    %399 = tpu.concatenate %397, %398 in 0 : vector<1x2x32xf32>, vector<7x2x32xf32> -> vector<8x2x32xf32>
    %400 = tpu.concatenate %399, %378 in 2 : vector<8x2x32xf32>, vector<8x2x32xf32> -> vector<8x2x64xf32>
    %401 = arith.truncf %400 : vector<8x2x64xf32> to vector<8x2x64xbf16>
    "tpu.trace_start"() <{level = 10 : i32, message = "lbi,lih->lbh"}> : () -> ()
    %cst_92 = arith.constant dense<0.000000e+00> : vector<8x2x32xf32>
    %402 = tpu.matmul %401, %0, %cst_92 {dimension_numbers = #tpu.dot_dimension_numbers<[2], [1], [1], [2], [0, 0, 0, 1, 1, 2], [0], [0]>} : vector<8x2x64xbf16>, vector<8x64x32xbf16>, vector<8x2x32xf32> -> vector<8x2x32xf32>
    "tpu.trace_stop"() : () -> ()
    %403 = vector.broadcast %1 : vector<8x1x32xf32> to vector<8x2x32xf32>
    %404 = arith.addf %402, %403 : vector<8x2x32xf32>
    %405 = math.tanh %404 : vector<8x2x32xf32>
    %406 = vector.broadcast %c11_i32 : i32 to vector<8x2x32xi32>
    %407 = arith.cmpi sle, %4, %406 : vector<8x2x32xi32>
    %c7_i32_93 = arith.constant 7 : i32
    %408 = vector.broadcast %c7_i32_93 : i32 to vector<8x2x32xi32>
    %409 = arith.addi %4, %408 : vector<8x2x32xi32>
    %410 = vector.broadcast %c11_i32 : i32 to vector<8x2x32xi32>
    %411 = arith.cmpi sle, %410, %409 : vector<8x2x32xi32>
    %412 = arith.andi %407, %411 : vector<8x2x32xi1>
    %413 = arith.select %412, %405, %378 : vector<8x2x32xi1>, vector<8x2x32xf32>
    %414 = vector.extract_strided_slice %413 {offsets = [7, 0, 0], sizes = [1, 2, 32], strides = [1, 1, 1]} : vector<8x2x32xf32> to vector<1x2x32xf32>
    %415 = vector.shape_cast %414 : vector<1x2x32xf32> to vector<2x32xf32>
    %416 = vector.broadcast %2 : vector<1x32xf32> to vector<2x32xf32>
    %417 = arith.mulf %415, %416 : vector<2x32xf32>
    %cst_94 = arith.constant dense<0.000000e+00> : vector<2xf32>
    %418 = vector.multi_reduction <add>, %417, %cst_94 [1] : vector<2x32xf32> to vector<2xf32>
    %419 = vector.shape_cast %418 : vector<2xf32> to vector<2x1xf32>
    %420 = vector.broadcast %3 : f32 to vector<2x1xf32>
    %421 = arith.addf %419, %420 : vector<2x1xf32>
    %c7_i32_95 = arith.constant 7 : i32
    %422 = arith.subi %c11_i32, %c7_i32_95 : i32
    %423 = vector.broadcast %422 : i32 to vector<2x8xi32>
    %424 = arith.cmpi eq, %5, %423 : vector<2x8xi32>
    %425 = vector.shape_cast %421 : vector<2x1xf32> to vector<2x1xf32>
    %426 = vector.broadcast %425 : vector<2x1xf32> to vector<2x8xf32>
    %427 = arith.select %424, %426, %392 : vector<2x8xi1>, vector<2x8xf32>
    %c12_i32 = arith.constant 12 : i32
    %c7_i32_96 = arith.constant 7 : i32
    %428 = arith.minsi %c12_i32, %c7_i32_96 : i32
    %429 = arith.index_cast %428 : i32 to index
    %c0_97 = arith.constant 0 : index
    %c0_98 = arith.constant 0 : index
    %430 = vector.load %arg0[%429, %c0_97, %c0_98] : memref<8x2x32xf32, #tpu.memory_space<vmem>>, vector<1x2x32xf32>
    %431 = vector.shape_cast %430 : vector<1x2x32xf32> to vector<2x32xf32>
    %432 = vector.shape_cast %431 : vector<2x32xf32> to vector<1x2x32xf32>
    %433 = vector.extract_strided_slice %413 {offsets = [0, 0, 0], sizes = [7, 2, 32], strides = [1, 1, 1]} : vector<8x2x32xf32> to vector<7x2x32xf32>
    %434 = tpu.concatenate %432, %433 in 0 : vector<1x2x32xf32>, vector<7x2x32xf32> -> vector<8x2x32xf32>
    %435 = tpu.concatenate %434, %413 in 2 : vector<8x2x32xf32>, vector<8x2x32xf32> -> vector<8x2x64xf32>
    %436 = arith.truncf %435 : vector<8x2x64xf32> to vector<8x2x64xbf16>
    "tpu.trace_start"() <{level = 10 : i32, message = "lbi,lih->lbh"}> : () -> ()
    %cst_99 = arith.constant dense<0.000000e+00> : vector<8x2x32xf32>
    %437 = tpu.matmul %436, %0, %cst_99 {dimension_numbers = #tpu.dot_dimension_numbers<[2], [1], [1], [2], [0, 0, 0, 1, 1, 2], [0], [0]>} : vector<8x2x64xbf16>, vector<8x64x32xbf16>, vector<8x2x32xf32> -> vector<8x2x32xf32>
    "tpu.trace_stop"() : () -> ()
    %438 = vector.broadcast %1 : vector<8x1x32xf32> to vector<8x2x32xf32>
    %439 = arith.addf %437, %438 : vector<8x2x32xf32>
    %440 = math.tanh %439 : vector<8x2x32xf32>
    %441 = vector.broadcast %c12_i32 : i32 to vector<8x2x32xi32>
    %442 = arith.cmpi sle, %4, %441 : vector<8x2x32xi32>
    %c7_i32_100 = arith.constant 7 : i32
    %443 = vector.broadcast %c7_i32_100 : i32 to vector<8x2x32xi32>
    %444 = arith.addi %4, %443 : vector<8x2x32xi32>
    %445 = vector.broadcast %c12_i32 : i32 to vector<8x2x32xi32>
    %446 = arith.cmpi sle, %445, %444 : vector<8x2x32xi32>
    %447 = arith.andi %442, %446 : vector<8x2x32xi1>
    %448 = arith.select %447, %440, %413 : vector<8x2x32xi1>, vector<8x2x32xf32>
    %449 = vector.extract_strided_slice %448 {offsets = [7, 0, 0], sizes = [1, 2, 32], strides = [1, 1, 1]} : vector<8x2x32xf32> to vector<1x2x32xf32>
    %450 = vector.shape_cast %449 : vector<1x2x32xf32> to vector<2x32xf32>
    %451 = vector.broadcast %2 : vector<1x32xf32> to vector<2x32xf32>
    %452 = arith.mulf %450, %451 : vector<2x32xf32>
    %cst_101 = arith.constant dense<0.000000e+00> : vector<2xf32>
    %453 = vector.multi_reduction <add>, %452, %cst_101 [1] : vector<2x32xf32> to vector<2xf32>
    %454 = vector.shape_cast %453 : vector<2xf32> to vector<2x1xf32>
    %455 = vector.broadcast %3 : f32 to vector<2x1xf32>
    %456 = arith.addf %454, %455 : vector<2x1xf32>
    %c7_i32_102 = arith.constant 7 : i32
    %457 = arith.subi %c12_i32, %c7_i32_102 : i32
    %458 = vector.broadcast %457 : i32 to vector<2x8xi32>
    %459 = arith.cmpi eq, %5, %458 : vector<2x8xi32>
    %460 = vector.shape_cast %456 : vector<2x1xf32> to vector<2x1xf32>
    %461 = vector.broadcast %460 : vector<2x1xf32> to vector<2x8xf32>
    %462 = arith.select %459, %461, %427 : vector<2x8xi1>, vector<2x8xf32>
    %c13_i32 = arith.constant 13 : i32
    %c7_i32_103 = arith.constant 7 : i32
    %463 = arith.minsi %c13_i32, %c7_i32_103 : i32
    %464 = arith.index_cast %463 : i32 to index
    %c0_104 = arith.constant 0 : index
    %c0_105 = arith.constant 0 : index
    %465 = vector.load %arg0[%464, %c0_104, %c0_105] : memref<8x2x32xf32, #tpu.memory_space<vmem>>, vector<1x2x32xf32>
    %466 = vector.shape_cast %465 : vector<1x2x32xf32> to vector<2x32xf32>
    %467 = vector.shape_cast %466 : vector<2x32xf32> to vector<1x2x32xf32>
    %468 = vector.extract_strided_slice %448 {offsets = [0, 0, 0], sizes = [7, 2, 32], strides = [1, 1, 1]} : vector<8x2x32xf32> to vector<7x2x32xf32>
    %469 = tpu.concatenate %467, %468 in 0 : vector<1x2x32xf32>, vector<7x2x32xf32> -> vector<8x2x32xf32>
    %470 = tpu.concatenate %469, %448 in 2 : vector<8x2x32xf32>, vector<8x2x32xf32> -> vector<8x2x64xf32>
    %471 = arith.truncf %470 : vector<8x2x64xf32> to vector<8x2x64xbf16>
    "tpu.trace_start"() <{level = 10 : i32, message = "lbi,lih->lbh"}> : () -> ()
    %cst_106 = arith.constant dense<0.000000e+00> : vector<8x2x32xf32>
    %472 = tpu.matmul %471, %0, %cst_106 {dimension_numbers = #tpu.dot_dimension_numbers<[2], [1], [1], [2], [0, 0, 0, 1, 1, 2], [0], [0]>} : vector<8x2x64xbf16>, vector<8x64x32xbf16>, vector<8x2x32xf32> -> vector<8x2x32xf32>
    "tpu.trace_stop"() : () -> ()
    %473 = vector.broadcast %1 : vector<8x1x32xf32> to vector<8x2x32xf32>
    %474 = arith.addf %472, %473 : vector<8x2x32xf32>
    %475 = math.tanh %474 : vector<8x2x32xf32>
    %476 = vector.broadcast %c13_i32 : i32 to vector<8x2x32xi32>
    %477 = arith.cmpi sle, %4, %476 : vector<8x2x32xi32>
    %c7_i32_107 = arith.constant 7 : i32
    %478 = vector.broadcast %c7_i32_107 : i32 to vector<8x2x32xi32>
    %479 = arith.addi %4, %478 : vector<8x2x32xi32>
    %480 = vector.broadcast %c13_i32 : i32 to vector<8x2x32xi32>
    %481 = arith.cmpi sle, %480, %479 : vector<8x2x32xi32>
    %482 = arith.andi %477, %481 : vector<8x2x32xi1>
    %483 = arith.select %482, %475, %448 : vector<8x2x32xi1>, vector<8x2x32xf32>
    %484 = vector.extract_strided_slice %483 {offsets = [7, 0, 0], sizes = [1, 2, 32], strides = [1, 1, 1]} : vector<8x2x32xf32> to vector<1x2x32xf32>
    %485 = vector.shape_cast %484 : vector<1x2x32xf32> to vector<2x32xf32>
    %486 = vector.broadcast %2 : vector<1x32xf32> to vector<2x32xf32>
    %487 = arith.mulf %485, %486 : vector<2x32xf32>
    %cst_108 = arith.constant dense<0.000000e+00> : vector<2xf32>
    %488 = vector.multi_reduction <add>, %487, %cst_108 [1] : vector<2x32xf32> to vector<2xf32>
    %489 = vector.shape_cast %488 : vector<2xf32> to vector<2x1xf32>
    %490 = vector.broadcast %3 : f32 to vector<2x1xf32>
    %491 = arith.addf %489, %490 : vector<2x1xf32>
    %c7_i32_109 = arith.constant 7 : i32
    %492 = arith.subi %c13_i32, %c7_i32_109 : i32
    %493 = vector.broadcast %492 : i32 to vector<2x8xi32>
    %494 = arith.cmpi eq, %5, %493 : vector<2x8xi32>
    %495 = vector.shape_cast %491 : vector<2x1xf32> to vector<2x1xf32>
    %496 = vector.broadcast %495 : vector<2x1xf32> to vector<2x8xf32>
    %497 = arith.select %494, %496, %462 : vector<2x8xi1>, vector<2x8xf32>
    %c14_i32 = arith.constant 14 : i32
    %c7_i32_110 = arith.constant 7 : i32
    %498 = arith.minsi %c14_i32, %c7_i32_110 : i32
    %499 = arith.index_cast %498 : i32 to index
    %c0_111 = arith.constant 0 : index
    %c0_112 = arith.constant 0 : index
    %500 = vector.load %arg0[%499, %c0_111, %c0_112] : memref<8x2x32xf32, #tpu.memory_space<vmem>>, vector<1x2x32xf32>
    %501 = vector.shape_cast %500 : vector<1x2x32xf32> to vector<2x32xf32>
    %502 = vector.shape_cast %501 : vector<2x32xf32> to vector<1x2x32xf32>
    %503 = vector.extract_strided_slice %483 {offsets = [0, 0, 0], sizes = [7, 2, 32], strides = [1, 1, 1]} : vector<8x2x32xf32> to vector<7x2x32xf32>
    %504 = tpu.concatenate %502, %503 in 0 : vector<1x2x32xf32>, vector<7x2x32xf32> -> vector<8x2x32xf32>
    %505 = tpu.concatenate %504, %483 in 2 : vector<8x2x32xf32>, vector<8x2x32xf32> -> vector<8x2x64xf32>
    %506 = arith.truncf %505 : vector<8x2x64xf32> to vector<8x2x64xbf16>
    "tpu.trace_start"() <{level = 10 : i32, message = "lbi,lih->lbh"}> : () -> ()
    %cst_113 = arith.constant dense<0.000000e+00> : vector<8x2x32xf32>
    %507 = tpu.matmul %506, %0, %cst_113 {dimension_numbers = #tpu.dot_dimension_numbers<[2], [1], [1], [2], [0, 0, 0, 1, 1, 2], [0], [0]>} : vector<8x2x64xbf16>, vector<8x64x32xbf16>, vector<8x2x32xf32> -> vector<8x2x32xf32>
    "tpu.trace_stop"() : () -> ()
    %508 = vector.broadcast %1 : vector<8x1x32xf32> to vector<8x2x32xf32>
    %509 = arith.addf %507, %508 : vector<8x2x32xf32>
    %510 = math.tanh %509 : vector<8x2x32xf32>
    %511 = vector.broadcast %c14_i32 : i32 to vector<8x2x32xi32>
    %512 = arith.cmpi sle, %4, %511 : vector<8x2x32xi32>
    %c7_i32_114 = arith.constant 7 : i32
    %513 = vector.broadcast %c7_i32_114 : i32 to vector<8x2x32xi32>
    %514 = arith.addi %4, %513 : vector<8x2x32xi32>
    %515 = vector.broadcast %c14_i32 : i32 to vector<8x2x32xi32>
    %516 = arith.cmpi sle, %515, %514 : vector<8x2x32xi32>
    %517 = arith.andi %512, %516 : vector<8x2x32xi1>
    %518 = arith.select %517, %510, %483 : vector<8x2x32xi1>, vector<8x2x32xf32>
    %519 = vector.extract_strided_slice %518 {offsets = [7, 0, 0], sizes = [1, 2, 32], strides = [1, 1, 1]} : vector<8x2x32xf32> to vector<1x2x32xf32>
    %520 = vector.shape_cast %519 : vector<1x2x32xf32> to vector<2x32xf32>
    %521 = vector.broadcast %2 : vector<1x32xf32> to vector<2x32xf32>
    %522 = arith.mulf %520, %521 : vector<2x32xf32>
    %cst_115 = arith.constant dense<0.000000e+00> : vector<2xf32>
    %523 = vector.multi_reduction <add>, %522, %cst_115 [1] : vector<2x32xf32> to vector<2xf32>
    %524 = vector.shape_cast %523 : vector<2xf32> to vector<2x1xf32>
    %525 = vector.broadcast %3 : f32 to vector<2x1xf32>
    %526 = arith.addf %524, %525 : vector<2x1xf32>
    %c7_i32_116 = arith.constant 7 : i32
    %527 = arith.subi %c14_i32, %c7_i32_116 : i32
    %528 = vector.broadcast %527 : i32 to vector<2x8xi32>
    %529 = arith.cmpi eq, %5, %528 : vector<2x8xi32>
    %530 = vector.shape_cast %526 : vector<2x1xf32> to vector<2x1xf32>
    %531 = vector.broadcast %530 : vector<2x1xf32> to vector<2x8xf32>
    %532 = arith.select %529, %531, %497 : vector<2x8xi1>, vector<2x8xf32>
    %c15_i32 = arith.constant 15 : i32
    %c0_117 = arith.constant 0 : index
    %c0_118 = arith.constant 0 : index
    %533 = vector.load %arg6[%c0_117, %c0_118] : memref<2x8xf32, #tpu.memory_space<vmem>>, vector<2x8xf32>
    tpu.vector_store %arg6[%c0_117, %c0_118], %532 {strides = array<i32>} : memref<2x8xf32, #tpu.memory_space<vmem>>, vector<2x8xf32>,
    %c0_119 = arith.constant 0 : index
    %c0_120 = arith.constant 0 : index
    %c0_121 = arith.constant 0 : index
    %534 = vector.load %arg7[%c0_119, %c0_120, %c0_121] : memref<8x2x32xf32, #tpu.memory_space<vmem>>, vector<8x2x32xf32>
    tpu.vector_store %arg7[%c0_119, %c0_120, %c0_121], %518 {strides = array<i32>} : memref<8x2x32xf32, #tpu.memory_space<vmem>>, vector<8x2x32xf32>,
    return
  }
}

</mosaic_0001>

<bundles_post_ra>
// kernel: tpu_custom_call.1
= control target key start
LH: loop header
LB: loop body
LE: loop exit
PB: predicated region body
PF: predicated region fallthrough
CT: control target
= control target key end

     0   :  { %14 = vsyncpa [#allocation4], 0  ;;  %s9203_s26 = smov 32   ;;  %v9204_v1 = vmov 0.0   ;;  %vm9205_vm0 = vmmov 0   ;;  %s12044_s0 = inlined_call_operand.vmem [shape: f32[8,2,32], index: 0, kind: input, shape index: {}]   ;;  %s12045_s1 = inlined_call_operand.vmem [shape: f32[8,2,32], index: 1, kind: input, shape index: {}]   ;;  %s12046_s2 = inlined_call_operand.vmem [shape: bf16[8,64,32], index: 2, kind: input, shape index: {}]   ;;  %s12047_s3 = inlined_call_operand.vmem [shape: f32[8,1,32], index: 3, kind: input, shape index: {}]   ;;  %s12048_s4 = inlined_call_operand.vmem [shape: f32[1,32], index: 4, kind: input, shape index: {}]   ;;  %s12049_s5 = inlined_call_operand.<no memory space> [shape: f32[1,1], index: 5, kind: input, shape index: {}]   ;;  %s12050_s6 = inlined_call_operand.hbm [shape: f32[2,8], index: 6, kind: output, shape index: {0}]   ;;  %s12051_s7 = inlined_call_operand.hbm [shape: f32[8,2,32], index: 7, kind: output, shape index: {1}]  }
   0x1   :  { %v9252_v0 = vld [vmem:[%s12045_s1] sm:$0x3]  ;;  %7425 = vmatprep.subr.bf16.mxu0 %v9204_v1  ;;  %7437 = vmatprep.subr.bf16.mxu1 %v9204_v1  ;;  %v9267_v3 = vld [vmem:[%s12046_s2 + $0x8] sm:$0xff]   ;;  %v9277_v4 = vld [vmem:[%s12046_s2 + $0x10] sm:$0xff]  }
   0x2   :  { %122 = vrot.lane.b32.xlu0 %v9252_v0, %s9203_s26  ;;  %v9260_v2 = vld [vmem:[%s12046_s2] sm:$0xff]   ;;  %7433 = vmatprep.mubr.msk.bf16.mxu0 %vm9205_vm0, %v9204_v1  ;;  %v9292_v7 = vld [vmem:[%s12045_s1 + $0xa] sm:$0x3]  ;;  %v9301_v8 = vld [vmem:[%s12045_s1 + $0xe] sm:$0x3] }
   0x3   :  { %7426 = vmatpush3.bf16.msra.mxu0 %v9260_v2  ;;  %7445 = vmatprep.mubr.msk.bf16.mxu1 %vm9205_vm0, %v9204_v1  ;;  %v9282_v5 = vld [vmem:[%s12045_s1 + $0x2] sm:$0x3]  ;;  %v9287_v6 = vld [vmem:[%s12045_s1 + $0x6] sm:$0x3]  ;;  %v9314_v10 = vld [vmem:[%s12046_s2 + $0x28] sm:$0xff]  }
   0x4   :  { %7427 = vmatprep.subr.bf16.mxu0 %v9204_v1  ;;  %128 = vrot.lane.b32.xlu1 %v9287_v6, %s9203_s26  ;;  %v9307_v9 = vld [vmem:[%s12046_s2 + $0x20] sm:$0xff]   ;;  %v9324_v11 = vld [vmem:[%s12046_s2 + $0x18] sm:$0xff]   ;;  %v9332_v12 = vld [vmem:[%s12046_s2 + $0x30] sm:$0xff]  }
   0x5   :  { %7438 = vmatpush3.bf16.msra.mxu1 %v9307_v9  ;;  %v9340_v13 = vld [vmem:[%s12045_s1 + $0x4] sm:$0x3]  ;;  %v9350_v14 = vld [vmem:[%s12046_s2 + $0x38] sm:$0xff]   ;;  %v9357_v15 = vld [vmem:[%s12045_s1 + $0x8] sm:$0x3] }
   0x6   :  { %124 = vrot.lane.b32.xlu0 %v9282_v5, %s9203_s26  ;;  %7439 = vmatprep.subr.bf16.mxu1 %v9204_v1 }
   0x7   :  { %7428 = vmatpush3.bf16.msra.mxu0 %v9267_v3 }
   0x8   :  { %7429 = vmatprep.subr.bf16.mxu0 %v9204_v1  ;;  %132 = vrot.lane.b32.xlu1 %v9292_v7, %s9203_s26 }
   0x9   :  { %7440 = vmatpush3.bf16.msra.mxu1 %v9314_v10 }
   0xa   :  { %136 = vrot.lane.b32.xlu0 %v9301_v8, %s9203_s26  ;;  %7441 = vmatprep.subr.bf16.mxu1 %v9204_v1 }
   0xb   :  { %7430 = vmatpush3.bf16.msra.mxu0 %v9277_v4 }
   0xc   :  { %7431 = vmatprep.subr.bf16.mxu0 %v9204_v1  ;;  %791 = vrot.lane.b32.xlu1 %v9282_v5, %s9203_s26 }
   0xd   :  { %7442 = vmatpush3.bf16.msra.mxu1 %v9332_v12 }
   0xe   :  { %126 = vrot.lane.b32.xlu0 %v9340_v13, %s9203_s26  ;;  %7443 = vmatprep.subr.bf16.mxu1 %v9204_v1 }
   0xf   :  { %7432 = vmatpush3.bf16.msra.mxu0 %v9324_v11 }
  0x10   :  { %7449 = vmatprep.subr.bf16.mxu0 %v9204_v1  ;;  %130 = vrot.lane.b32.xlu1 %v9357_v15, %s9203_s26 }
  0x11   :  { %7444 = vmatpush3.bf16.msra.mxu1 %v9350_v14 }
  0x12   :  { %7461 = vmatprep.subr.bf16.mxu1 %v9204_v1 }
  0x13   :  { %15 = vsyncpa [#allocation6], 0  ;;  %v9365_v16 = vld [vmem:[%s12045_s1 + $0xc] sm:$0x3]  ;;  %v113_v17 = vld [vmem:[%s12044_s0] sm:$0x3] }
  0x14   :  { %134 = vrot.lane.b32.xlu0 %v9365_v16, %s9203_s26  ;;  %vm146_vm1 = vcmask 261120   ;;  %vm235_vm2 = vcmask 523264   ;;  %v9393_v23 = vld [vmem:[%s12046_s2 + $0x60] sm:$0xff]   ;;  %v9400_v25 = vld [vmem:[%s12046_s2 + $0x68] sm:$0xff]   ;;  %v9409_v26 = vld [vmem:[%s12046_s2 + $0x70] sm:$0xff]   ;;  %vm771_vm3 = vcmask 254976  }
  0x15   :  { %v9418_v29 = vld [vmem:[%s12046_s2 + $0x78] sm:$0xff]   ;;  %v9425_v31 = vld [vmem:[%s12046_s2 + $0xa0] sm:$0xff]   ;;  %v9433_v32 = vld [vmem:[%s12046_s2 + $0xa8] sm:$0xff]  }
  0x16   :  { %v9442_v33 = vld [vmem:[%s12046_s2 + $0xb0] sm:$0xff]   ;;  %v9451_v36 = vld [vmem:[%s12046_s2 + $0xb8] sm:$0xff]   ;;  %v9458_v38 = vld [vmem:[%s12046_s2 + $0xe0] sm:$0xff]  }
  0x17   :  { %v9466_v39 = vld [vmem:[%s12046_s2 + $0xe8] sm:$0xff]   ;;  %v9475_v40 = vld [vmem:[%s12046_s2 + $0xf0] sm:$0xff]   ;;  %v9484_v43 = vld [vmem:[%s12046_s2 + $0xf8] sm:$0xff]  }
  0x18   :  { %795 = vrot.lane.b32.xlu0 %v9287_v6, %s9203_s26  ;;  %v9503_v45 = vld [vmem:[%s12046_s2 + $0x40] sm:$0xff]   ;;  %v9509_v46 = vld [vmem:[%s12046_s2 + $0x48] sm:$0xff]   ;;  %v9516_v47 = vld [vmem:[%s12046_s2 + $0x50] sm:$0xff]  }
  0x19   :  { %v9525_v50 = vld [vmem:[%s12046_s2 + $0x58] sm:$0xff]   ;;  %v9532_v52 = vld [vmem:[%s12046_s2 + $0x80] sm:$0xff]   ;;  %v9540_v53 = vld [vmem:[%s12046_s2 + $0x88] sm:$0xff]  }
  0x1a   :  { %v9549_v55 = vld [vmem:[%s12046_s2 + $0x90] sm:$0xff]   ;;  %v9558_v58 = vld [vmem:[%s12046_s2 + $0x98] sm:$0xff]   ;;  %v9565_v60 = vld [vmem:[%s12046_s2 + $0xc0] sm:$0xff]  }
  0x1b   :  { %v9573_v61 = vld [vmem:[%s12046_s2 + $0xc8] sm:$0xff]   ;;  %v9582_v62 = vld [vmem:[%s12046_s2 + $0xd0] sm:$0xff]  }
  0x1c   :  { %803 = vrot.lane.b32.xlu0 %v9301_v8, %s9203_s26 }
  0x20   :  { %793 = vrot.lane.b32.xlu0 %v9340_v13, %s9203_s26 }
  0x24   :  { %801 = vrot.lane.b32.xlu0 %v9365_v16, %s9203_s26 }
  0x28   :  { %1210 = vrot.lane.b32.xlu0 %v9340_v13, %s9203_s26 }
  0x2c   :  { %1216 = vrot.lane.b32.xlu0 %v9292_v7, %s9203_s26 }
  0x74   :  { %v123_v18 = vpop.permute.xlu0 %122 }
  0x75   :  { %v147_v19 = vsel %vm146_vm1, %v113_v17, %v123_v18  ;;  %v9591_v17 = vld [vmem:[%s12046_s2 + $0xd8] sm:$0xff]  }
  0x76   :  { %v155_v20 = vpack.c.bf16 %v147_v19, %v147_v19  ;;  %v129_v27 = vpop.permute.xlu1 %128  ;;  %v9610_v19 = vld [vmem:[%s12047_s3] ss:$0 sm:$0xff] }
  0x77   :  { %v150_v28 = vsel %vm146_vm1, %v9340_v13, %v129_v27 }
  0x78   :  { %7434 = vmatmul.mubr.msk.bf16.vlgmr.msra.gmra.mrb[0].mxu0 %vm235_vm2, %v155_v20  ;;  %v125_v21 = vpop.permute.xlu0 %124  ;;  %v158_v30 = vpack.c.bf16 %v150_v28, %v150_v28 }
  0x79   :  { %7457 = vmatprep.mubr.msk.bf16.mxu0 %vm9205_vm0, %v9204_v1  ;;  %v148_v22 = vsel %vm146_vm1, %v9252_v0, %v125_v21  ;;  %7450 = vmatpush3.bf16.msra.mxu0 %v9503_v45 }
  0x7a   :  { %v156_v24 = vpack.c.bf16 %v148_v22, %v148_v22  ;;  %v133_v34 = vpop.permute.xlu1 %132  ;;  %7451 = vmatprep.subr.bf16.mxu0 %v9204_v1 }
  0x7b   :  { %v152_v35 = vsel %vm146_vm1, %v9357_v15, %v133_v34 }
  0x7c   :  { %7446 = vmatmul.mubr.msk.bf16.vlgmr.msra.gmra.mrb[0].mxu1 %vm235_vm2, %v156_v24  ;;  %v160_v37 = vpack.c.bf16 %v152_v35, %v152_v35  ;;  %v137_v41 = vpop.permute.xlu0 %136 }
  0x7d   :  { %7462 = vmatpush3.bf16.msra.mxu1 %v9393_v23  ;;  %7469 = vmatprep.mubr.msk.bf16.mxu1 %vm9205_vm0, %v9204_v1  ;;  %v154_v42 = vsel %vm146_vm1, %v9365_v16, %v137_v41 }
  0x7e   :  { %7463 = vmatprep.subr.bf16.mxu1 %v9204_v1  ;;  %v162_v44 = vpack.c.bf16 %v154_v42, %v154_v42  ;;  %7452 = vmatpush3.bf16.msra.mxu0 %v9509_v46  ;;  %v792_v54 = vpop.permute.xlu1 %791 }
  0x7f   :  { %7453 = vmatprep.subr.bf16.mxu0 %v9204_v1 }
  0x80   :  { %v127_v48 = vpop.permute.xlu0 %126 }
  0x81   :  { %7464 = vmatpush3.bf16.msra.mxu1 %v9400_v25  ;;  %v149_v49 = vsel %vm146_vm1, %v9282_v5, %v127_v48 }
  0x82   :  { %7465 = vmatprep.subr.bf16.mxu1 %v9204_v1  ;;  %7454 = vmatpush3.bf16.msra.mxu0 %v9516_v47  ;;  %v157_v51 = vpack.c.bf16 %v149_v49, %v149_v49  ;;  %v131_v56 = vpop.permute.xlu1 %130 }
  0x83   :  { %7455 = vmatprep.subr.bf16.mxu0 %v9204_v1  ;;  %v151_v57 = vsel %vm146_vm1, %v9287_v6, %v131_v56 }
  0x84   :  { %v159_v59 = vpack.c.bf16 %v151_v57, %v151_v57 }
  0x85   :  { %7466 = vmatpush3.bf16.msra.mxu1 %v9409_v26 }
  0x86   :  { %7467 = vmatprep.subr.bf16.mxu1 %v9204_v1  ;;  %7456 = vmatpush3.bf16.msra.mxu0 %v9525_v50  ;;  %v135_v63 = vpop.permute.xlu0 %134 }
  0x87   :  { %7473 = vmatprep.subr.bf16.mxu0 %v9204_v1  ;;  %v153_v0 = vsel %vm146_vm1, %v9292_v7, %v135_v63 }
  0x88   :  { %v161_v18 = vpack.c.bf16 %v153_v0, %v153_v0 }
  0x89   :  { %7468 = vmatpush3.bf16.msra.mxu1 %v9418_v29  ;;  %7458 = vmatmul.mubr.msk.bf16.vlgmr.msra.gmra.mrb[4].mxu0 %vm235_vm2, %v157_v51 }
  0x8a   :  { %7485 = vmatprep.subr.bf16.mxu1 %v9204_v1  ;;  %7474 = vmatpush3.bf16.msra.mxu0 %v9532_v52 }
  0x8b   :  { %7481 = vmatprep.mubr.msk.bf16.mxu0 %vm9205_vm0, %v9204_v1  ;;  %7475 = vmatprep.subr.bf16.mxu0 %v9204_v1 }
  0x8c   :  { %7470 = vmatmul.mubr.msk.bf16.vlgmr.msra.gmra.mrb[4].mxu1 %vm235_vm2, %v158_v30 }
  0x8d   :  { %7486 = vmatpush3.bf16.msra.mxu1 %v9425_v31  ;;  %7493 = vmatprep.mubr.msk.bf16.mxu1 %vm9205_vm0, %v9204_v1 }
  0x8e   :  { %7487 = vmatprep.subr.bf16.mxu1 %v9204_v1  ;;  %7476 = vmatpush3.bf16.msra.mxu0 %v9540_v53 }
  0x8f   :  { %7477 = vmatprep.subr.bf16.mxu0 %v9204_v1 }
  0x91   :  { %7488 = vmatpush3.bf16.msra.mxu1 %v9433_v32 }
  0x92   :  { %7489 = vmatprep.subr.bf16.mxu1 %v9204_v1  ;;  %7478 = vmatpush3.bf16.msra.mxu0 %v9549_v55 }
  0x93   :  { %7479 = vmatprep.subr.bf16.mxu0 %v9204_v1 }
  0x95   :  { %7490 = vmatpush3.bf16.msra.mxu1 %v9442_v33 }
  0x96   :  { %7491 = vmatprep.subr.bf16.mxu1 %v9204_v1  ;;  %7480 = vmatpush3.bf16.msra.mxu0 %v9558_v58 }
  0x97   :  { %7497 = vmatprep.subr.bf16.mxu0 %v9204_v1 }
  0x99   :  { %7492 = vmatpush3.bf16.msra.mxu1 %v9451_v36  ;;  %7482 = vmatmul.mubr.msk.bf16.vlgmr.msra.gmra.mrb[8].mxu0 %vm235_vm2, %v159_v59 }
  0x9a   :  { %7509 = vmatprep.subr.bf16.mxu1 %v9204_v1  ;;  %7498 = vmatpush3.bf16.msra.mxu0 %v9565_v60 }
  0x9b   :  { %7505 = vmatprep.mubr.msk.bf16.mxu0 %vm9205_vm0, %v9204_v1  ;;  %7499 = vmatprep.subr.bf16.mxu0 %v9204_v1 }
  0x9c   :  { %7494 = vmatmul.mubr.msk.bf16.vlgmr.msra.gmra.mrb[8].mxu1 %vm235_vm2, %v160_v37 }
  0x9d   :  { %7510 = vmatpush3.bf16.msra.mxu1 %v9458_v38  ;;  %7517 = vmatprep.mubr.msk.bf16.mxu1 %vm9205_vm0, %v9204_v1 }
  0x9e   :  { %7511 = vmatprep.subr.bf16.mxu1 %v9204_v1  ;;  %7500 = vmatpush3.bf16.msra.mxu0 %v9573_v61 }
  0x9f   :  { %7501 = vmatprep.subr.bf16.mxu0 %v9204_v1 }
  0xa1   :  { %7512 = vmatpush3.bf16.msra.mxu1 %v9466_v39 }
  0xa2   :  { %7513 = vmatprep.subr.bf16.mxu1 %v9204_v1  ;;  %7502 = vmatpush3.bf16.msra.mxu0 %v9582_v62 }
  0xa3   :  { %7503 = vmatprep.subr.bf16.mxu0 %v9204_v1 }
  0xa5   :  { %7514 = vmatpush3.bf16.msra.mxu1 %v9475_v40 }
  0xa6   :  { %7515 = vmatprep.subr.bf16.mxu1 %v9204_v1  ;;  %7504 = vmatpush3.bf16.msra.mxu0 %v9591_v17 }
  0xa7   :  { %7521 = vmatprep.subr.bf16.mxu0 %v9204_v1 }
  0xa9   :  { %7516 = vmatpush3.bf16.msra.mxu1 %v9484_v43  ;;  %7506 = vmatmul.mubr.msk.bf16.vlgmr.msra.gmra.mrb[12].mxu0 %vm235_vm2, %v161_v18 }
  0xaa   :  { %7533 = vmatprep.subr.bf16.mxu1 %v9204_v1  ;;  %7522 = vmatpush3.bf16.msra.mxu0 %v9260_v2 }
  0xab   :  { %7529 = vmatprep.mubr.msk.bf16.mxu0 %vm9205_vm0, %v9204_v1  ;;  %7523 = vmatprep.subr.bf16.mxu0 %v9204_v1 }
  0xac   :  { %7518 = vmatmul.mubr.msk.bf16.vlgmr.msra.gmra.mrb[12].mxu1 %vm235_vm2, %v162_v44 }
  0xad   :  { %7534 = vmatpush3.bf16.msra.mxu1 %v9307_v9  ;;  %7541 = vmatprep.mubr.msk.bf16.mxu1 %vm9205_vm0, %v9204_v1 }
  0xae   :  { %7535 = vmatprep.subr.bf16.mxu1 %v9204_v1  ;;  %7524 = vmatpush3.bf16.msra.mxu0 %v9267_v3 }
  0xaf   :  { %7525 = vmatprep.subr.bf16.mxu0 %v9204_v1 }
  0xb1   :  { %7536 = vmatpush3.bf16.msra.mxu1 %v9314_v10 }
  0xb2   :  { %7537 = vmatprep.subr.bf16.mxu1 %v9204_v1  ;;  %7526 = vmatpush3.bf16.msra.mxu0 %v9277_v4 }
  0xb3   :  { %7527 = vmatprep.subr.bf16.mxu0 %v9204_v1 }
  0xb5   :  { %7538 = vmatpush3.bf16.msra.mxu1 %v9332_v12 }
  0xb6   :  { %7539 = vmatprep.subr.bf16.mxu1 %v9204_v1  ;;  %7528 = vmatpush3.bf16.msra.mxu0 %v9324_v11 }
  0xb7   :  { %7545 = vmatprep.subr.bf16.mxu0 %v9204_v1 }
  0xb9   :  { %7540 = vmatpush3.bf16.msra.mxu1 %v9350_v14 }
  0xba   :  { %7557 = vmatprep.subr.bf16.mxu1 %v9204_v1 }
 0x14b   :  { %v273_v20 = vpop.f32.mrb[0].mxu0 }
 0x14c   :  { %v274_v21 = vadd.f32 %v9610_v19, %v273_v20  ;;  %v7435_v22 = vpop.f32.mrb[1].mxu0 }
 0x14d   :  { %v276_v24 = vpop.f32.mrb[2].mxu0 }
 0x14e   :  { %8903 = vtanh.f32 %v274_v21  ;;  %v7436_v27 = vpop.f32.mrb[3].mxu0 }
 0x14f   :  { %v340_v28 = vpop.f32.mrb[0].mxu1 }
 0x150   :  { %v7447_v30 = vpop.f32.mrb[1].mxu1 }
 0x151   :  { %v343_v34 = vpop.f32.mrb[2].mxu1 }
 0x152   :  { %v7448_v35 = vpop.f32.mrb[3].mxu1 }
 0x153   :  { %v6699_v35 = vld [vmem:[%s12044_s0 + $0x2] sm:$0x3] }
 0x158   :  { %v8904_v37 = vpop.eup %8903 }
 0x159   :  { %v814_v41 = vsel %vm146_vm1, %v8904_v37, %v792_v54  ;;  %789 = vrot.lane.b32.xlu1 %v8904_v37, %s9203_s26  ;;  %v796_v54 = vpop.permute.xlu0 %795 }
 0x15a   :  { %v822_v42 = vpack.c.bf16 %v814_v41, %v814_v41  ;;  %v816_v56 = vsel %vm146_vm1, %v9340_v13, %v796_v54 }
 0x15b   :  { %v824_v57 = vpack.c.bf16 %v816_v56, %v816_v56 }
 0x15c   :  { %7542 = vmatmul.mubr.msk.bf16.vlgmr.msra.gmra.mrb[16].mxu1 %vm235_vm2, %v822_v42  ;;  %v407_v27 = vpop.f32.mrb[4].mxu0 }
 0x15d   :  { %799 = vrot.lane.b32.xlu1 %v9292_v7, %s9203_s26  ;;  %7558 = vmatpush3.bf16.msra.mxu1 %v9393_v23  ;;  %v7459_v28 = vpop.f32.mrb[5].mxu0  ;;  %v804_v56 = vpop.permute.xlu0 %803 }
 0x15e   :  { %7559 = vmatprep.subr.bf16.mxu1 %v9204_v1  ;;  %7565 = vmatprep.mubr.msk.bf16.mxu1 %vm9205_vm0, %v9204_v1  ;;  %v410_v30 = vpop.f32.mrb[6].mxu0  ;;  %v9698_v28 = vld [vmem:[%s12047_s3 + $0x1] ss:$0 sm:$0xff] }
 0x15f   :  { %v474_v44 = vpop.f32.mrb[4].mxu1  ;;  %v7460_v34 = vpop.f32.mrb[7].mxu0 }
 0x160   :  { %v7471_v48 = vpop.f32.mrb[5].mxu1 }
 0x161   :  { %7560 = vmatpush3.bf16.msra.mxu1 %v9400_v25  ;;  %v477_v49 = vpop.f32.mrb[6].mxu1 }
 0x162   :  { %7561 = vmatprep.subr.bf16.mxu1 %v9204_v1  ;;  %v7472_v51 = vpop.f32.mrb[7].mxu1 }
 0x165   :  { %7562 = vmatpush3.bf16.msra.mxu1 %v9409_v26 }
 0x166   :  { %7563 = vmatprep.subr.bf16.mxu1 %v9204_v1 }
 0x169   :  { %7564 = vmatpush3.bf16.msra.mxu1 %v9418_v29 }
 0x16a   :  { %7581 = vmatprep.subr.bf16.mxu1 %v9204_v1 }
 0x16c   :  { %7566 = vmatmul.mubr.msk.bf16.vlgmr.msra.gmra.mrb[20].mxu1 %vm235_vm2, %v824_v57  ;;  %v541_v48 = vpop.f32.mrb[8].mxu0 }
 0x16d   :  { %7582 = vmatpush3.bf16.msra.mxu1 %v9425_v31  ;;  %7589 = vmatprep.mubr.msk.bf16.mxu1 %vm9205_vm0, %v9204_v1  ;;  %v7483_v51 = vpop.f32.mrb[9].mxu0 }
 0x16e   :  { %7583 = vmatprep.subr.bf16.mxu1 %v9204_v1  ;;  %v544_v57 = vpop.f32.mrb[10].mxu0 }
 0x16f   :  { %v608_v59 = vpop.f32.mrb[8].mxu1 }
 0x170   :  { %v7495_v63 = vpop.f32.mrb[9].mxu1  ;;  %v7484_v59 = vpop.f32.mrb[11].mxu0 }
 0x171   :  { %7584 = vmatpush3.bf16.msra.mxu1 %v9433_v32  ;;  %v611_v0 = vpop.f32.mrb[10].mxu1  ;;  %v794_v63 = vpop.permute.xlu0 %793 }
 0x172   :  { %7585 = vmatprep.subr.bf16.mxu1 %v9204_v1  ;;  %v7496_v18 = vpop.f32.mrb[11].mxu1  ;;  %v815_v0 = vsel %vm146_vm1, %v9282_v5, %v794_v63 }
 0x173   :  { %v820_v18 = vsel %vm146_vm1, %v9365_v16, %v804_v56 }
 0x175   :  { %7586 = vmatpush3.bf16.msra.mxu1 %v9442_v33 }
 0x176   :  { %7587 = vmatprep.subr.bf16.mxu1 %v9204_v1 }
 0x179   :  { %7588 = vmatpush3.bf16.msra.mxu1 %v9451_v36 }
 0x17a   :  { %7605 = vmatprep.subr.bf16.mxu1 %v9204_v1 }
 0x17c   :  { %v675_v5 = vpop.f32.mrb[12].mxu0 }
 0x17f   :  { %v742_v20 = vpop.f32.mrb[12].mxu1 }
 0x180   :  { %v7519_v21 = vpop.f32.mrb[13].mxu1  ;;  %v823_v20 = vpack.c.bf16 %v815_v0, %v815_v0 }
 0x181   :  { %v745_v22 = vpop.f32.mrb[14].mxu1  ;;  %v828_v21 = vpack.c.bf16 %v820_v18, %v820_v18 }
 0x182   :  { %v7520_v24 = vpop.f32.mrb[15].mxu1  ;;  %v7507_v22 = vpop.f32.mrb[13].mxu0 }
 0x183   :  { %v678_v24 = vpop.f32.mrb[14].mxu0 }
 0x184   :  { %v7508_v27 = vpop.f32.mrb[15].mxu0 }
 0x1cb   :  { %v790_v37 = vpop.permute.xlu1 %789 }
 0x1cc   :  { %v813_v41 = vsel %vm146_vm1, %v6699_v35, %v790_v37 }
 0x1cd   :  { %v821_v42 = vpack.c.bf16 %v813_v41, %v813_v41 }
 0x1cf   :  { %7530 = vmatmul.mubr.msk.bf16.vlgmr.msra.gmra.mrb[16].mxu0 %vm235_vm2, %v821_v42  ;;  %v800_v44 = vpop.permute.xlu1 %799 }
 0x1d0   :  { %v818_v49 = vsel %vm146_vm1, %v9357_v15, %v800_v44  ;;  %7546 = vmatpush3.bf16.msra.mxu0 %v9503_v45  ;;  %7553 = vmatprep.mubr.msk.bf16.mxu0 %vm9205_vm0, %v9204_v1 }
 0x1d1   :  { %v826_v54 = vpack.c.bf16 %v818_v49, %v818_v49  ;;  %7547 = vmatprep.subr.bf16.mxu0 %v9204_v1 }
 0x1d3   :  { %7590 = vmatmul.mubr.msk.bf16.vlgmr.msra.gmra.mrb[24].mxu1 %vm235_vm2, %v826_v54 }
 0x1d4   :  { %7606 = vmatpush3.bf16.msra.mxu1 %v9458_v38  ;;  %7613 = vmatprep.mubr.msk.bf16.mxu1 %vm9205_vm0, %v9204_v1 }
 0x1d5   :  { %7607 = vmatprep.subr.bf16.mxu1 %v9204_v1  ;;  %7548 = vmatpush3.bf16.msra.mxu0 %v9509_v46 }
 0x1d6   :  { %7549 = vmatprep.subr.bf16.mxu0 %v9204_v1 }
 0x1d8   :  { %7608 = vmatpush3.bf16.msra.mxu1 %v9466_v39 }
 0x1d9   :  { %7609 = vmatprep.subr.bf16.mxu1 %v9204_v1  ;;  %7550 = vmatpush3.bf16.msra.mxu0 %v9516_v47 }
 0x1da   :  { %7551 = vmatprep.subr.bf16.mxu0 %v9204_v1 }
 0x1dc   :  { %7610 = vmatpush3.bf16.msra.mxu1 %v9475_v40 }
 0x1dd   :  { %7611 = vmatprep.subr.bf16.mxu1 %v9204_v1  ;;  %7552 = vmatpush3.bf16.msra.mxu0 %v9525_v50 }
 0x1de   :  { %7569 = vmatprep.subr.bf16.mxu0 %v9204_v1 }
 0x1e0   :  { %7612 = vmatpush3.bf16.msra.mxu1 %v9484_v43  ;;  %7554 = vmatmul.mubr.msk.bf16.vlgmr.msra.gmra.mrb[20].mxu0 %vm235_vm2, %v823_v20 }
 0x1e1   :  { %7629 = vmatprep.subr.bf16.mxu1 %v9204_v1  ;;  %7570 = vmatpush3.bf16.msra.mxu0 %v9532_v52 }
 0x1e2   :  { %7571 = vmatprep.subr.bf16.mxu0 %v9204_v1  ;;  %7577 = vmatprep.mubr.msk.bf16.mxu0 %vm9205_vm0, %v9204_v1 }
 0x1e3   :  { %7614 = vmatmul.mubr.msk.bf16.vlgmr.msra.gmra.mrb[28].mxu1 %vm235_vm2, %v828_v21 }
 0x1e4   :  { %7630 = vmatpush3.bf16.msra.mxu1 %v9307_v9  ;;  %7637 = vmatprep.mubr.msk.bf16.mxu1 %vm9205_vm0, %v9204_v1 }
 0x1e5   :  { %7631 = vmatprep.subr.bf16.mxu1 %v9204_v1  ;;  %7572 = vmatpush3.bf16.msra.mxu0 %v9540_v53 }
 0x1e6   :  { %7573 = vmatprep.subr.bf16.mxu0 %v9204_v1 }
 0x1e8   :  { %7632 = vmatpush3.bf16.msra.mxu1 %v9314_v10 }
 0x1e9   :  { %7633 = vmatprep.subr.bf16.mxu1 %v9204_v1  ;;  %7574 = vmatpush3.bf16.msra.mxu0 %v9549_v55 }
 0x1ea   :  { %7575 = vmatprep.subr.bf16.mxu0 %v9204_v1 }
 0x1ec   :  { %7634 = vmatpush3.bf16.msra.mxu1 %v9332_v12 }
 0x1ed   :  { %7635 = vmatprep.subr.bf16.mxu1 %v9204_v1  ;;  %7576 = vmatpush3.bf16.msra.mxu0 %v9558_v58 }
 0x1ee   :  { %7593 = vmatprep.subr.bf16.mxu0 %v9204_v1 }
 0x1f0   :  { %7636 = vmatpush3.bf16.msra.mxu1 %v9350_v14 }
 0x1f1   :  { %7653 = vmatprep.subr.bf16.mxu1 %v9204_v1 }
 0x22f   :  { %v909_v30 = vpop.f32.mrb[16].mxu1 }
 0x230   :  { %v910_v34 = vadd.f32 %v9698_v28, %v909_v30  ;;  %v7543_v35 = vpop.f32.mrb[17].mxu1 }
 0x231   :  { %v912_v37 = vpop.f32.mrb[18].mxu1 }
 0x232   :  { %8905 = vtanh.f32 %v910_v34  ;;  %v7544_v41 = vpop.f32.mrb[19].mxu1 }
 0x23c   :  { %v9701_v42 = vpop.eup %8905 }
 0x23d   :  { %1208 = vrot.lane.b32.xlu1 %v9701_v42, %s9203_s26 }
 0x23f   :  { %v995_v44 = vpop.f32.mrb[20].mxu1 }
 0x240   :  { %v7567_v48 = vpop.f32.mrb[21].mxu1 }
 0x241   :  { %797 = vrot.lane.b32.xlu1 %v9357_v15, %s9203_s26  ;;  %v998_v49 = vpop.f32.mrb[22].mxu1 }
 0x242   :  { %v7568_v51 = vpop.f32.mrb[23].mxu1 }
 0x2a2   :  { %v866_v54 = vpop.f32.mrb[16].mxu0 }
 0x2a3   :  { %v867_v56 = vadd.f32 %v9610_v19, %v866_v54  ;;  %v7531_v57 = vpop.f32.mrb[17].mxu0 }
 0x2a4   :  { %v869_v59 = vpop.f32.mrb[18].mxu0  ;;  %v802_v57 = vpop.permute.xlu0 %801 }
 0x2a5   :  { %8907 = vtanh.f32 %v867_v56  ;;  %v7532_v63 = vpop.f32.mrb[19].mxu0  ;;  %v819_v59 = vsel %vm146_vm1, %v9292_v7, %v802_v57 }
 0x2a6   :  { %v1081_v0 = vpop.f32.mrb[24].mxu1 }
 0x2a7   :  { %v7591_v18 = vpop.f32.mrb[25].mxu1 }
 0x2a8   :  { %v1084_v20 = vpop.f32.mrb[26].mxu1  ;;  %v1211_v0 = vpop.permute.xlu0 %1210 }
 0x2a9   :  { %v7592_v21 = vpop.f32.mrb[27].mxu1  ;;  %v1232_v18 = vsel %vm146_vm1, %v9701_v42, %v1211_v0 }
 0x2aa   :  { %v1240_v21 = vpack.c.bf16 %v1232_v18, %v1232_v18 }
 0x2af   :  { %v8908_v5 = vpop.eup %8907  ;;  %v1209_v22 = vpop.permute.xlu1 %1208 }
 0x2b0   :  { %v1231_v24 = vsel %vm146_vm1, %v8908_v5, %v1209_v22  ;;  %1206 = vrot.lane.b32.xlu1 %v8908_v5, %s9203_s26 }
 0x2b1   :  { %v1239_v27 = vpack.c.bf16 %v1231_v24, %v1231_v24 }
 0x2b3   :  { %7638 = vmatmul.mubr.msk.bf16.vlgmr.msra.gmra.mrb[32].mxu1 %vm235_vm2, %v1239_v27  ;;  %v798_v30 = vpop.permute.xlu1 %797  ;;  %v952_v34 = vpop.f32.mrb[20].mxu0 }
 0x2b4   :  { %v817_v35 = vsel %vm146_vm1, %v9287_v6, %v798_v30  ;;  %1212 = vrot.lane.b32.xlu1 %v9287_v6, %s9203_s26  ;;  %v7555_v37 = vpop.f32.mrb[21].mxu0  ;;  %7654 = vmatpush3.bf16.msra.mxu1 %v9393_v23 }
 0x2b5   :  { %v825_v41 = vpack.c.bf16 %v817_v35, %v817_v35  ;;  %v955_v44 = vpop.f32.mrb[22].mxu0  ;;  %7655 = vmatprep.subr.bf16.mxu1 %v9204_v1  ;;  %7661 = vmatprep.mubr.msk.bf16.mxu1 %vm9205_vm0, %v9204_v1 }
 0x2b6   :  { %v1167_v48 = vpop.f32.mrb[28].mxu1  ;;  %v7556_v49 = vpop.f32.mrb[23].mxu0 }
 0x2b7   :  { %7578 = vmatmul.mubr.msk.bf16.vlgmr.msra.gmra.mrb[24].mxu0 %vm235_vm2, %v825_v41  ;;  %v7615_v51 = vpop.f32.mrb[29].mxu1 }
 0x2b8   :  { %7594 = vmatpush3.bf16.msra.mxu0 %v9565_v60  ;;  %7601 = vmatprep.mubr.msk.bf16.mxu0 %vm9205_vm0, %v9204_v1  ;;  %v1170_v54 = vpop.f32.mrb[30].mxu1 }
 0x2b9   :  { %7595 = vmatprep.subr.bf16.mxu0 %v9204_v1  ;;  %v7616_v56 = vpop.f32.mrb[31].mxu1  ;;  %1220 = vrot.lane.b32.xlu1 %v9301_v8, %s9203_s26  ;;  %v827_v8 = vpack.c.bf16 %v819_v59, %v819_v59 }
 0x2ba   :  { %7656 = vmatpush3.bf16.msra.mxu1 %v9400_v25 }
 0x2bb   :  { %7657 = vmatprep.subr.bf16.mxu1 %v9204_v1 }
 0x2bc   :  { %7596 = vmatpush3.bf16.msra.mxu0 %v9573_v61 }
 0x2bd   :  { %7597 = vmatprep.subr.bf16.mxu0 %v9204_v1  ;;  %1629 = vrot.lane.b32.xlu1 %v9287_v6, %s9203_s26 }
 0x2be   :  { %7658 = vmatpush3.bf16.msra.mxu1 %v9409_v26 }
 0x2bf   :  { %7659 = vmatprep.subr.bf16.mxu1 %v9204_v1 }
 0x2c0   :  { %7598 = vmatpush3.bf16.msra.mxu0 %v9582_v62 }
 0x2c1   :  { %7599 = vmatprep.subr.bf16.mxu0 %v9204_v1  ;;  %1218 = vrot.lane.b32.xlu1 %v9365_v16, %s9203_s26 }
 0x2c2   :  { %7660 = vmatpush3.bf16.msra.mxu1 %v9418_v29 }
 0x2c3   :  { %7677 = vmatprep.subr.bf16.mxu1 %v9204_v1 }
 0x2c4   :  { %7600 = vmatpush3.bf16.msra.mxu0 %v9591_v17 }
 0x2c5   :  { %7617 = vmatprep.subr.bf16.mxu0 %v9204_v1 }
 0x2c7   :  { %7602 = vmatmul.mubr.msk.bf16.vlgmr.msra.gmra.mrb[28].mxu0 %vm235_vm2, %v827_v8 }
 0x2c8   :  { %7618 = vmatpush3.bf16.msra.mxu0 %v9260_v2  ;;  %7625 = vmatprep.mubr.msk.bf16.mxu0 %vm9205_vm0, %v9204_v1  ;;  %v6708_v2 = vld [vmem:[%s12044_s0 + $0x4] sm:$0x3] }
 0x2c9   :  { %7619 = vmatprep.subr.bf16.mxu0 %v9204_v1 }
 0x2cc   :  { %7620 = vmatpush3.bf16.msra.mxu0 %v9267_v3 }
 0x2cd   :  { %7621 = vmatprep.subr.bf16.mxu0 %v9204_v1 }
 0x2d0   :  { %7622 = vmatpush3.bf16.msra.mxu0 %v9277_v4 }
 0x2d1   :  { %7623 = vmatprep.subr.bf16.mxu0 %v9204_v1 }
 0x2d4   :  { %7624 = vmatpush3.bf16.msra.mxu0 %v9324_v11 }
 0x2d5   :  { %7641 = vmatprep.subr.bf16.mxu0 %v9204_v1 }
 0x322   :  { %v1207_v6 = vpop.permute.xlu1 %1206 }
 0x323   :  { %v1230_v7 = vsel %vm146_vm1, %v6708_v2, %v1207_v6 }
 0x324   :  { %v1238_v63 = vpack.c.bf16 %v1230_v7, %v1230_v7 }
 0x326   :  { %7626 = vmatmul.mubr.msk.bf16.vlgmr.msra.gmra.mrb[32].mxu0 %vm235_vm2, %v1238_v63  ;;  %v1213_v3 = vpop.permute.xlu1 %1212 }
 0x327   :  { %7642 = vmatpush3.bf16.msra.mxu0 %v9503_v45  ;;  %7649 = vmatprep.mubr.msk.bf16.mxu0 %vm9205_vm0, %v9204_v1  ;;  %v1233_v4 = vsel %vm146_vm1, %v9340_v13, %v1213_v3  ;;  %v1217_v13 = vpop.permute.xlu0 %1216 }
 0x328   :  { %7643 = vmatprep.subr.bf16.mxu0 %v9204_v1  ;;  %v1241_v11 = vpack.c.bf16 %v1233_v4, %v1233_v4  ;;  %v1235_v20 = vsel %vm146_vm1, %v9357_v15, %v1217_v13 }
 0x329   :  { %v1243_v5 = vpack.c.bf16 %v1235_v20, %v1235_v20 }
 0x32a   :  { %7662 = vmatmul.mubr.msk.bf16.vlgmr.msra.gmra.mrb[36].mxu1 %vm235_vm2, %v1241_v11 }
 0x32b   :  { %7644 = vmatpush3.bf16.msra.mxu0 %v9509_v46  ;;  %7678 = vmatpush3.bf16.msra.mxu1 %v9425_v31  ;;  %v1221_v42 = vpop.permute.xlu1 %1220 }
 0x32c   :  { %7645 = vmatprep.subr.bf16.mxu0 %v9204_v1  ;;  %7679 = vmatprep.subr.bf16.mxu1 %v9204_v1  ;;  %v1237_v22 = vsel %vm146_vm1, %v9365_v16, %v1221_v42 }
 0x32d   :  { %7685 = vmatprep.mubr.msk.bf16.mxu1 %vm9205_vm0, %v9204_v1  ;;  %v1245_v24 = vpack.c.bf16 %v1237_v22, %v1237_v22 }
 0x32f   :  { %7646 = vmatpush3.bf16.msra.mxu0 %v9516_v47  ;;  %7680 = vmatpush3.bf16.msra.mxu1 %v9433_v32 }
 0x330   :  { %7647 = vmatprep.subr.bf16.mxu0 %v9204_v1  ;;  %7681 = vmatprep.subr.bf16.mxu1 %v9204_v1 }
 0x333   :  { %7648 = vmatpush3.bf16.msra.mxu0 %v9525_v50  ;;  %7682 = vmatpush3.bf16.msra.mxu1 %v9442_v33 }
 0x334   :  { %7683 = vmatprep.subr.bf16.mxu1 %v9204_v1  ;;  %7665 = vmatprep.subr.bf16.mxu0 %v9204_v1 }
 0x336   :  { %7650 = vmatmul.mubr.msk.bf16.vlgmr.msra.gmra.mrb[36].mxu0 %vm235_vm2, %v1240_v21 }
 0x337   :  { %7684 = vmatpush3.bf16.msra.mxu1 %v9451_v36  ;;  %7666 = vmatpush3.bf16.msra.mxu0 %v9532_v52 }
 0x338   :  { %7701 = vmatprep.subr.bf16.mxu1 %v9204_v1  ;;  %7667 = vmatprep.subr.bf16.mxu0 %v9204_v1 }
 0x339   :  { %7673 = vmatprep.mubr.msk.bf16.mxu0 %vm9205_vm0, %v9204_v1 }
 0x33a   :  { %7686 = vmatmul.mubr.msk.bf16.vlgmr.msra.gmra.mrb[40].mxu1 %vm235_vm2, %v1243_v5  ;;  %v9845_v5 = vld [vmem:[%s12045_s1 + $0x6] sm:$0x3] }
 0x33b   :  { %7702 = vmatpush3.bf16.msra.mxu1 %v9458_v38  ;;  %7709 = vmatprep.mubr.msk.bf16.mxu1 %vm9205_vm0, %v9204_v1 }
 0x33c   :  { %7703 = vmatprep.subr.bf16.mxu1 %v9204_v1  ;;  %7668 = vmatpush3.bf16.msra.mxu0 %v9540_v53 }
 0x33d   :  { %7669 = vmatprep.subr.bf16.mxu0 %v9204_v1 }
 0x33f   :  { %7704 = vmatpush3.bf16.msra.mxu1 %v9466_v39 }
 0x340   :  { %7705 = vmatprep.subr.bf16.mxu1 %v9204_v1  ;;  %7670 = vmatpush3.bf16.msra.mxu0 %v9549_v55 }
 0x341   :  { %7671 = vmatprep.subr.bf16.mxu0 %v9204_v1 }
 0x343   :  { %7706 = vmatpush3.bf16.msra.mxu1 %v9475_v40 }
 0x344   :  { %7707 = vmatprep.subr.bf16.mxu1 %v9204_v1  ;;  %7672 = vmatpush3.bf16.msra.mxu0 %v9558_v58 }
 0x345   :  { %7689 = vmatprep.subr.bf16.mxu0 %v9204_v1 }
 0x347   :  { %7708 = vmatpush3.bf16.msra.mxu1 %v9484_v43 }
 0x348   :  { %7725 = vmatprep.subr.bf16.mxu1 %v9204_v1 }
 0x34a   :  { %7710 = vmatmul.mubr.msk.bf16.vlgmr.msra.gmra.mrb[44].mxu1 %vm235_vm2, %v1245_v24 }
 0x34b   :  { %7726 = vmatpush3.bf16.msra.mxu1 %v9307_v9  ;;  %7733 = vmatprep.mubr.msk.bf16.mxu1 %vm9205_vm0, %v9204_v1 }
 0x34c   :  { %7727 = vmatprep.subr.bf16.mxu1 %v9204_v1 }
 0x34f   :  { %7728 = vmatpush3.bf16.msra.mxu1 %v9314_v10 }
 0x350   :  { %7729 = vmatprep.subr.bf16.mxu1 %v9204_v1 }
 0x353   :  { %7730 = vmatpush3.bf16.msra.mxu1 %v9332_v12 }
 0x354   :  { %7731 = vmatprep.subr.bf16.mxu1 %v9204_v1 }
 0x357   :  { %7732 = vmatpush3.bf16.msra.mxu1 %v9350_v14 }
 0x358   :  { %7749 = vmatprep.subr.bf16.mxu1 %v9204_v1 }
 0x386   :  { %v1326_v16 = vpop.f32.mrb[32].mxu1 }
 0x387   :  { %v1327_v9 = vadd.f32 %v9698_v28, %v1326_v16  ;;  %v7639_v27 = vpop.f32.mrb[33].mxu1 }
 0x388   :  { %v1329_v30 = vpop.f32.mrb[34].mxu1 }
 0x389   :  { %8909 = vtanh.f32 %v1327_v9  ;;  %v7640_v34 = vpop.f32.mrb[35].mxu1 }
 0x38a   :  { %v1038_v35 = vpop.f32.mrb[24].mxu0  ;;  %v1630_v34 = vpop.permute.xlu1 %1629 }
 0x38b   :  { %v7579_v37 = vpop.f32.mrb[25].mxu0 }
 0x38c   :  { %v1041_v10 = vpop.f32.mrb[26].mxu0 }
 0x38d   :  { %v7580_v41 = vpop.f32.mrb[27].mxu0 }
 0x393   :  { %v9823_v44 = vpop.eup %8909 }
 0x394   :  { %1625 = vrot.lane.b32.xlu0 %v9823_v44, %s9203_s26 }
 0x398   :  { %1214 = vrot.lane.b32.xlu0 %v9357_v15, %s9203_s26  ;;  %v9835_v15 = vld [vmem:[%s12047_s3 + $0x2] ss:$0 sm:$0xff] }
 0x39a   :  { %v1124_v12 = vpop.f32.mrb[28].mxu0 }
 0x39b   :  { %v7603_v14 = vpop.f32.mrb[29].mxu0  ;;  %v9880_v12 = vld [vmem:[%s12045_s1 + $0xe] sm:$0x3] }
 0x39c   :  { %v1127_v48 = vpop.f32.mrb[30].mxu0 }
 0x39d   :  { %v7604_v49 = vpop.f32.mrb[31].mxu0 }
 0x39e   :  { %v9915_v49 = vld [vmem:[%s12046_s2 + $0x10] sm:$0xff]  }
 0x3f9   :  { %v1283_v51 = vpop.f32.mrb[32].mxu0 }
 0x3fa   :  { %v1284_v54 = vadd.f32 %v9610_v19, %v1283_v51  ;;  %v7627_v56 = vpop.f32.mrb[33].mxu0 }
 0x3fb   :  { %v1286_v57 = vpop.f32.mrb[34].mxu0 }
 0x3fc   :  { %8911 = vtanh.f32 %v1284_v54  ;;  %v7628_v59 = vpop.f32.mrb[35].mxu0 }
 0x3fd   :  { %v1412_v8 = vpop.f32.mrb[36].mxu1  ;;  %v9939_v59 = vld [vmem:[%s12045_s1 + $0x8] sm:$0x3] }
 0x3fe   :  { %v7663_v2 = vpop.f32.mrb[37].mxu1 }
 0x3ff   :  { %v1415_v6 = vpop.f32.mrb[38].mxu1 }
 0x400   :  { %v7664_v7 = vpop.f32.mrb[39].mxu1 }
 0x406   :  { %v8912_v63 = vpop.eup %8911  ;;  %v1626_v3 = vpop.permute.xlu0 %1625 }
 0x407   :  { %v1648_v4 = vsel %vm146_vm1, %v8912_v63, %v1626_v3  ;;  %1623 = vrot.lane.b32.xlu0 %v8912_v63, %s9203_s26 }
 0x408   :  { %v1656_v11 = vpack.c.bf16 %v1648_v4, %v1648_v4 }
 0x409   :  { %v1369_v0 = vpop.f32.mrb[36].mxu0 }
 0x40a   :  { %v1370_v13 = vadd.f32 %v9835_v15, %v1369_v0  ;;  %v7651_v18 = vpop.f32.mrb[37].mxu0  ;;  %7734 = vmatmul.mubr.msk.bf16.vlgmr.msra.gmra.mrb[48].mxu1 %vm235_vm2, %v1656_v11  ;;  %v1215_v20 = vpop.permute.xlu0 %1214 }
 0x40b   :  { %v1372_v21 = vpop.f32.mrb[38].mxu0  ;;  %7750 = vmatpush3.bf16.msra.mxu1 %v9393_v23  ;;  %7757 = vmatprep.mubr.msk.bf16.mxu1 %vm9205_vm0, %v9204_v1  ;;  %v1234_v42 = vsel %vm146_vm1, %v9845_v5, %v1215_v20  ;;  %v9853_v23 = vld [vmem:[%s12045_s1 + $0xa] sm:$0x3]  ;;  %v10019_v18 = vld [vmem:[%s12047_s3 + $0x3] ss:$0 sm:$0xff] }
 0x40c   :  { %8913 = vtanh.f32 %v1370_v13  ;;  %v7652_v22 = vpop.f32.mrb[39].mxu0  ;;  %7751 = vmatprep.subr.bf16.mxu1 %v9204_v1  ;;  %v1242_v24 = vpack.c.bf16 %v1234_v42, %v1234_v42  ;;  %1633 = vrot.lane.b32.xlu0 %v9853_v23, %s9203_s26 }
 0x40d   :  { %v1498_v16 = vpop.f32.mrb[40].mxu1 }
 0x40e   :  { %7674 = vmatmul.mubr.msk.bf16.vlgmr.msra.gmra.mrb[40].mxu0 %vm235_vm2, %v1242_v24  ;;  %v7687_v9 = vpop.f32.mrb[41].mxu1 }
 0x40f   :  { %7752 = vmatpush3.bf16.msra.mxu1 %v9400_v25  ;;  %7690 = vmatpush3.bf16.msra.mxu0 %v9565_v60  ;;  %v1501_v27 = vpop.f32.mrb[42].mxu1  ;;  %v1219_v25 = vpop.permute.xlu1 %1218 }
 0x410   :  { %7753 = vmatprep.subr.bf16.mxu1 %v9204_v1  ;;  %7691 = vmatprep.subr.bf16.mxu0 %v9204_v1  ;;  %v7688_v30 = vpop.f32.mrb[43].mxu1 }
 0x411   :  { %7697 = vmatprep.mubr.msk.bf16.mxu0 %vm9205_vm0, %v9204_v1 }
 0x413   :  { %7754 = vmatpush3.bf16.msra.mxu1 %v9409_v26  ;;  %7692 = vmatpush3.bf16.msra.mxu0 %v9573_v61  ;;  %v1236_v26 = vsel %vm146_vm1, %v9853_v23, %v1219_v25 }
 0x414   :  { %7755 = vmatprep.subr.bf16.mxu1 %v9204_v1  ;;  %7693 = vmatprep.subr.bf16.mxu0 %v9204_v1  ;;  %v1244_v41 = vpack.c.bf16 %v1236_v26, %v1236_v26 }
 0x416   :  { %v8914_v35 = vpop.eup %8913 }
 0x417   :  { %v1650_v37 = vsel %vm146_vm1, %v8914_v35, %v1630_v34  ;;  %7756 = vmatpush3.bf16.msra.mxu1 %v9418_v29  ;;  %1627 = vrot.lane.b32.xlu1 %v8914_v35, %s9203_s26 }
 0x418   :  { %v1658_v10 = vpack.c.bf16 %v1650_v37, %v1650_v37  ;;  %7694 = vmatpush3.bf16.msra.mxu0 %v9582_v62  ;;  %7773 = vmatprep.subr.bf16.mxu1 %v9204_v1 }
 0x419   :  { %7695 = vmatprep.subr.bf16.mxu0 %v9204_v1 }
 0x41a   :  { %7758 = vmatmul.mubr.msk.bf16.vlgmr.msra.gmra.mrb[52].mxu1 %vm235_vm2, %v1658_v10 }
 0x41b   :  { %1637 = vrot.lane.b32.xlu1 %v9880_v12, %s9203_s26  ;;  %7774 = vmatpush3.bf16.msra.mxu1 %v9425_v31  ;;  %v9895_v31 = vld [vmem:[%s12046_s2] sm:$0xff]  }
 0x41c   :  { %7696 = vmatpush3.bf16.msra.mxu0 %v9591_v17  ;;  %7775 = vmatprep.subr.bf16.mxu1 %v9204_v1 }
 0x41d   :  { %7713 = vmatprep.subr.bf16.mxu0 %v9204_v1  ;;  %v1584_v29 = vpop.f32.mrb[44].mxu1  ;;  %7781 = vmatprep.mubr.msk.bf16.mxu1 %vm9205_vm0, %v9204_v1 }
 0x41e   :  { %v7711_v14 = vpop.f32.mrb[45].mxu1 }
 0x41f   :  { %7698 = vmatmul.mubr.msk.bf16.vlgmr.msra.gmra.mrb[44].mxu0 %vm235_vm2, %v1244_v41  ;;  %v1587_v48 = vpop.f32.mrb[46].mxu1  ;;  %7776 = vmatpush3.bf16.msra.mxu1 %v9433_v32  ;;  %v9906_v32 = vld [vmem:[%s12046_s2 + $0x8] sm:$0xff]  }
 0x420   :  { %7714 = vmatpush3.bf16.msra.mxu0 %v9895_v31  ;;  %7721 = vmatprep.mubr.msk.bf16.mxu0 %vm9205_vm0, %v9204_v1  ;;  %v7712_v17 = vpop.f32.mrb[47].mxu1 }
 0x421   :  { %7715 = vmatprep.subr.bf16.mxu0 %v9204_v1  ;;  %7777 = vmatprep.subr.bf16.mxu1 %v9204_v1 }
 0x423   :  { %7778 = vmatpush3.bf16.msra.mxu1 %v9442_v33  ;;  %v9923_v33 = vld [vmem:[%s12046_s2 + $0x18] sm:$0xff]  }
 0x424   :  { %7716 = vmatpush3.bf16.msra.mxu0 %v9906_v32  ;;  %7779 = vmatprep.subr.bf16.mxu1 %v9204_v1 }
 0x425   :  { %7717 = vmatprep.subr.bf16.mxu0 %v9204_v1 }
 0x427   :  { %7780 = vmatpush3.bf16.msra.mxu1 %v9451_v36  ;;  %v6717_v36 = vld [vmem:[%s12044_s0 + $0x6] sm:$0x3] }
 0x428   :  { %7718 = vmatpush3.bf16.msra.mxu0 %v9915_v49  ;;  %7797 = vmatprep.subr.bf16.mxu1 %v9204_v1 }
 0x429   :  { %7719 = vmatprep.subr.bf16.mxu0 %v9204_v1 }
 0x42c   :  { %7720 = vmatpush3.bf16.msra.mxu0 %v9923_v33 }
 0x42d   :  { %7737 = vmatprep.subr.bf16.mxu0 %v9204_v1 }
 0x479   :  { %v1624_v51 = vpop.permute.xlu0 %1623 }
 0x47a   :  { %v1647_v54 = vsel %vm146_vm1, %v6717_v36, %v1624_v51 }
 0x47b   :  { %v1655_v56 = vpack.c.bf16 %v1647_v54, %v1647_v54 }
 0x47d   :  { %7722 = vmatmul.mubr.msk.bf16.vlgmr.msra.gmra.mrb[48].mxu0 %vm235_vm2, %v1655_v56 }
 0x47e   :  { %7738 = vmatpush3.bf16.msra.mxu0 %v9503_v45  ;;  %7745 = vmatprep.mubr.msk.bf16.mxu0 %vm9205_vm0, %v9204_v1  ;;  %v1634_v57 = vpop.permute.xlu0 %1633 }
 0x47f   :  { %7739 = vmatprep.subr.bf16.mxu0 %v9204_v1  ;;  %v1652_v8 = vsel %vm146_vm1, %v9939_v59, %v1634_v57 }
 0x480   :  { %v1660_v2 = vpack.c.bf16 %v1652_v8, %v1652_v8 }
 0x482   :  { %7740 = vmatpush3.bf16.msra.mxu0 %v9509_v46  ;;  %7782 = vmatmul.mubr.msk.bf16.vlgmr.msra.gmra.mrb[56].mxu1 %vm235_vm2, %v1660_v2 }
 0x483   :  { %7741 = vmatprep.subr.bf16.mxu0 %v9204_v1  ;;  %7798 = vmatpush3.bf16.msra.mxu1 %v9458_v38 }
 0x484   :  { %7799 = vmatprep.subr.bf16.mxu1 %v9204_v1  ;;  %7805 = vmatprep.mubr.msk.bf16.mxu1 %vm9205_vm0, %v9204_v1 }
 0x486   :  { %7742 = vmatpush3.bf16.msra.mxu0 %v9516_v47 }
 0x487   :  { %7743 = vmatprep.subr.bf16.mxu0 %v9204_v1  ;;  %7800 = vmatpush3.bf16.msra.mxu1 %v9466_v39  ;;  %v9964_v39 = vld [vmem:[%s12045_s1 + $0xc] sm:$0x3] }
 0x488   :  { %7801 = vmatprep.subr.bf16.mxu1 %v9204_v1 }
 0x489   :  { %v1628_v45 = vpop.permute.xlu1 %1627 }
 0x48a   :  { %v1649_v46 = vsel %vm146_vm1, %v9823_v44, %v1628_v45  ;;  %7744 = vmatpush3.bf16.msra.mxu0 %v9525_v50  ;;  %v9979_v50 = vld [vmem:[%s12046_s2 + $0x20] sm:$0xff]  }
 0x48b   :  { %v1657_v38 = vpack.c.bf16 %v1649_v46, %v1649_v46  ;;  %7802 = vmatpush3.bf16.msra.mxu1 %v9475_v40  ;;  %7761 = vmatprep.subr.bf16.mxu0 %v9204_v1  ;;  %v10038_v45 = vld [vmem:[%s12046_s2 + $0x60] sm:$0xff]  }
 0x48c   :  { %7803 = vmatprep.subr.bf16.mxu1 %v9204_v1 }
 0x48d   :  { %7746 = vmatmul.mubr.msk.bf16.vlgmr.msra.gmra.mrb[52].mxu0 %vm235_vm2, %v1657_v38  ;;  %v1638_v47 = vpop.permute.xlu1 %1637 }
 0x48e   :  { %v1654_v44 = vsel %vm146_vm1, %v9964_v39, %v1638_v47  ;;  %7762 = vmatpush3.bf16.msra.mxu0 %v9532_v52  ;;  %7769 = vmatprep.mubr.msk.bf16.mxu0 %vm9205_vm0, %v9204_v1  ;;  %v9999_v52 = vld [vmem:[%s12046_s2 + $0x30] sm:$0xff]  }
 0x48f   :  { %v1662_v40 = vpack.c.bf16 %v1654_v44, %v1654_v44  ;;  %7804 = vmatpush3.bf16.msra.mxu1 %v9484_v43  ;;  %7763 = vmatprep.subr.bf16.mxu0 %v9204_v1  ;;  %v9990_v43 = vld [vmem:[%s12046_s2 + $0x28] sm:$0xff]  }
 0x490   :  { %7821 = vmatprep.subr.bf16.mxu1 %v9204_v1 }
 0x492   :  { %7806 = vmatmul.mubr.msk.bf16.vlgmr.msra.gmra.mrb[60].mxu1 %vm235_vm2, %v1662_v40  ;;  %7764 = vmatpush3.bf16.msra.mxu0 %v9540_v53  ;;  %v10007_v53 = vld [vmem:[%s12046_s2 + $0x38] sm:$0xff]   ;;  %v10052_v40 = vld [vmem:[%s12046_s2 + $0x68] sm:$0xff]  }
 0x493   :  { %7822 = vmatpush3.bf16.msra.mxu1 %v9979_v50  ;;  %7829 = vmatprep.mubr.msk.bf16.mxu1 %vm9205_vm0, %v9204_v1 }
 0x494   :  { %7823 = vmatprep.subr.bf16.mxu1 %v9204_v1  ;;  %7765 = vmatprep.subr.bf16.mxu0 %v9204_v1 }
 0x496   :  { %7766 = vmatpush3.bf16.msra.mxu0 %v9549_v55 }
 0x497   :  { %7824 = vmatpush3.bf16.msra.mxu1 %v9990_v43  ;;  %7767 = vmatprep.subr.bf16.mxu0 %v9204_v1 }
 0x498   :  { %7825 = vmatprep.subr.bf16.mxu1 %v9204_v1 }
 0x49a   :  { %7768 = vmatpush3.bf16.msra.mxu0 %v9558_v58 }
 0x49b   :  { %7826 = vmatpush3.bf16.msra.mxu1 %v9999_v52  ;;  %7785 = vmatprep.subr.bf16.mxu0 %v9204_v1 }
 0x49c   :  { %7827 = vmatprep.subr.bf16.mxu1 %v9204_v1 }
 0x49f   :  { %7828 = vmatpush3.bf16.msra.mxu1 %v10007_v53 }
 0x4a0   :  { %7845 = vmatprep.subr.bf16.mxu1 %v9204_v1 }
 0x4dd   :  { %v1743_v55 = vpop.f32.mrb[48].mxu1 }
 0x4de   :  { %v1744_v58 = vadd.f32 %v9698_v28, %v1743_v55  ;;  %v7735_v6 = vpop.f32.mrb[49].mxu1 }
 0x4df   :  { %v1746_v7 = vpop.f32.mrb[50].mxu1  ;;  %v10065_v6 = vld [vmem:[%s12046_s2 + $0x70] sm:$0xff]  }
 0x4e0   :  { %8915 = vtanh.f32 %v1744_v58  ;;  %v7736_v63 = vpop.f32.mrb[51].mxu1 }
 0x4e1   :  { %v1455_v3 = vpop.f32.mrb[40].mxu0 }
 0x4e2   :  { %v7675_v4 = vpop.f32.mrb[41].mxu0  ;;  %v10075_v3 = vld [vmem:[%s12046_s2 + $0x78] sm:$0xff]  }
 0x4e3   :  { %v1458_v11 = vpop.f32.mrb[42].mxu0 }
 0x4e4   :  { %v7676_v0 = vpop.f32.mrb[43].mxu0 }
 0x4e5   :  { %v10090_v0 = vld [vmem:[%s12046_s2 + $0xa0] sm:$0xff]  }
 0x4ea   :  { %v10012_v13 = vpop.eup %8915 }
 0x4eb   :  { %2042 = vrot.lane.b32.xlu0 %v10012_v13, %s9203_s26 }
 0x4ed   :  { %v1829_v20 = vpop.f32.mrb[52].mxu1 }
 0x4ee   :  { %v1830_v21 = vadd.f32 %v10019_v18, %v1829_v20  ;;  %v7759_v42 = vpop.f32.mrb[53].mxu1  ;;  %v10096_v20 = vld [vmem:[%s12046_s2 + $0xd8] sm:$0xff]  }
 0x4ef   :  { %v1832_v22 = vpop.f32.mrb[54].mxu1  ;;  %1631 = vrot.lane.b32.xlu0 %v9939_v59, %s9203_s26  ;;  %v10118_v42 = vld [vmem:[%s12046_s2 + $0xb0] sm:$0xff]  }
 0x4f0   :  { %8917 = vtanh.f32 %v1830_v21  ;;  %v7760_v24 = vpop.f32.mrb[55].mxu1  ;;  %v10107_v21 = vld [vmem:[%s12046_s2 + $0xa8] sm:$0xff]   ;;  %v10127_v22 = vld [vmem:[%s12046_s2 + $0xb8] sm:$0xff]  }
 0x4f1   :  { %v6726_v24 = vld [vmem:[%s12044_s0 + $0x8] sm:$0x3] }
 0x4f2   :  { %v1541_v16 = vpop.f32.mrb[44].mxu0 }
 0x4f3   :  { %v7699_v9 = vpop.f32.mrb[45].mxu0 }
 0x4f4   :  { %v1544_v27 = vpop.f32.mrb[46].mxu0 }
 0x4f5   :  { %v7700_v30 = vpop.f32.mrb[47].mxu0 }
 0x4f6   :  { %v10143_v30 = vld [vmem:[%s12046_s2 + $0x40] sm:$0xff]  }
 0x4fa   :  { %v10024_v34 = vpop.eup %8917 }
 0x4fb   :  { %2046 = vrot.lane.b32.xlu1 %v10024_v34, %s9203_s26 }
 0x4ff   :  { %1635 = vrot.lane.b32.xlu1 %v9964_v39, %s9203_s26 }
 0x550   :  { %v1700_v25 = vpop.f32.mrb[48].mxu0 }
 0x551   :  { %v1701_v35 = vadd.f32 %v9610_v19, %v1700_v25  ;;  %v7723_v37 = vpop.f32.mrb[49].mxu0  ;;  %v10152_v25 = vld [vmem:[%s12046_s2 + $0x48] sm:$0xff]  }
 0x552   :  { %v1703_v10 = vpop.f32.mrb[50].mxu0 }
 0x553   :  { %8919 = vtanh.f32 %v1701_v35  ;;  %v7724_v26 = vpop.f32.mrb[51].mxu0  ;;  %v10159_v35 = vld [vmem:[%s12046_s2 + $0x50] sm:$0xff]  }
 0x554   :  { %v10168_v26 = vld [vmem:[%s12046_s2 + $0x58] sm:$0xff]  }
 0x555   :  { %v1915_v41 = vpop.f32.mrb[56].mxu1 }
 0x556   :  { %v7783_v29 = vpop.f32.mrb[57].mxu1 }
 0x557   :  { %v1918_v14 = vpop.f32.mrb[58].mxu1 }
 0x558   :  { %v7784_v48 = vpop.f32.mrb[59].mxu1  ;;  %v10176_v14 = vld [vmem:[%s12046_s2 + $0x80] sm:$0xff]  }
 0x55d   :  { %v8920_v17 = vpop.eup %8919  ;;  %v2043_v36 = vpop.permute.xlu0 %2042 }
 0x55e   :  { %v2065_v51 = vsel %vm146_vm1, %v8920_v17, %v2043_v36  ;;  %2040 = vrot.lane.b32.xlu0 %v8920_v17, %s9203_s26  ;;  %v10188_v17 = vld [vmem:[%s12046_s2 + $0x88] sm:$0xff]   ;;  %v10194_v36 = vld [vmem:[%s12046_s2 + $0xe0] sm:$0xff]  }
 0x55f   :  { %v2073_v54 = vpack.c.bf16 %v2065_v51, %v2065_v51  ;;  %v10204_v51 = vld [vmem:[%s12046_s2 + $0x90] sm:$0xff]  }
 0x560   :  { %v1786_v56 = vpop.f32.mrb[52].mxu0 }
 0x561   :  { %v1787_v57 = vadd.f32 %v9835_v15, %v1786_v56  ;;  %v7747_v8 = vpop.f32.mrb[53].mxu0  ;;  %7830 = vmatmul.mubr.msk.bf16.vlgmr.msra.gmra.mrb[64].mxu1 %vm235_vm2, %v2073_v54  ;;  %v1632_v19 = vpop.permute.xlu0 %1631  ;;  %v10210_v54 = vld [vmem:[%s12046_s2 + $0xe8] sm:$0xff]  }
 0x562   :  { %v1789_v2 = vpop.f32.mrb[54].mxu0  ;;  %7846 = vmatpush3.bf16.msra.mxu1 %v10038_v45  ;;  %2048 = vrot.lane.b32.xlu0 %v9939_v59, %s9203_s26  ;;  %v1651_v46 = vsel %vm146_vm1, %v9845_v5, %v1632_v19  ;;  %v10220_v8 = vld [vmem:[%s12046_s2 + $0x98] sm:$0xff]   ;;  %v10226_v19 = vld [vmem:[%s12046_s2 + $0xf0] sm:$0xff]  }
 0x563   :  { %8921 = vtanh.f32 %v1787_v57  ;;  %v7748_v38 = vpop.f32.mrb[55].mxu0  ;;  %7847 = vmatprep.subr.bf16.mxu1 %v9204_v1  ;;  %7853 = vmatprep.mubr.msk.bf16.mxu1 %vm9205_vm0, %v9204_v1  ;;  %v1659_v47 = vpack.c.bf16 %v1651_v46, %v1651_v46 }
 0x564   :  { %v10237_v38 = vld [vmem:[%s12046_s2 + $0xf8] sm:$0xff]  }
 0x565   :  { %7770 = vmatmul.mubr.msk.bf16.vlgmr.msra.gmra.mrb[56].mxu0 %vm235_vm2, %v1659_v47  ;;  %v2001_v44 = vpop.f32.mrb[60].mxu1  ;;  %v10243_v47 = vld [vmem:[%s12046_s2 + $0xc0] sm:$0xff]  }
 0x566   :  { %7848 = vmatpush3.bf16.msra.mxu1 %v10052_v40  ;;  %7786 = vmatpush3.bf16.msra.mxu0 %v9565_v60  ;;  %v7807_v5 = vpop.f32.mrb[61].mxu1  ;;  %v10258_v44 = vld [vmem:[%s12046_s2 + $0xc8] sm:$0xff]  }
 0x567   :  { %7849 = vmatprep.subr.bf16.mxu1 %v9204_v1  ;;  %7787 = vmatprep.subr.bf16.mxu0 %v9204_v1  ;;  %v2004_v55 = vpop.f32.mrb[62].mxu1  ;;  %v10267_v5 = vld [vmem:[%s12046_s2 + $0xd0] sm:$0xff]  }
 0x568   :  { %7793 = vmatprep.mubr.msk.bf16.mxu0 %vm9205_vm0, %v9204_v1  ;;  %v7808_v58 = vpop.f32.mrb[63].mxu1  ;;  %2054 = vrot.lane.b32.xlu0 %v9880_v12, %s9203_s26 }
 0x56a   :  { %7850 = vmatpush3.bf16.msra.mxu1 %v10065_v6  ;;  %7788 = vmatpush3.bf16.msra.mxu0 %v9573_v61 }
 0x56b   :  { %7851 = vmatprep.subr.bf16.mxu1 %v9204_v1  ;;  %7789 = vmatprep.subr.bf16.mxu0 %v9204_v1 }
 0x56d   :  { %v8922_v60 = vpop.eup %8921  ;;  %v2047_v7 = vpop.permute.xlu1 %2046 }
 0x56e   :  { %v2067_v63 = vsel %vm146_vm1, %v8922_v60, %v2047_v7  ;;  %7852 = vmatpush3.bf16.msra.mxu1 %v10075_v3  ;;  %2044 = vrot.lane.b32.xlu1 %v8922_v60, %s9203_s26 }
 0x56f   :  { %v2075_v4 = vpack.c.bf16 %v2067_v63, %v2067_v63  ;;  %7790 = vmatpush3.bf16.msra.mxu0 %v9582_v62  ;;  %7869 = vmatprep.subr.bf16.mxu1 %v9204_v1 }
 0x570   :  { %7791 = vmatprep.subr.bf16.mxu0 %v9204_v1 }
 0x571   :  { %7854 = vmatmul.mubr.msk.bf16.vlgmr.msra.gmra.mrb[68].mxu1 %vm235_vm2, %v2075_v4  ;;  %v1636_v61 = vpop.permute.xlu1 %1635 }
 0x572   :  { %v1653_v11 = vsel %vm146_vm1, %v9853_v23, %v1636_v61  ;;  %2050 = vrot.lane.b32.xlu1 %v9853_v23, %s9203_s26  ;;  %7870 = vmatpush3.bf16.msra.mxu1 %v10090_v0 }
 0x573   :  { %v1661_v62 = vpack.c.bf16 %v1653_v11, %v1653_v11  ;;  %7792 = vmatpush3.bf16.msra.mxu0 %v10096_v20  ;;  %7871 = vmatprep.subr.bf16.mxu1 %v9204_v1 }
 0x574   :  { %7809 = vmatprep.subr.bf16.mxu0 %v9204_v1  ;;  %7877 = vmatprep.mubr.msk.bf16.mxu1 %vm9205_vm0, %v9204_v1 }
 0x576   :  { %7794 = vmatmul.mubr.msk.bf16.vlgmr.msra.gmra.mrb[60].mxu0 %vm235_vm2, %v1661_v62  ;;  %7872 = vmatpush3.bf16.msra.mxu1 %v10107_v21 }
 0x577   :  { %7810 = vmatpush3.bf16.msra.mxu0 %v9895_v31  ;;  %7817 = vmatprep.mubr.msk.bf16.mxu0 %vm9205_vm0, %v9204_v1 }
 0x578   :  { %7811 = vmatprep.subr.bf16.mxu0 %v9204_v1  ;;  %7873 = vmatprep.subr.bf16.mxu1 %v9204_v1 }
 0x57a   :  { %7874 = vmatpush3.bf16.msra.mxu1 %v10118_v42 }
 0x57b   :  { %7812 = vmatpush3.bf16.msra.mxu0 %v9906_v32  ;;  %7875 = vmatprep.subr.bf16.mxu1 %v9204_v1 }
 0x57c   :  { %7813 = vmatprep.subr.bf16.mxu0 %v9204_v1 }
 0x57e   :  { %7876 = vmatpush3.bf16.msra.mxu1 %v10127_v22 }
 0x57f   :  { %7814 = vmatpush3.bf16.msra.mxu0 %v9915_v49  ;;  %7893 = vmatprep.subr.bf16.mxu1 %v9204_v1 }
 0x580   :  { %7815 = vmatprep.subr.bf16.mxu0 %v9204_v1 }
 0x583   :  { %7816 = vmatpush3.bf16.msra.mxu0 %v9923_v33 }
 0x584   :  { %7833 = vmatprep.subr.bf16.mxu0 %v9204_v1 }
 0x5d0   :  { %v2041_v16 = vpop.permute.xlu0 %2040 }
 0x5d1   :  { %v2064_v9 = vsel %vm146_vm1, %v6726_v24, %v2041_v16 }
 0x5d2   :  { %v2072_v27 = vpack.c.bf16 %v2064_v9, %v2064_v9 }
 0x5d4   :  { %7818 = vmatmul.mubr.msk.bf16.vlgmr.msra.gmra.mrb[64].mxu0 %vm235_vm2, %v2072_v27 }
 0x5d5   :  { %7834 = vmatpush3.bf16.msra.mxu0 %v10143_v30  ;;  %7841 = vmatprep.mubr.msk.bf16.mxu0 %vm9205_vm0, %v9204_v1 }
 0x5d6   :  { %7835 = vmatprep.subr.bf16.mxu0 %v9204_v1 }
 0x5d9   :  { %7836 = vmatpush3.bf16.msra.mxu0 %v10152_v25 }
 0x5da   :  { %7837 = vmatprep.subr.bf16.mxu0 %v9204_v1 }
 0x5dd   :  { %7838 = vmatpush3.bf16.msra.mxu0 %v10159_v35 }
 0x5de   :  { %7839 = vmatprep.subr.bf16.mxu0 %v9204_v1 }
 0x5e0   :  { %v2045_v37 = vpop.permute.xlu1 %2044 }
 0x5e1   :  { %v2066_v10 = vsel %vm146_vm1, %v10012_v13, %v2045_v37  ;;  %7840 = vmatpush3.bf16.msra.mxu0 %v10168_v26 }
 0x5e2   :  { %v2074_v41 = vpack.c.bf16 %v2066_v10, %v2066_v10  ;;  %7857 = vmatprep.subr.bf16.mxu0 %v9204_v1 }
 0x5e4   :  { %7842 = vmatmul.mubr.msk.bf16.vlgmr.msra.gmra.mrb[68].mxu0 %vm235_vm2, %v2074_v41  ;;  %v2051_v29 = vpop.permute.xlu1 %2050 }
 0x5e5   :  { %7858 = vmatpush3.bf16.msra.mxu0 %v10176_v14  ;;  %7865 = vmatprep.mubr.msk.bf16.mxu0 %vm9205_vm0, %v9204_v1  ;;  %v2069_v13 = vsel %vm146_vm1, %v9939_v59, %v2051_v29  ;;  %v2049_v59 = vpop.permute.xlu0 %2048 }
 0x5e6   :  { %7859 = vmatprep.subr.bf16.mxu0 %v9204_v1  ;;  %v2077_v48 = vpack.c.bf16 %v2069_v13, %v2069_v13  ;;  %v2068_v57 = vsel %vm146_vm1, %v10024_v34, %v2049_v59 }
 0x5e7   :  { %v2076_v46 = vpack.c.bf16 %v2068_v57, %v2068_v57 }
 0x5e8   :  { %7878 = vmatmul.mubr.msk.bf16.vlgmr.msra.gmra.mrb[72].mxu1 %vm235_vm2, %v2077_v48 }
 0x5e9   :  { %7860 = vmatpush3.bf16.msra.mxu0 %v10188_v17  ;;  %7894 = vmatpush3.bf16.msra.mxu1 %v10194_v36  ;;  %v2055_v56 = vpop.permute.xlu0 %2054 }
 0x5ea   :  { %7861 = vmatprep.subr.bf16.mxu0 %v9204_v1  ;;  %7895 = vmatprep.subr.bf16.mxu1 %v9204_v1  ;;  %v2071_v2 = vsel %vm146_vm1, %v9964_v39, %v2055_v56  ;;  %v10294_v56 = vld [vmem:[%s12047_s3] ss:$0 sm:$0xff] }
 0x5eb   :  { %7901 = vmatprep.mubr.msk.bf16.mxu1 %vm9205_vm0, %v9204_v1  ;;  %v2079_v34 = vpack.c.bf16 %v2071_v2, %v2071_v2 }
 0x5ed   :  { %7862 = vmatpush3.bf16.msra.mxu0 %v10204_v51  ;;  %7896 = vmatpush3.bf16.msra.mxu1 %v10210_v54 }
 0x5ee   :  { %7863 = vmatprep.subr.bf16.mxu0 %v9204_v1  ;;  %7897 = vmatprep.subr.bf16.mxu1 %v9204_v1 }
 0x5f1   :  { %7864 = vmatpush3.bf16.msra.mxu0 %v10220_v8  ;;  %7898 = vmatpush3.bf16.msra.mxu1 %v10226_v19 }
 0x5f2   :  { %7899 = vmatprep.subr.bf16.mxu1 %v9204_v1  ;;  %7881 = vmatprep.subr.bf16.mxu0 %v9204_v1 }
 0x5f4   :  { %7866 = vmatmul.mubr.msk.bf16.vlgmr.msra.gmra.mrb[72].mxu0 %vm235_vm2, %v2076_v46 }
 0x5f5   :  { %7900 = vmatpush3.bf16.msra.mxu1 %v10237_v38  ;;  %7882 = vmatpush3.bf16.msra.mxu0 %v10243_v47 }
 0x5f6   :  { %7917 = vmatprep.subr.bf16.mxu1 %v9204_v1  ;;  %7883 = vmatprep.subr.bf16.mxu0 %v9204_v1 }
 0x5f7   :  { %7889 = vmatprep.mubr.msk.bf16.mxu0 %vm9205_vm0, %v9204_v1 }
 0x5f8   :  { %7902 = vmatmul.mubr.msk.bf16.vlgmr.msra.gmra.mrb[76].mxu1 %vm235_vm2, %v2079_v34 }
 0x5f9   :  { %7918 = vmatpush3.bf16.msra.mxu1 %v9979_v50  ;;  %7925 = vmatprep.mubr.msk.bf16.mxu1 %vm9205_vm0, %v9204_v1 }
 0x5fa   :  { %7919 = vmatprep.subr.bf16.mxu1 %v9204_v1  ;;  %7884 = vmatpush3.bf16.msra.mxu0 %v10258_v44 }
 0x5fb   :  { %7885 = vmatprep.subr.bf16.mxu0 %v9204_v1 }
 0x5fd   :  { %7920 = vmatpush3.bf16.msra.mxu1 %v9990_v43 }
 0x5fe   :  { %7921 = vmatprep.subr.bf16.mxu1 %v9204_v1  ;;  %7886 = vmatpush3.bf16.msra.mxu0 %v10267_v5 }
 0x5ff   :  { %7887 = vmatprep.subr.bf16.mxu0 %v9204_v1 }
 0x601   :  { %7922 = vmatpush3.bf16.msra.mxu1 %v9999_v52 }
 0x602   :  { %7923 = vmatprep.subr.bf16.mxu1 %v9204_v1  ;;  %7888 = vmatpush3.bf16.msra.mxu0 %v10096_v20 }
 0x603   :  { %7905 = vmatprep.subr.bf16.mxu0 %v9204_v1 }
 0x605   :  { %7924 = vmatpush3.bf16.msra.mxu1 %v10007_v53 }
 0x606   :  { %7941 = vmatprep.subr.bf16.mxu1 %v9204_v1 }
 0x634   :  { %v2160_v55 = vpop.f32.mrb[64].mxu1 }
 0x635   :  { %v2161_v58 = vadd.f32 %v9698_v28, %v2160_v55  ;;  %v7831_v60 = vpop.f32.mrb[65].mxu1 }
 0x636   :  { %v2163_v7 = vpop.f32.mrb[66].mxu1 }
 0x637   :  { %8923 = vtanh.f32 %v2161_v58  ;;  %v7832_v63 = vpop.f32.mrb[67].mxu1 }
 0x638   :  { %v1872_v4 = vpop.f32.mrb[56].mxu0 }
 0x639   :  { %v7771_v61 = vpop.f32.mrb[57].mxu0 }
 0x63a   :  { %v1875_v11 = vpop.f32.mrb[58].mxu0 }
 0x63b   :  { %v7772_v62 = vpop.f32.mrb[59].mxu0 }
 0x641   :  { %v10278_v24 = vpop.eup %8923 }
 0x642   :  { %2459 = vrot.lane.b32.xlu1 %v10278_v24, %s9203_s26 }
 0x644   :  { %v2246_v16 = vpop.f32.mrb[68].mxu1 }
 0x645   :  { %v2247_v9 = vadd.f32 %v10019_v18, %v2246_v16  ;;  %v7855_v27 = vpop.f32.mrb[69].mxu1 }
 0x646   :  { %v2249_v37 = vpop.f32.mrb[70].mxu1  ;;  %2467 = vrot.lane.b32.xlu1 %v9853_v23, %s9203_s26 }
 0x647   :  { %8925 = vtanh.f32 %v2247_v9  ;;  %v7856_v28 = vpop.f32.mrb[71].mxu1 }
 0x649   :  { %v1958_v10 = vpop.f32.mrb[60].mxu0 }
 0x64a   :  { %v7795_v41 = vpop.f32.mrb[61].mxu0 }
 0x64b   :  { %v1961_v29 = vpop.f32.mrb[62].mxu0 }
 0x64c   :  { %v7796_v13 = vpop.f32.mrb[63].mxu0  ;;  %v10315_v29 = vld [vmem:[%s12047_s3 + $0x4] ss:$0 sm:$0xff] }
 0x651   :  { %v10285_v48 = vpop.eup %8925 }
 0x652   :  { %2463 = vrot.lane.b32.xlu0 %v10285_v48, %s9203_s26 }
 0x656   :  { %2052 = vrot.lane.b32.xlu0 %v9964_v39, %s9203_s26 }
 0x6a7   :  { %v2117_v59 = vpop.f32.mrb[64].mxu0 }
 0x6a8   :  { %v2118_v57 = vadd.f32 %v10294_v56, %v2117_v59  ;;  %v7819_v2 = vpop.f32.mrb[65].mxu0 }
 0x6a9   :  { %v2120_v46 = vpop.f32.mrb[66].mxu0 }
 0x6aa   :  { %8927 = vtanh.f32 %v2118_v57  ;;  %v7820_v34 = vpop.f32.mrb[67].mxu0 }
 0x6b4   :  { %v8928_v55 = vpop.eup %8927  ;;  %v2460_v58 = vpop.permute.xlu1 %2459 }
 0x6b5   :  { %v2482_v60 = vsel %vm146_vm1, %v8928_v55, %v2460_v58  ;;  %2457 = vrot.lane.b32.xlu1 %v8928_v55, %s9203_s26 }
 0x6b6   :  { %v2490_v7 = vpack.c.bf16 %v2482_v60, %v2482_v60 }
 0x6b7   :  { %v2203_v63 = vpop.f32.mrb[68].mxu0 }
 0x6b8   :  { %v2204_v4 = vadd.f32 %v9835_v15, %v2203_v63  ;;  %v7843_v61 = vpop.f32.mrb[69].mxu0  ;;  %7926 = vmatmul.mubr.msk.bf16.vlgmr.msra.gmra.mrb[80].mxu1 %vm235_vm2, %v2490_v7 }
 0x6b9   :  { %v2206_v11 = vpop.f32.mrb[70].mxu0  ;;  %7942 = vmatpush3.bf16.msra.mxu1 %v10038_v45  ;;  %7949 = vmatprep.mubr.msk.bf16.mxu1 %vm9205_vm0, %v9204_v1 }
 0x6ba   :  { %8929 = vtanh.f32 %v2204_v4  ;;  %v7844_v62 = vpop.f32.mrb[71].mxu0  ;;  %7943 = vmatprep.subr.bf16.mxu1 %v9204_v1 }
 0x6bb   :  { %v2332_v16 = vpop.f32.mrb[72].mxu1 }
 0x6bc   :  { %v7879_v9 = vpop.f32.mrb[73].mxu1  ;;  %v6735_v16 = vld [vmem:[%s12044_s0 + $0xa] sm:$0x3] }
 0x6bd   :  { %7944 = vmatpush3.bf16.msra.mxu1 %v10052_v40  ;;  %v2335_v27 = vpop.f32.mrb[74].mxu1 }
 0x6be   :  { %7945 = vmatprep.subr.bf16.mxu1 %v9204_v1  ;;  %v7880_v37 = vpop.f32.mrb[75].mxu1 }
 0x6c1   :  { %7946 = vmatpush3.bf16.msra.mxu1 %v10065_v6 }
 0x6c2   :  { %7947 = vmatprep.subr.bf16.mxu1 %v9204_v1 }
 0x6c4   :  { %v8930_v28 = vpop.eup %8929  ;;  %v2464_v10 = vpop.permute.xlu0 %2463 }
 0x6c5   :  { %v2484_v41 = vsel %vm146_vm1, %v8930_v28, %v2464_v10  ;;  %7948 = vmatpush3.bf16.msra.mxu1 %v10075_v3  ;;  %2461 = vrot.lane.b32.xlu0 %v8930_v28, %s9203_s26 }
 0x6c6   :  { %v2492_v13 = vpack.c.bf16 %v2484_v41, %v2484_v41  ;;  %7965 = vmatprep.subr.bf16.mxu1 %v9204_v1 }
 0x6c7   :  { %v2289_v59 = vpop.f32.mrb[72].mxu0 }
 0x6c8   :  { %v2290_v57 = vadd.f32 %v10315_v29, %v2289_v59  ;;  %v7867_v2 = vpop.f32.mrb[73].mxu0  ;;  %7950 = vmatmul.mubr.msk.bf16.vlgmr.msra.gmra.mrb[84].mxu1 %vm235_vm2, %v2492_v13  ;;  %v2053_v46 = vpop.permute.xlu0 %2052 }
 0x6c9   :  { %v2292_v34 = vpop.f32.mrb[74].mxu0  ;;  %7966 = vmatpush3.bf16.msra.mxu1 %v10090_v0  ;;  %7973 = vmatprep.mubr.msk.bf16.mxu1 %vm9205_vm0, %v9204_v1  ;;  %v2070_v55 = vsel %vm146_vm1, %v9853_v23, %v2053_v46 }
 0x6ca   :  { %8931 = vtanh.f32 %v2290_v57  ;;  %v7868_v58 = vpop.f32.mrb[75].mxu0  ;;  %7967 = vmatprep.subr.bf16.mxu1 %v9204_v1  ;;  %v2078_v60 = vpack.c.bf16 %v2070_v55, %v2070_v55  ;;  %2471 = vrot.lane.b32.xlu0 %v9880_v12, %s9203_s26  ;;  %v2468_v12 = vpop.permute.xlu1 %2467  ;;  %v10415_v34 = vld [vmem:[%s12047_s3 + $0x1] ss:$0 sm:$0xff] }
 0x6cb   :  { %v2418_v7 = vpop.f32.mrb[76].mxu1 }
 0x6cc   :  { %7890 = vmatmul.mubr.msk.bf16.vlgmr.msra.gmra.mrb[76].mxu0 %vm235_vm2, %v2078_v60  ;;  %v7903_v63 = vpop.f32.mrb[77].mxu1 }
 0x6cd   :  { %7968 = vmatpush3.bf16.msra.mxu1 %v10107_v21  ;;  %7906 = vmatpush3.bf16.msra.mxu0 %v9895_v31  ;;  %v2421_v4 = vpop.f32.mrb[78].mxu1 }
 0x6ce   :  { %7969 = vmatprep.subr.bf16.mxu1 %v9204_v1  ;;  %7907 = vmatprep.subr.bf16.mxu0 %v9204_v1  ;;  %v7904_v23 = vpop.f32.mrb[79].mxu1 }
 0x6cf   :  { %7913 = vmatprep.mubr.msk.bf16.mxu0 %vm9205_vm0, %v9204_v1 }
 0x6d1   :  { %7970 = vmatpush3.bf16.msra.mxu1 %v10118_v42  ;;  %7908 = vmatpush3.bf16.msra.mxu0 %v9906_v32 }
 0x6d2   :  { %7971 = vmatprep.subr.bf16.mxu1 %v9204_v1  ;;  %7909 = vmatprep.subr.bf16.mxu0 %v9204_v1 }
 0x6d4   :  { %v8932_v61 = vpop.eup %8931 }
 0x6d5   :  { %v2486_v11 = vsel %vm146_vm1, %v8932_v61, %v2468_v12  ;;  %7972 = vmatpush3.bf16.msra.mxu1 %v10127_v22  ;;  %2465 = vrot.lane.b32.xlu1 %v8932_v61, %s9203_s26 }
 0x6d6   :  { %v2494_v62 = vpack.c.bf16 %v2486_v11, %v2486_v11  ;;  %7910 = vmatpush3.bf16.msra.mxu0 %v9915_v49  ;;  %7989 = vmatprep.subr.bf16.mxu1 %v9204_v1 }
 0x6d7   :  { %7911 = vmatprep.subr.bf16.mxu0 %v9204_v1 }
 0x6d8   :  { %7974 = vmatmul.mubr.msk.bf16.vlgmr.msra.gmra.mrb[88].mxu1 %vm235_vm2, %v2494_v62 }
 0x6d9   :  { %7990 = vmatpush3.bf16.msra.mxu1 %v10194_v36  ;;  %7997 = vmatprep.mubr.msk.bf16.mxu1 %vm9205_vm0, %v9204_v1 }
 0x6da   :  { %7912 = vmatpush3.bf16.msra.mxu0 %v9923_v33  ;;  %7991 = vmatprep.subr.bf16.mxu1 %v9204_v1 }
 0x6db   :  { %7929 = vmatprep.subr.bf16.mxu0 %v9204_v1 }
 0x6dd   :  { %7992 = vmatpush3.bf16.msra.mxu1 %v10210_v54 }
 0x6de   :  { %7993 = vmatprep.subr.bf16.mxu1 %v9204_v1 }
 0x6e1   :  { %7994 = vmatpush3.bf16.msra.mxu1 %v10226_v19 }
 0x6e2   :  { %7995 = vmatprep.subr.bf16.mxu1 %v9204_v1 }
 0x6e5   :  { %7996 = vmatpush3.bf16.msra.mxu1 %v10237_v38 }
 0x6e6   :  { %8013 = vmatprep.subr.bf16.mxu1 %v9204_v1 }
 0x727   :  { %v2458_v9 = vpop.permute.xlu1 %2457 }
 0x728   :  { %v2481_v27 = vsel %vm146_vm1, %v6735_v16, %v2458_v9 }
 0x729   :  { %v2489_v37 = vpack.c.bf16 %v2481_v27, %v2481_v27 }
 0x72b   :  { %7914 = vmatmul.mubr.msk.bf16.vlgmr.msra.gmra.mrb[80].mxu0 %vm235_vm2, %v2489_v37 }
 0x72c   :  { %7930 = vmatpush3.bf16.msra.mxu0 %v10143_v30  ;;  %7937 = vmatprep.mubr.msk.bf16.mxu0 %vm9205_vm0, %v9204_v1 }
 0x72d   :  { %7931 = vmatprep.subr.bf16.mxu0 %v9204_v1 }
 0x730   :  { %7932 = vmatpush3.bf16.msra.mxu0 %v10152_v25 }
 0x731   :  { %7933 = vmatprep.subr.bf16.mxu0 %v9204_v1 }
 0x734   :  { %7934 = vmatpush3.bf16.msra.mxu0 %v10159_v35 }
 0x735   :  { %7935 = vmatprep.subr.bf16.mxu0 %v9204_v1 }
 0x737   :  { %v2462_v28 = vpop.permute.xlu0 %2461 }
 0x738   :  { %v2483_v10 = vsel %vm146_vm1, %v10278_v24, %v2462_v28  ;;  %7936 = vmatpush3.bf16.msra.mxu0 %v10168_v26  ;;  %v10430_v28 = vld [vmem:[%s12047_s3 + $0x5] ss:$0 sm:$0xff] }
 0x739   :  { %v2491_v41 = vpack.c.bf16 %v2483_v10, %v2483_v10  ;;  %7953 = vmatprep.subr.bf16.mxu0 %v9204_v1 }
 0x73b   :  { %7938 = vmatmul.mubr.msk.bf16.vlgmr.msra.gmra.mrb[84].mxu0 %vm235_vm2, %v2491_v41 }
 0x73c   :  { %7954 = vmatpush3.bf16.msra.mxu0 %v10176_v14  ;;  %7961 = vmatprep.mubr.msk.bf16.mxu0 %vm9205_vm0, %v9204_v1  ;;  %v2472_v13 = vpop.permute.xlu0 %2471 }
 0x73d   :  { %7955 = vmatprep.subr.bf16.mxu0 %v9204_v1  ;;  %v2488_v59 = vsel %vm146_vm1, %v9964_v39, %v2472_v13 }
 0x73e   :  { %v2496_v57 = vpack.c.bf16 %v2488_v59, %v2488_v59 }
 0x740   :  { %7956 = vmatpush3.bf16.msra.mxu0 %v10188_v17  ;;  %7998 = vmatmul.mubr.msk.bf16.vlgmr.msra.gmra.mrb[92].mxu1 %vm235_vm2, %v2496_v57 }
 0x741   :  { %7957 = vmatprep.subr.bf16.mxu0 %v9204_v1  ;;  %8014 = vmatpush3.bf16.msra.mxu1 %v9979_v50 }
 0x742   :  { %8015 = vmatprep.subr.bf16.mxu1 %v9204_v1  ;;  %8021 = vmatprep.mubr.msk.bf16.mxu1 %vm9205_vm0, %v9204_v1 }
 0x744   :  { %7958 = vmatpush3.bf16.msra.mxu0 %v10204_v51 }
 0x745   :  { %7959 = vmatprep.subr.bf16.mxu0 %v9204_v1  ;;  %8016 = vmatpush3.bf16.msra.mxu1 %v9990_v43 }
 0x746   :  { %8017 = vmatprep.subr.bf16.mxu1 %v9204_v1 }
 0x747   :  { %v2466_v24 = vpop.permute.xlu1 %2465 }
 0x748   :  { %v2485_v2 = vsel %vm146_vm1, %v10285_v48, %v2466_v24  ;;  %7960 = vmatpush3.bf16.msra.mxu0 %v10220_v8 }
 0x749   :  { %v2493_v46 = vpack.c.bf16 %v2485_v2, %v2485_v2  ;;  %8018 = vmatpush3.bf16.msra.mxu1 %v9999_v52  ;;  %7977 = vmatprep.subr.bf16.mxu0 %v9204_v1 }
 0x74a   :  { %8019 = vmatprep.subr.bf16.mxu1 %v9204_v1 }
 0x74b   :  { %7962 = vmatmul.mubr.msk.bf16.vlgmr.msra.gmra.mrb[88].mxu0 %vm235_vm2, %v2493_v46 }
 0x74c   :  { %7978 = vmatpush3.bf16.msra.mxu0 %v10243_v47  ;;  %7985 = vmatprep.mubr.msk.bf16.mxu0 %vm9205_vm0, %v9204_v1 }
 0x74d   :  { %8020 = vmatpush3.bf16.msra.mxu1 %v10007_v53  ;;  %7979 = vmatprep.subr.bf16.mxu0 %v9204_v1 }
 0x74e   :  { %8037 = vmatprep.subr.bf16.mxu1 %v9204_v1 }
 0x750   :  { %7980 = vmatpush3.bf16.msra.mxu0 %v10258_v44 }
 0x751   :  { %7981 = vmatprep.subr.bf16.mxu0 %v9204_v1 }
 0x754   :  { %7982 = vmatpush3.bf16.msra.mxu0 %v10267_v5 }
 0x755   :  { %7983 = vmatprep.subr.bf16.mxu0 %v9204_v1 }
 0x758   :  { %7984 = vmatpush3.bf16.msra.mxu0 %v10096_v20 }
 0x759   :  { %8001 = vmatprep.subr.bf16.mxu0 %v9204_v1 }
 0x78b   :  { %v2577_v48 = vpop.f32.mrb[80].mxu1 }
 0x78c   :  { %v2578_v55 = vadd.f32 %v10415_v34, %v2577_v48  ;;  %v7927_v58 = vpop.f32.mrb[81].mxu1 }
 0x78d   :  { %v2580_v60 = vpop.f32.mrb[82].mxu1 }
 0x78e   :  { %8933 = vtanh.f32 %v2578_v55  ;;  %v7928_v7 = vpop.f32.mrb[83].mxu1 }
 0x798   :  { %v10418_v63 = vpop.eup %8933 }
 0x799   :  { %2876 = vrot.lane.b32.xlu1 %v10418_v63, %s9203_s26 }
 0x79b   :  { %v2663_v4 = vpop.f32.mrb[84].mxu1 }
 0x79c   :  { %v2664_v23 = vadd.f32 %v10019_v18, %v2663_v4  ;;  %v7951_v12 = vpop.f32.mrb[85].mxu1 }
 0x79d   :  { %v2666_v61 = vpop.f32.mrb[86].mxu1 }
 0x79e   :  { %8935 = vtanh.f32 %v2664_v23  ;;  %v7952_v11 = vpop.f32.mrb[87].mxu1 }
 0x79f   :  { %v2375_v62 = vpop.f32.mrb[76].mxu0 }
 0x7a0   :  { %v7891_v16 = vpop.f32.mrb[77].mxu0 }
 0x7a1   :  { %v2378_v9 = vpop.f32.mrb[78].mxu0 }
 0x7a2   :  { %v7892_v27 = vpop.f32.mrb[79].mxu0 }
 0x7a8   :  { %v10423_v37 = vpop.eup %8935 }
 0x7a9   :  { %2880 = vrot.lane.b32.xlu0 %v10423_v37, %s9203_s26 }
 0x7ab   :  { %v2749_v10 = vpop.f32.mrb[88].mxu1 }
 0x7ac   :  { %v2750_v18 = vadd.f32 %v10430_v28, %v2749_v10  ;;  %v7975_v41 = vpop.f32.mrb[89].mxu1 }
 0x7ad   :  { %v2752_v13 = vpop.f32.mrb[90].mxu1  ;;  %2469 = vrot.lane.b32.xlu0 %v9964_v39, %s9203_s26 }
 0x7ae   :  { %8937 = vtanh.f32 %v2750_v18  ;;  %v7976_v59 = vpop.f32.mrb[91].mxu1 }
 0x7b8   :  { %v10435_v57 = vpop.eup %8937 }
 0x7b9   :  { %2884 = vrot.lane.b32.xlu1 %v10435_v57, %s9203_s26 }
 0x7fe   :  { %v2534_v24 = vpop.f32.mrb[80].mxu0 }
 0x7ff   :  { %v2535_v2 = vadd.f32 %v10294_v56, %v2534_v24  ;;  %v7915_v46 = vpop.f32.mrb[81].mxu0 }
 0x800   :  { %v2537_v48 = vpop.f32.mrb[82].mxu0 }
 0x801   :  { %8939 = vtanh.f32 %v2535_v2  ;;  %v7916_v55 = vpop.f32.mrb[83].mxu0  ;;  %v9070_v48 = vld [vmem:[%s12045_s1 + $0xa] sm:$0x3] }
 0x80b   :  { %v8940_v58 = vpop.eup %8939  ;;  %v2877_v60 = vpop.permute.xlu1 %2876 }
 0x80c   :  { %v2899_v7 = vsel %vm146_vm1, %v8940_v58, %v2877_v60  ;;  %2874 = vrot.lane.b32.xlu1 %v8940_v58, %s9203_s26 }
 0x80d   :  { %v2907_v4 = vpack.c.bf16 %v2899_v7, %v2899_v7 }
 0x80e   :  { %v2620_v23 = vpop.f32.mrb[84].mxu0 }
 0x80f   :  { %v2621_v12 = vadd.f32 %v9835_v15, %v2620_v23  ;;  %v7939_v61 = vpop.f32.mrb[85].mxu0  ;;  %8022 = vmatmul.mubr.msk.bf16.vlgmr.msra.gmra.mrb[96].mxu1 %vm235_vm2, %v2907_v4 }
 0x810   :  { %v2623_v11 = vpop.f32.mrb[86].mxu0  ;;  %8038 = vmatpush3.bf16.msra.mxu1 %v10038_v45  ;;  %8045 = vmatprep.mubr.msk.bf16.mxu1 %vm9205_vm0, %v9204_v1 }
 0x811   :  { %8941 = vtanh.f32 %v2621_v12  ;;  %v7940_v62 = vpop.f32.mrb[87].mxu0  ;;  %8039 = vmatprep.subr.bf16.mxu1 %v9204_v1 }
 0x813   :  { %v2835_v16 = vpop.f32.mrb[92].mxu1 }
 0x814   :  { %8040 = vmatpush3.bf16.msra.mxu1 %v10052_v40  ;;  %v7999_v9 = vpop.f32.mrb[93].mxu1 }
 0x815   :  { %8041 = vmatprep.subr.bf16.mxu1 %v9204_v1  ;;  %v2838_v15 = vpop.f32.mrb[94].mxu1 }
 0x816   :  { %v8000_v27 = vpop.f32.mrb[95].mxu1 }
 0x817   :  { %v10600_v27 = vld [vmem:[%s12047_s3 + $0x3] ss:$0 sm:$0xff] }
 0x818   :  { %8042 = vmatpush3.bf16.msra.mxu1 %v10065_v6 }
 0x819   :  { %8043 = vmatprep.subr.bf16.mxu1 %v9204_v1 }
 0x81b   :  { %v8942_v45 = vpop.eup %8941  ;;  %v2881_v10 = vpop.permute.xlu0 %2880 }
 0x81c   :  { %v2901_v18 = vsel %vm146_vm1, %v8942_v45, %v2881_v10  ;;  %8044 = vmatpush3.bf16.msra.mxu1 %v10075_v3  ;;  %2878 = vrot.lane.b32.xlu0 %v8942_v45, %s9203_s26 }
 0x81d   :  { %v2909_v41 = vpack.c.bf16 %v2901_v18, %v2901_v18  ;;  %8061 = vmatprep.subr.bf16.mxu1 %v9204_v1 }
 0x81e   :  { %v2706_v13 = vpop.f32.mrb[88].mxu0 }
 0x81f   :  { %v2707_v59 = vadd.f32 %v10315_v29, %v2706_v13  ;;  %v7963_v24 = vpop.f32.mrb[89].mxu0  ;;  %8046 = vmatmul.mubr.msk.bf16.vlgmr.msra.gmra.mrb[100].mxu1 %vm235_vm2, %v2909_v41  ;;  %v2470_v2 = vpop.permute.xlu0 %2469 }
 0x820   :  { %2886 = vrot.lane.b32.xlu0 %v9964_v39, %s9203_s26  ;;  %v2709_v46 = vpop.f32.mrb[90].mxu0  ;;  %8062 = vmatpush3.bf16.msra.mxu1 %v10090_v0  ;;  %v2487_v55 = vsel %vm146_vm1, %v9070_v48, %v2470_v2 }
 0x821   :  { %8943 = vtanh.f32 %v2707_v59  ;;  %v7964_v58 = vpop.f32.mrb[91].mxu0  ;;  %8063 = vmatprep.subr.bf16.mxu1 %v9204_v1  ;;  %8069 = vmatprep.mubr.msk.bf16.mxu1 %vm9205_vm0, %v9204_v1  ;;  %v2495_v60 = vpack.c.bf16 %v2487_v55, %v2487_v55 }
 0x823   :  { %7986 = vmatmul.mubr.msk.bf16.vlgmr.msra.gmra.mrb[92].mxu0 %vm235_vm2, %v2495_v60 }
 0x824   :  { %8064 = vmatpush3.bf16.msra.mxu1 %v10107_v21  ;;  %8002 = vmatpush3.bf16.msra.mxu0 %v9895_v31 }
 0x825   :  { %8065 = vmatprep.subr.bf16.mxu1 %v9204_v1  ;;  %8003 = vmatprep.subr.bf16.mxu0 %v9204_v1 }
 0x826   :  { %8009 = vmatprep.mubr.msk.bf16.mxu0 %vm9205_vm0, %v9204_v1 }
 0x828   :  { %8066 = vmatpush3.bf16.msra.mxu1 %v10118_v42  ;;  %8004 = vmatpush3.bf16.msra.mxu0 %v9906_v32  ;;  %v10489_v32 = vld [vmem:[%s12045_s1 + $0xe] sm:$0x3] }
 0x829   :  { %8067 = vmatprep.subr.bf16.mxu1 %v9204_v1  ;;  %8005 = vmatprep.subr.bf16.mxu0 %v9204_v1 }
 0x82b   :  { %v8944_v7 = vpop.eup %8943  ;;  %v2885_v4 = vpop.permute.xlu1 %2884 }
 0x82c   :  { %v2903_v23 = vsel %vm146_vm1, %v8944_v7, %v2885_v4  ;;  %8068 = vmatpush3.bf16.msra.mxu1 %v10127_v22  ;;  %2882 = vrot.lane.b32.xlu1 %v8944_v7, %s9203_s26 }
 0x82d   :  { %v2911_v31 = vpack.c.bf16 %v2903_v23, %v2903_v23  ;;  %8006 = vmatpush3.bf16.msra.mxu0 %v9915_v49  ;;  %8085 = vmatprep.subr.bf16.mxu1 %v9204_v1  ;;  %v6744_v49 = vld [vmem:[%s12044_s0 + $0xc] sm:$0x3] }
 0x82e   :  { %8007 = vmatprep.subr.bf16.mxu0 %v9204_v1 }
 0x82f   :  { %8070 = vmatmul.mubr.msk.bf16.vlgmr.msra.gmra.mrb[104].mxu1 %vm235_vm2, %v2911_v31 }
 0x830   :  { %2888 = vrot.lane.b32.xlu1 %v10489_v32, %s9203_s26  ;;  %8086 = vmatpush3.bf16.msra.mxu1 %v10194_v36 }
 0x831   :  { %8008 = vmatpush3.bf16.msra.mxu0 %v9923_v33  ;;  %8087 = vmatprep.subr.bf16.mxu1 %v9204_v1 }
 0x832   :  { %8025 = vmatprep.subr.bf16.mxu0 %v9204_v1  ;;  %8093 = vmatprep.mubr.msk.bf16.mxu1 %vm9205_vm0, %v9204_v1 }
 0x834   :  { %8088 = vmatpush3.bf16.msra.mxu1 %v10210_v54 }
 0x835   :  { %8089 = vmatprep.subr.bf16.mxu1 %v9204_v1 }
 0x838   :  { %8090 = vmatpush3.bf16.msra.mxu1 %v10226_v19 }
 0x839   :  { %8091 = vmatprep.subr.bf16.mxu1 %v9204_v1 }
 0x83c   :  { %8092 = vmatpush3.bf16.msra.mxu1 %v10237_v38 }
 0x83d   :  { %8109 = vmatprep.subr.bf16.mxu1 %v9204_v1 }
 0x87e   :  { %v2875_v33 = vpop.permute.xlu1 %2874 }
 0x87f   :  { %v2898_v12 = vsel %vm146_vm1, %v6744_v49, %v2875_v33 }
 0x880   :  { %v2906_v61 = vpack.c.bf16 %v2898_v12, %v2898_v12 }
 0x882   :  { %8010 = vmatmul.mubr.msk.bf16.vlgmr.msra.gmra.mrb[96].mxu0 %vm235_vm2, %v2906_v61 }
 0x883   :  { %8026 = vmatpush3.bf16.msra.mxu0 %v10143_v30  ;;  %8033 = vmatprep.mubr.msk.bf16.mxu0 %vm9205_vm0, %v9204_v1 }
 0x884   :  { %8027 = vmatprep.subr.bf16.mxu0 %v9204_v1 }
 0x887   :  { %8028 = vmatpush3.bf16.msra.mxu0 %v10152_v25 }
 0x888   :  { %8029 = vmatprep.subr.bf16.mxu0 %v9204_v1 }
 0x88b   :  { %8030 = vmatpush3.bf16.msra.mxu0 %v10159_v35 }
 0x88c   :  { %8031 = vmatprep.subr.bf16.mxu0 %v9204_v1 }
 0x88e   :  { %v2879_v11 = vpop.permute.xlu0 %2878 }
 0x88f   :  { %v2900_v62 = vsel %vm146_vm1, %v10418_v63, %v2879_v11  ;;  %8032 = vmatpush3.bf16.msra.mxu0 %v10168_v26 }
 0x890   :  { %v2908_v30 = vpack.c.bf16 %v2900_v62, %v2900_v62  ;;  %8049 = vmatprep.subr.bf16.mxu0 %v9204_v1 }
 0x892   :  { %8034 = vmatmul.mubr.msk.bf16.vlgmr.msra.gmra.mrb[100].mxu0 %vm235_vm2, %v2908_v30 }
 0x893   :  { %8050 = vmatpush3.bf16.msra.mxu0 %v10176_v14  ;;  %8057 = vmatprep.mubr.msk.bf16.mxu0 %vm9205_vm0, %v9204_v1 }
 0x894   :  { %8051 = vmatprep.subr.bf16.mxu0 %v9204_v1 }
 0x897   :  { %8052 = vmatpush3.bf16.msra.mxu0 %v10188_v17 }
 0x898   :  { %8053 = vmatprep.subr.bf16.mxu0 %v9204_v1 }
 0x89b   :  { %8054 = vmatpush3.bf16.msra.mxu0 %v10204_v51 }
 0x89c   :  { %8055 = vmatprep.subr.bf16.mxu0 %v9204_v1 }
 0x89e   :  { %v2883_v25 = vpop.permute.xlu1 %2882 }
 0x89f   :  { %v2902_v35 = vsel %vm146_vm1, %v10423_v37, %v2883_v25  ;;  %8056 = vmatpush3.bf16.msra.mxu0 %v10220_v8  ;;  %v2887_v8 = vpop.permute.xlu0 %2886  ;;  %v10620_v25 = vld [vmem:[%s12047_s3 + $0x2] ss:$0 sm:$0xff] }
 0x8a0   :  { %v2910_v26 = vpack.c.bf16 %v2902_v35, %v2902_v35  ;;  %8073 = vmatprep.subr.bf16.mxu0 %v9204_v1 }
 0x8a2   :  { %8058 = vmatmul.mubr.msk.bf16.vlgmr.msra.gmra.mrb[104].mxu0 %vm235_vm2, %v2910_v26  ;;  %v2889_v14 = vpop.permute.xlu1 %2888 }
 0x8a3   :  { %8074 = vmatpush3.bf16.msra.mxu0 %v10243_v47  ;;  %8081 = vmatprep.mubr.msk.bf16.mxu0 %vm9205_vm0, %v9204_v1  ;;  %v2905_v17 = vsel %vm146_vm1, %v9964_v39, %v2889_v14  ;;  %v2904_v39 = vsel %vm146_vm1, %v10435_v57, %v2887_v8  ;;  %v10627_v14 = vld [vmem:[%s12046_s2 + $0x60] sm:$0xff]  }
 0x8a4   :  { %8075 = vmatprep.subr.bf16.mxu0 %v9204_v1  ;;  %v2913_v51 = vpack.c.bf16 %v2905_v17, %v2905_v17 }
 0x8a6   :  { %8094 = vmatmul.mubr.msk.bf16.vlgmr.msra.gmra.mrb[108].mxu1 %vm235_vm2, %v2913_v51 }
 0x8a7   :  { %8076 = vmatpush3.bf16.msra.mxu0 %v10258_v44  ;;  %8110 = vmatpush3.bf16.msra.mxu1 %v9979_v50  ;;  %v2912_v50 = vpack.c.bf16 %v2904_v39, %v2904_v39 }
 0x8a8   :  { %8077 = vmatprep.subr.bf16.mxu0 %v9204_v1  ;;  %8111 = vmatprep.subr.bf16.mxu1 %v9204_v1 }
 0x8a9   :  { %8117 = vmatprep.mubr.msk.bf16.mxu1 %vm9205_vm0, %v9204_v1 }
 0x8ab   :  { %8078 = vmatpush3.bf16.msra.mxu0 %v10267_v5  ;;  %8112 = vmatpush3.bf16.msra.mxu1 %v9990_v43  ;;  %v10564_v43 = vld [vmem:[%s12046_s2] sm:$0xff]  }
 0x8ac   :  { %8079 = vmatprep.subr.bf16.mxu0 %v9204_v1  ;;  %8113 = vmatprep.subr.bf16.mxu1 %v9204_v1 }
 0x8af   :  { %8080 = vmatpush3.bf16.msra.mxu0 %v10096_v20  ;;  %8114 = vmatpush3.bf16.msra.mxu1 %v9999_v52  ;;  %v10574_v52 = vld [vmem:[%s12046_s2 + $0x8] sm:$0xff]   ;;  %v10588_v20 = vld [vmem:[%s12046_s2 + $0x18] sm:$0xff]  }
 0x8b0   :  { %8115 = vmatprep.subr.bf16.mxu1 %v9204_v1  ;;  %8097 = vmatprep.subr.bf16.mxu0 %v9204_v1 }
 0x8b2   :  { %8082 = vmatmul.mubr.msk.bf16.vlgmr.msra.gmra.mrb[108].mxu0 %vm235_vm2, %v2912_v50 }
 0x8b3   :  { %8116 = vmatpush3.bf16.msra.mxu1 %v10007_v53  ;;  %8098 = vmatpush3.bf16.msra.mxu0 %v10564_v43  ;;  %v10581_v53 = vld [vmem:[%s12046_s2 + $0x10] sm:$0xff]  }
 0x8b4   :  { %8133 = vmatprep.subr.bf16.mxu1 %v9204_v1  ;;  %8099 = vmatprep.subr.bf16.mxu0 %v9204_v1 }
 0x8b5   :  { %8105 = vmatprep.mubr.msk.bf16.mxu0 %vm9205_vm0, %v9204_v1 }
 0x8b7   :  { %8100 = vmatpush3.bf16.msra.mxu0 %v10574_v52 }
 0x8b8   :  { %8101 = vmatprep.subr.bf16.mxu0 %v9204_v1 }
 0x8bb   :  { %8102 = vmatpush3.bf16.msra.mxu0 %v10581_v53 }
 0x8bc   :  { %8103 = vmatprep.subr.bf16.mxu0 %v9204_v1 }
 0x8bf   :  { %8104 = vmatpush3.bf16.msra.mxu0 %v10588_v20 }
 0x8c0   :  { %8121 = vmatprep.subr.bf16.mxu0 %v9204_v1 }
 0x8e2   :  { %v2994_v47 = vpop.f32.mrb[96].mxu1 }
 0x8e3   :  { %v2995_v63 = vadd.f32 %v10415_v34, %v2994_v47  ;;  %v8023_v37 = vpop.f32.mrb[97].mxu1 }
 0x8e4   :  { %v2997_v57 = vpop.f32.mrb[98].mxu1 }
 0x8e5   :  { %8945 = vtanh.f32 %v2995_v63  ;;  %v8024_v16 = vpop.f32.mrb[99].mxu1 }
 0x8ef   :  { %v10593_v9 = vpop.eup %8945 }
 0x8f0   :  { %3293 = vrot.lane.b32.xlu0 %v10593_v9, %s9203_s26 }
 0x8f2   :  { %v3080_v15 = vpop.f32.mrb[100].mxu1 }
 0x8f3   :  { %v3081_v45 = vadd.f32 %v10600_v27, %v3080_v15  ;;  %v8047_v10 = vpop.f32.mrb[101].mxu1 }
 0x8f4   :  { %v3083_v18 = vpop.f32.mrb[102].mxu1 }
 0x8f5   :  { %8947 = vtanh.f32 %v3081_v45  ;;  %v8048_v41 = vpop.f32.mrb[103].mxu1 }
 0x8f6   :  { %v2792_v13 = vpop.f32.mrb[92].mxu0 }
 0x8f7   :  { %v7987_v59 = vpop.f32.mrb[93].mxu0 }
 0x8f8   :  { %v2795_v24 = vpop.f32.mrb[94].mxu0 }
 0x8f9   :  { %v7988_v2 = vpop.f32.mrb[95].mxu0 }
 0x8ff   :  { %v10603_v46 = vpop.eup %8947 }
 0x900   :  { %3297 = vrot.lane.b32.xlu1 %v10603_v46, %s9203_s26 }
 0x902   :  { %v3166_v48 = vpop.f32.mrb[104].mxu1 }
 0x903   :  { %v3167_v55 = vadd.f32 %v10430_v28, %v3166_v48  ;;  %v8071_v58 = vpop.f32.mrb[105].mxu1  ;;  %v10701_v48 = vld [vmem:[%s12046_s2 + $0x38] sm:$0xff]  }
 0x904   :  { %v3169_v60 = vpop.f32.mrb[106].mxu1  ;;  %3305 = vrot.lane.b32.xlu1 %v10489_v32, %s9203_s26 }
 0x905   :  { %8949 = vtanh.f32 %v3167_v55  ;;  %v8072_v7 = vpop.f32.mrb[107].mxu1  ;;  %v6753_v55 = vld [vmem:[%s12044_s0 + $0xe] sm:$0x3] }
 0x90f   :  { %v10610_v4 = vpop.eup %8949 }
 0x910   :  { %3301 = vrot.lane.b32.xlu0 %v10610_v4, %s9203_s26 }
 0x955   :  { %v2951_v23 = vpop.f32.mrb[96].mxu0 }
 0x956   :  { %v2952_v31 = vadd.f32 %v10294_v56, %v2951_v23  ;;  %v8011_v49 = vpop.f32.mrb[97].mxu0  ;;  %v10713_v23 = vld [vmem:[%s12046_s2 + $0x40] sm:$0xff]  }
 0x957   :  { %v2954_v33 = vpop.f32.mrb[98].mxu0  ;;  %v10729_v49 = vld [vmem:[%s12046_s2 + $0x50] sm:$0xff]  }
 0x958   :  { %8951 = vtanh.f32 %v2952_v31  ;;  %v8012_v12 = vpop.f32.mrb[99].mxu0  ;;  %v10722_v31 = vld [vmem:[%s12046_s2 + $0x48] sm:$0xff]  }
 0x962   :  { %v8952_v61 = vpop.eup %8951  ;;  %v3294_v11 = vpop.permute.xlu0 %3293 }
 0x963   :  { %v3316_v62 = vsel %vm146_vm1, %v8952_v61, %v3294_v11  ;;  %3291 = vrot.lane.b32.xlu0 %v8952_v61, %s9203_s26  ;;  %v10738_v61 = vld [vmem:[%s12046_s2 + $0x58] sm:$0xff]  }
 0x964   :  { %v3324_v32 = vpack.c.bf16 %v3316_v62, %v3316_v62  ;;  %v10746_v62 = vld [vmem:[%s12046_s2 + $0x80] sm:$0xff]  }
 0x965   :  { %v3037_v30 = vpop.f32.mrb[100].mxu0 }
 0x966   :  { %v3038_v35 = vadd.f32 %v10620_v25, %v3037_v30  ;;  %v8035_v56 = vpop.f32.mrb[101].mxu0  ;;  %8118 = vmatmul.mubr.msk.bf16.vlgmr.msra.gmra.mrb[112].mxu1 %vm235_vm2, %v3324_v32  ;;  %v10762_v32 = vld [vmem:[%s12046_s2 + $0x90] sm:$0xff]  }
 0x967   :  { %v3040_v26 = vpop.f32.mrb[102].mxu0  ;;  %8134 = vmatpush3.bf16.msra.mxu1 %v10627_v14  ;;  %8141 = vmatprep.mubr.msk.bf16.mxu1 %vm9205_vm0, %v9204_v1  ;;  %v10771_v56 = vld [vmem:[%s12046_s2 + $0x98] sm:$0xff]  }
 0x968   :  { %8953 = vtanh.f32 %v3038_v35  ;;  %v8036_v17 = vpop.f32.mrb[103].mxu0  ;;  %8135 = vmatprep.subr.bf16.mxu1 %v9204_v1 }
 0x969   :  { %v10779_v17 = vld [vmem:[%s12046_s2 + $0xc0] sm:$0xff]  }
 0x96b   :  { %8136 = vmatpush3.bf16.msra.mxu1 %v10052_v40 }
 0x96c   :  { %8137 = vmatprep.subr.bf16.mxu1 %v9204_v1 }
 0x96f   :  { %8138 = vmatpush3.bf16.msra.mxu1 %v10065_v6 }
 0x970   :  { %8139 = vmatprep.subr.bf16.mxu1 %v9204_v1 }
 0x972   :  { %v8954_v51 = vpop.eup %8953  ;;  %v3298_v8 = vpop.permute.xlu1 %3297 }
 0x973   :  { %v3318_v39 = vsel %vm146_vm1, %v8954_v51, %v3298_v8  ;;  %8140 = vmatpush3.bf16.msra.mxu1 %v10075_v3  ;;  %3295 = vrot.lane.b32.xlu1 %v8954_v51, %s9203_s26  ;;  %v10794_v8 = vld [vmem:[%s12046_s2 + $0xd8] sm:$0xff]  }
 0x974   :  { %v3326_v50 = vpack.c.bf16 %v3318_v39, %v3318_v39  ;;  %8157 = vmatprep.subr.bf16.mxu1 %v9204_v1 }
 0x975   :  { %v3123_v47 = vpop.f32.mrb[104].mxu0 }
 0x976   :  { %v3124_v40 = vadd.f32 %v10315_v29, %v3123_v47  ;;  %v8059_v63 = vpop.f32.mrb[105].mxu0  ;;  %8142 = vmatmul.mubr.msk.bf16.vlgmr.msra.gmra.mrb[116].mxu1 %vm235_vm2, %v3326_v50  ;;  %v3306_v59 = vpop.permute.xlu1 %3305 }
 0x977   :  { %v3126_v6 = vpop.f32.mrb[106].mxu0  ;;  %8158 = vmatpush3.bf16.msra.mxu1 %v10090_v0  ;;  %8165 = vmatprep.mubr.msk.bf16.mxu1 %vm9205_vm0, %v9204_v1 }
 0x978   :  { %8955 = vtanh.f32 %v3124_v40  ;;  %v8060_v37 = vpop.f32.mrb[107].mxu0  ;;  %8159 = vmatprep.subr.bf16.mxu1 %v9204_v1 }
 0x979   :  { %v3252_v3 = vpop.f32.mrb[108].mxu1 }
 0x97a   :  { %v8095_v57 = vpop.f32.mrb[109].mxu1 }
 0x97b   :  { %8160 = vmatpush3.bf16.msra.mxu1 %v10107_v21  ;;  %v3255_v16 = vpop.f32.mrb[110].mxu1  ;;  %v10657_v21 = vld [vmem:[%s12047_s3 + $0x6] ss:$0 sm:$0xff] }
 0x97c   :  { %8161 = vmatprep.subr.bf16.mxu1 %v9204_v1  ;;  %v8096_v29 = vpop.f32.mrb[111].mxu1 }
 0x97f   :  { %8162 = vmatpush3.bf16.msra.mxu1 %v10118_v42 }
 0x980   :  { %8163 = vmatprep.subr.bf16.mxu1 %v9204_v1 }
 0x982   :  { %v8956_v0 = vpop.eup %8955  ;;  %v3302_v15 = vpop.permute.xlu0 %3301 }
 0x983   :  { %v3320_v45 = vsel %vm146_vm1, %v8956_v0, %v3302_v15  ;;  %8164 = vmatpush3.bf16.msra.mxu1 %v10127_v22  ;;  %3299 = vrot.lane.b32.xlu0 %v8956_v0, %s9203_s26 }
 0x984   :  { %v3328_v10 = vpack.c.bf16 %v3320_v45, %v3320_v45  ;;  %8181 = vmatprep.subr.bf16.mxu1 %v9204_v1 }
 0x985   :  { %v3209_v18 = vpop.f32.mrb[108].mxu0 }
 0x986   :  { %v3210_v42 = vadd.f32 %v10657_v21, %v3209_v18  ;;  %v8083_v41 = vpop.f32.mrb[109].mxu0  ;;  %8166 = vmatmul.mubr.msk.bf16.vlgmr.msra.gmra.mrb[120].mxu1 %vm235_vm2, %v3328_v10  ;;  %v10827_v18 = vld [vmem:[%s12047_s3 + $0x7] ss:$0 sm:$0xff] }
 0x987   :  { %v3212_v13 = vpop.f32.mrb[110].mxu0  ;;  %8182 = vmatpush3.bf16.msra.mxu1 %v10194_v36  ;;  %8189 = vmatprep.mubr.msk.bf16.mxu1 %vm9205_vm0, %v9204_v1 }
 0x988   :  { %8957 = vtanh.f32 %v3210_v42  ;;  %v8084_v22 = vpop.f32.mrb[111].mxu0  ;;  %8183 = vmatprep.subr.bf16.mxu1 %v9204_v1 }
 0x98b   :  { %8184 = vmatpush3.bf16.msra.mxu1 %v10210_v54  ;;  %v10678_v54 = vld [vmem:[%s12046_s2 + $0x20] sm:$0xff]  }
 0x98c   :  { %8185 = vmatprep.subr.bf16.mxu1 %v9204_v1 }
 0x98f   :  { %8186 = vmatpush3.bf16.msra.mxu1 %v10226_v19  ;;  %v10687_v19 = vld [vmem:[%s12046_s2 + $0x28] sm:$0xff]  }
 0x990   :  { %8187 = vmatprep.subr.bf16.mxu1 %v9204_v1 }
 0x992   :  { %v8958_v24 = vpop.eup %8957 }
 0x993   :  { %v3322_v2 = vsel %vm146_vm1, %v8958_v24, %v3306_v59  ;;  %8188 = vmatpush3.bf16.msra.mxu1 %v10237_v38  ;;  %3303 = vrot.lane.b32.xlu1 %v8958_v24, %s9203_s26  ;;  %v10694_v38 = vld [vmem:[%s12046_s2 + $0x30] sm:$0xff]  }
 0x994   :  { %v3330_v36 = vpack.c.bf16 %v3322_v2, %v3322_v2  ;;  %8205 = vmatprep.subr.bf16.mxu1 %v9204_v1  ;;  %v9093_v2 = vld [vmem:[%s12047_s3] ss:$0 sm:$0xff] }
 0x996   :  { %8190 = vmatmul.mubr.msk.bf16.vlgmr.msra.gmra.mrb[124].mxu1 %vm235_vm2, %v3330_v36 }
 0x997   :  { %8206 = vmatpush3.bf16.msra.mxu1 %v10678_v54  ;;  %8213 = vmatprep.mubr.msk.bf16.mxu1 %vm9205_vm0, %v9204_v1 }
 0x998   :  { %8207 = vmatprep.subr.bf16.mxu1 %v9204_v1 }
 0x99b   :  { %8208 = vmatpush3.bf16.msra.mxu1 %v10687_v19 }
 0x99c   :  { %8209 = vmatprep.subr.bf16.mxu1 %v9204_v1 }
 0x99f   :  { %8210 = vmatpush3.bf16.msra.mxu1 %v10694_v38 }
 0x9a0   :  { %8211 = vmatprep.subr.bf16.mxu1 %v9204_v1 }
 0x9a3   :  { %8212 = vmatpush3.bf16.msra.mxu1 %v10701_v48 }
 0x9a4   :  { %8229 = vmatprep.subr.bf16.mxu1 %v9204_v1 }
 0x9d5   :  { %v3292_v58 = vpop.permute.xlu0 %3291 }
 0x9d6   :  { %v3315_v60 = vsel %vm146_vm1, %v6753_v55, %v3292_v58 }
 0x9d7   :  { %v3323_v7 = vpack.c.bf16 %v3315_v60, %v3315_v60 }
 0x9d9   :  { %8106 = vmatmul.mubr.msk.bf16.vlgmr.msra.gmra.mrb[112].mxu0 %vm235_vm2, %v3323_v7 }
 0x9da   :  { %8122 = vmatpush3.bf16.msra.mxu0 %v10713_v23  ;;  %8129 = vmatprep.mubr.msk.bf16.mxu0 %vm9205_vm0, %v9204_v1 }
 0x9db   :  { %8123 = vmatprep.subr.bf16.mxu0 %v9204_v1 }
 0x9de   :  { %8124 = vmatpush3.bf16.msra.mxu0 %v10722_v31 }
 0x9df   :  { %8125 = vmatprep.subr.bf16.mxu0 %v9204_v1 }
 0x9e2   :  { %8126 = vmatpush3.bf16.msra.mxu0 %v10729_v49 }
 0x9e3   :  { %8127 = vmatprep.subr.bf16.mxu0 %v9204_v1 }
 0x9e5   :  { %v3296_v33 = vpop.permute.xlu1 %3295 }
 0x9e6   :  { %v3317_v12 = vsel %vm146_vm1, %v10593_v9, %v3296_v33  ;;  %8128 = vmatpush3.bf16.msra.mxu0 %v10738_v61  ;;  %v10755_v9 = vld [vmem:[%s12046_s2 + $0x88] sm:$0xff]  }
 0x9e7   :  { %v3325_v11 = vpack.c.bf16 %v3317_v12, %v3317_v12  ;;  %8145 = vmatprep.subr.bf16.mxu0 %v9204_v1 }
 0x9e9   :  { %8130 = vmatmul.mubr.msk.bf16.vlgmr.msra.gmra.mrb[116].mxu0 %vm235_vm2, %v3325_v11 }
 0x9ea   :  { %8146 = vmatpush3.bf16.msra.mxu0 %v10746_v62  ;;  %8153 = vmatprep.mubr.msk.bf16.mxu0 %vm9205_vm0, %v9204_v1 }
 0x9eb   :  { %8147 = vmatprep.subr.bf16.mxu0 %v9204_v1 }
 0x9ee   :  { %8148 = vmatpush3.bf16.msra.mxu0 %v10755_v9 }
 0x9ef   :  { %8149 = vmatprep.subr.bf16.mxu0 %v9204_v1 }
 0x9f2   :  { %8150 = vmatpush3.bf16.msra.mxu0 %v10762_v32 }
 0x9f3   :  { %8151 = vmatprep.subr.bf16.mxu0 %v9204_v1 }
 0x9f5   :  { %v3300_v30 = vpop.permute.xlu0 %3299 }
 0x9f6   :  { %v3319_v35 = vsel %vm146_vm1, %v10603_v46, %v3300_v30  ;;  %8152 = vmatpush3.bf16.msra.mxu0 %v10771_v56 }
 0x9f7   :  { %v3327_v26 = vpack.c.bf16 %v3319_v35, %v3319_v35  ;;  %8169 = vmatprep.subr.bf16.mxu0 %v9204_v1 }
 0x9f9   :  { %8154 = vmatmul.mubr.msk.bf16.vlgmr.msra.gmra.mrb[120].mxu0 %vm235_vm2, %v3327_v26 }
 0x9fa   :  { %8170 = vmatpush3.bf16.msra.mxu0 %v10779_v17  ;;  %8177 = vmatprep.mubr.msk.bf16.mxu0 %vm9205_vm0, %v9204_v1 }
 0x9fb   :  { %8171 = vmatprep.subr.bf16.mxu0 %v9204_v1 }
 0x9fe   :  { %8172 = vmatpush3.bf16.msra.mxu0 %v10258_v44 }
 0x9ff   :  { %8173 = vmatprep.subr.bf16.mxu0 %v9204_v1 }
 0xa02   :  { %8174 = vmatpush3.bf16.msra.mxu0 %v10267_v5 }
 0xa03   :  { %8175 = vmatprep.subr.bf16.mxu0 %v9204_v1 }
 0xa05   :  { %v3304_v46 = vpop.permute.xlu1 %3303 }
 0xa06   :  { %v3321_v51 = vsel %vm146_vm1, %v10610_v4, %v3304_v46  ;;  %8176 = vmatpush3.bf16.msra.mxu0 %v10794_v8 }
 0xa07   :  { %v3329_v39 = vpack.c.bf16 %v3321_v51, %v3321_v51  ;;  %8193 = vmatprep.subr.bf16.mxu0 %v9204_v1 }
 0xa09   :  { %8178 = vmatmul.mubr.msk.bf16.vlgmr.msra.gmra.mrb[124].mxu0 %vm235_vm2, %v3329_v39  ;;  %v10854_v39 = vld [vmem:[%s12046_s2 + $0x68] sm:$0xff]  }
 0xa0a   :  { %8194 = vmatpush3.bf16.msra.mxu0 %v10564_v43  ;;  %8201 = vmatprep.mubr.msk.bf16.mxu0 %vm9205_vm0, %v9204_v1 }
 0xa0b   :  { %8195 = vmatprep.subr.bf16.mxu0 %v9204_v1 }
 0xa0e   :  { %8196 = vmatpush3.bf16.msra.mxu0 %v10574_v52 }
 0xa0f   :  { %8197 = vmatprep.subr.bf16.mxu0 %v9204_v1 }
 0xa12   :  { %8198 = vmatpush3.bf16.msra.mxu0 %v10581_v53 }
 0xa13   :  { %8199 = vmatprep.subr.bf16.mxu0 %v9204_v1 }
 0xa16   :  { %8200 = vmatpush3.bf16.msra.mxu0 %v10588_v20 }
 0xa17   :  { %8217 = vmatprep.subr.bf16.mxu0 %v9204_v1 }
 0xa39   :  { %v3411_v44 = vpop.f32.mrb[112].mxu1 }
 0xa3a   :  { %v3412_v5 = vadd.f32 %v10415_v34, %v3411_v44  ;;  %v8119_v4 = vpop.f32.mrb[113].mxu1  ;;  %v10861_v44 = vld [vmem:[%s12046_s2 + $0x70] sm:$0xff]  }
 0xa3b   :  { %v3414_v50 = vpop.f32.mrb[114].mxu1 }
 0xa3c   :  { %8959 = vtanh.f32 %v3412_v5  ;;  %v8120_v47 = vpop.f32.mrb[115].mxu1 }
 0xa3d   :  { %v10869_v47 = vld [vmem:[%s12046_s2 + $0x78] sm:$0xff]  }
 0xa46   :  { %v10810_v40 = vpop.eup %8959 }
 0xa47   :  { %3709 = vrot.lane.b32.xlu0 %v10810_v40, %s9203_s26 }
 0xa49   :  { %v3497_v63 = vpop.f32.mrb[116].mxu1 }
 0xa4a   :  { %v3498_v6 = vadd.f32 %v10600_v27, %v3497_v63  ;;  %v8143_v37 = vpop.f32.mrb[117].mxu1 }
 0xa4b   :  { %v3500_v3 = vpop.f32.mrb[118].mxu1  ;;  %v10877_v37 = vld [vmem:[%s12047_s3 + $0x4] ss:$0 sm:$0xff] }
 0xa4c   :  { %8961 = vtanh.f32 %v3498_v6  ;;  %v8144_v57 = vpop.f32.mrb[119].mxu1 }
 0xa56   :  { %v10815_v16 = vpop.eup %8961 }
 0xa57   :  { %3713 = vrot.lane.b32.xlu1 %v10815_v16, %s9203_s26 }
 0xa59   :  { %v3583_v34 = vpop.f32.mrb[120].mxu1 }
 0xa5a   :  { %v3584_v29 = vadd.f32 %v10430_v28, %v3583_v34  ;;  %v8167_v0 = vpop.f32.mrb[121].mxu1 }
 0xa5b   :  { %v3586_v15 = vpop.f32.mrb[122].mxu1 }
 0xa5c   :  { %8963 = vtanh.f32 %v3584_v29  ;;  %v8168_v45 = vpop.f32.mrb[123].mxu1  ;;  %v10884_v29 = vld [vmem:[%s12046_s2 + $0xa0] sm:$0xff]   ;;  %v10893_v15 = vld [vmem:[%s12046_s2 + $0xa8] sm:$0xff]  }
 0xa5d   :  { %v10900_v45 = vld [vmem:[%s12046_s2 + $0xb0] sm:$0xff]  }
 0xa66   :  { %v10820_v10 = vpop.eup %8963 }
 0xa67   :  { %3717 = vrot.lane.b32.xlu0 %v10820_v10, %s9203_s26 }
 0xa69   :  { %v3669_v42 = vpop.f32.mrb[124].mxu1 }
 0xa6a   :  { %v3670_v41 = vadd.f32 %v10827_v18, %v3669_v42  ;;  %v8191_v13 = vpop.f32.mrb[125].mxu1 }
 0xa6b   :  { %v3672_v22 = vpop.f32.mrb[126].mxu1 }
 0xa6c   :  { %8965 = vtanh.f32 %v3670_v41  ;;  %v8192_v28 = vpop.f32.mrb[127].mxu1  ;;  %v10908_v22 = vld [vmem:[%s12046_s2 + $0xb8] sm:$0xff]  }
 0xa76   :  { %v10830_v59 = vpop.eup %8965 }
 0xa77   :  { %3721 = vrot.lane.b32.xlu1 %v10830_v59, %s9203_s26 }
 0xaac   :  { %v3368_v24 = vpop.f32.mrb[112].mxu0 }
 0xaad   :  { %v3369_v36 = vadd.f32 %v9093_v2, %v3368_v24  ;;  %v8107_v55 = vpop.f32.mrb[113].mxu0 }
 0xaae   :  { %v3371_v58 = vpop.f32.mrb[114].mxu0 }
 0xaaf   :  { %8967 = vtanh.f32 %v3369_v36  ;;  %v8108_v60 = vpop.f32.mrb[115].mxu0  ;;  %v10918_v58 = vld [vmem:[%s12046_s2 + $0xe0] sm:$0xff]  }
 0xab9   :  { %v10837_v7 = vpop.eup %8967  ;;  %v3710_v33 = vpop.permute.xlu0 %3709 }
 0xaba   :  { %v3732_v12 = vsel %vm146_vm1, %v10837_v7, %v3710_v33  ;;  %3707 = vrot.lane.b32.xlu0 %v10837_v7, %s9203_s26  ;;  %6612 = vst.msk [vmem:[#allocation5] sm:$0x3] %vm771_vm3, %v10837_v7  ;;  %v10927_v33 = vld [vmem:[%s12046_s2 + $0xe8] sm:$0xff]  }
 0xabb   :  { %v3740_v11 = vpack.c.bf16 %v3732_v12, %v3732_v12  ;;  %v10934_v12 = vld [vmem:[%s12046_s2 + $0xf0] sm:$0xff]  }
 0xabc   :  { %v3454_v30 = vpop.f32.mrb[116].mxu0 }
 0xabd   :  { %v3455_v35 = vadd.f32 %v10620_v25, %v3454_v30  ;;  %v8131_v26 = vpop.f32.mrb[117].mxu0  ;;  %8214 = vmatmul.mubr.msk.bf16.vlgmr.msra.gmra.mrb[128].mxu1 %vm235_vm2, %v3740_v11 }
 0xabe   :  { %v3457_v46 = vpop.f32.mrb[118].mxu0  ;;  %8230 = vmatpush3.bf16.msra.mxu1 %v10627_v14  ;;  %8237 = vmatprep.mubr.msk.bf16.mxu1 %vm9205_vm0, %v9204_v1  ;;  %v10942_v26 = vld [vmem:[%s12046_s2 + $0xf8] sm:$0xff]  }
 0xabf   :  { %8969 = vtanh.f32 %v3455_v35  ;;  %v8132_v51 = vpop.f32.mrb[119].mxu0  ;;  %8231 = vmatprep.subr.bf16.mxu1 %v9204_v1 }
 0xac0   :  { %v6762_v51 = vld [vmem:[%s12044_s0 + $0xe] sm:$0x3] }
 0xac2   :  { %8232 = vmatpush3.bf16.msra.mxu1 %v10854_v39 }
 0xac3   :  { %8233 = vmatprep.subr.bf16.mxu1 %v9204_v1 }
 0xac6   :  { %8234 = vmatpush3.bf16.msra.mxu1 %v10861_v44 }
 0xac7   :  { %8235 = vmatprep.subr.bf16.mxu1 %v9204_v1 }
 0xac9   :  { %v8970_v5 = vpop.eup %8969  ;;  %v3714_v4 = vpop.permute.xlu1 %3713 }
 0xaca   :  { %v3734_v50 = vsel %vm146_vm1, %v8970_v5, %v3714_v4  ;;  %8236 = vmatpush3.bf16.msra.mxu1 %v10869_v47  ;;  %3711 = vrot.lane.b32.xlu1 %v8970_v5, %s9203_s26 }
 0xacb   :  { %v3742_v63 = vpack.c.bf16 %v3734_v50, %v3734_v50  ;;  %8253 = vmatprep.subr.bf16.mxu1 %v9204_v1 }
 0xacc   :  { %v3540_v6 = vpop.f32.mrb[120].mxu0 }
 0xacd   :  { %v3541_v3 = vadd.f32 %v10877_v37, %v3540_v6  ;;  %v8155_v57 = vpop.f32.mrb[121].mxu0  ;;  %8238 = vmatmul.mubr.msk.bf16.vlgmr.msra.gmra.mrb[132].mxu1 %vm235_vm2, %v3742_v63 }
 0xace   :  { %v3543_v34 = vpop.f32.mrb[122].mxu0  ;;  %8254 = vmatpush3.bf16.msra.mxu1 %v10884_v29  ;;  %8261 = vmatprep.mubr.msk.bf16.mxu1 %vm9205_vm0, %v9204_v1 }
 0xacf   :  { %8971 = vtanh.f32 %v3541_v3  ;;  %v8156_v0 = vpop.f32.mrb[123].mxu0  ;;  %8255 = vmatprep.subr.bf16.mxu1 %v9204_v1 }
 0xad0   :  { %v10996_v0 = vld [vmem:[%s12046_s2 + $0xc8] sm:$0xff]  }
 0xad2   :  { %8256 = vmatpush3.bf16.msra.mxu1 %v10893_v15 }
 0xad3   :  { %8257 = vmatprep.subr.bf16.mxu1 %v9204_v1 }
 0xad6   :  { %8258 = vmatpush3.bf16.msra.mxu1 %v10900_v45 }
 0xad7   :  { %8259 = vmatprep.subr.bf16.mxu1 %v9204_v1 }
 0xad9   :  { %v8972_v42 = vpop.eup %8971  ;;  %v3718_v41 = vpop.permute.xlu0 %3717 }
 0xada   :  { %v3736_v13 = vsel %vm146_vm1, %v8972_v42, %v3718_v41  ;;  %8260 = vmatpush3.bf16.msra.mxu1 %v10908_v22  ;;  %3715 = vrot.lane.b32.xlu0 %v8972_v42, %s9203_s26 }
 0xadb   :  { %v3744_v28 = vpack.c.bf16 %v3736_v13, %v3736_v13  ;;  %8277 = vmatprep.subr.bf16.mxu1 %v9204_v1 }
 0xadc   :  { %v3626_v24 = vpop.f32.mrb[124].mxu0 }
 0xadd   :  { %v3627_v2 = vadd.f32 %v10657_v21, %v3626_v24  ;;  %v8179_v36 = vpop.f32.mrb[125].mxu0  ;;  %8262 = vmatmul.mubr.msk.bf16.vlgmr.msra.gmra.mrb[136].mxu1 %vm235_vm2, %v3744_v28 }
 0xade   :  { %v3629_v55 = vpop.f32.mrb[126].mxu0  ;;  %8278 = vmatpush3.bf16.msra.mxu1 %v10918_v58  ;;  %8285 = vmatprep.mubr.msk.bf16.mxu1 %vm9205_vm0, %v9204_v1 }
 0xadf   :  { %8973 = vtanh.f32 %v3627_v2  ;;  %v8180_v60 = vpop.f32.mrb[127].mxu0  ;;  %8279 = vmatprep.subr.bf16.mxu1 %v9204_v1 }
 0xae2   :  { %8280 = vmatpush3.bf16.msra.mxu1 %v10927_v33 }
 0xae3   :  { %8281 = vmatprep.subr.bf16.mxu1 %v9204_v1 }
 0xae6   :  { %8282 = vmatpush3.bf16.msra.mxu1 %v10934_v12 }
 0xae7   :  { %8283 = vmatprep.subr.bf16.mxu1 %v9204_v1 }
 0xae9   :  { %v8974_v11 = vpop.eup %8973  ;;  %v3722_v30 = vpop.permute.xlu1 %3721 }
 0xaea   :  { %v3738_v35 = vsel %vm146_vm1, %v8974_v11, %v3722_v30  ;;  %8284 = vmatpush3.bf16.msra.mxu1 %v10942_v26  ;;  %3719 = vrot.lane.b32.xlu1 %v8974_v11, %s9203_s26 }
 0xaeb   :  { %v3746_v46 = vpack.c.bf16 %v3738_v35, %v3738_v35  ;;  %8301 = vmatprep.subr.bf16.mxu1 %v9204_v1 }
 0xaed   :  { %8286 = vmatmul.mubr.msk.bf16.vlgmr.msra.gmra.mrb[140].mxu1 %vm235_vm2, %v3746_v46  ;;  %v11039_v46 = vld [vmem:[%s12047_s3 + $0x5] ss:$0 sm:$0xff] }
 0xaee   :  { %8302 = vmatpush3.bf16.msra.mxu1 %v10678_v54  ;;  %8309 = vmatprep.mubr.msk.bf16.mxu1 %vm9205_vm0, %v9204_v1 }
 0xaef   :  { %8303 = vmatprep.subr.bf16.mxu1 %v9204_v1 }
 0xaf2   :  { %8304 = vmatpush3.bf16.msra.mxu1 %v10687_v19 }
 0xaf3   :  { %8305 = vmatprep.subr.bf16.mxu1 %v9204_v1 }
 0xaf6   :  { %8306 = vmatpush3.bf16.msra.mxu1 %v10694_v38 }
 0xaf7   :  { %8307 = vmatprep.subr.bf16.mxu1 %v9204_v1 }
 0xafa   :  { %8308 = vmatpush3.bf16.msra.mxu1 %v10701_v48 }
 0xafb   :  { %8325 = vmatprep.subr.bf16.mxu1 %v9204_v1 }
 0xb2c   :  { %v3708_v5 = vpop.permute.xlu0 %3707 }
 0xb2d   :  { %v3731_v4 = vsel %vm146_vm1, %v6762_v51, %v3708_v5 }
 0xb2e   :  { %v3739_v50 = vpack.c.bf16 %v3731_v4, %v3731_v4 }
 0xb30   :  { %8202 = vmatmul.mubr.msk.bf16.vlgmr.msra.gmra.mrb[128].mxu0 %vm235_vm2, %v3739_v50 }
 0xb31   :  { %8218 = vmatpush3.bf16.msra.mxu0 %v10713_v23  ;;  %8225 = vmatprep.mubr.msk.bf16.mxu0 %vm9205_vm0, %v9204_v1 }
 0xb32   :  { %8219 = vmatprep.subr.bf16.mxu0 %v9204_v1 }
 0xb35   :  { %8220 = vmatpush3.bf16.msra.mxu0 %v10722_v31 }
 0xb36   :  { %8221 = vmatprep.subr.bf16.mxu0 %v9204_v1 }
 0xb39   :  { %8222 = vmatpush3.bf16.msra.mxu0 %v10729_v49 }
 0xb3a   :  { %8223 = vmatprep.subr.bf16.mxu0 %v9204_v1 }
 0xb3c   :  { %v3712_v63 = vpop.permute.xlu1 %3711 }
 0xb3d   :  { %v3733_v6 = vsel %vm146_vm1, %v10810_v40, %v3712_v63  ;;  %8224 = vmatpush3.bf16.msra.mxu0 %v10738_v61 }
 0xb3e   :  { %v3741_v3 = vpack.c.bf16 %v3733_v6, %v3733_v6  ;;  %8241 = vmatprep.subr.bf16.mxu0 %v9204_v1 }
 0xb40   :  { %8226 = vmatmul.mubr.msk.bf16.vlgmr.msra.gmra.mrb[132].mxu0 %vm235_vm2, %v3741_v3 }
 0xb41   :  { %8242 = vmatpush3.bf16.msra.mxu0 %v10746_v62  ;;  %8249 = vmatprep.mubr.msk.bf16.mxu0 %vm9205_vm0, %v9204_v1 }
 0xb42   :  { %8243 = vmatprep.subr.bf16.mxu0 %v9204_v1 }
 0xb45   :  { %8244 = vmatpush3.bf16.msra.mxu0 %v10755_v9 }
 0xb46   :  { %8245 = vmatprep.subr.bf16.mxu0 %v9204_v1 }
 0xb49   :  { %8246 = vmatpush3.bf16.msra.mxu0 %v10762_v32 }
 0xb4a   :  { %8247 = vmatprep.subr.bf16.mxu0 %v9204_v1 }
 0xb4c   :  { %v3716_v40 = vpop.permute.xlu0 %3715 }
 0xb4d   :  { %v3735_v57 = vsel %vm146_vm1, %v10815_v16, %v3716_v40  ;;  %8248 = vmatpush3.bf16.msra.mxu0 %v10771_v56  ;;  %v11003_v16 = vld [vmem:[%s12046_s2 + $0xd0] sm:$0xff]  }
 0xb4e   :  { %v3743_v34 = vpack.c.bf16 %v3735_v57, %v3735_v57  ;;  %8265 = vmatprep.subr.bf16.mxu0 %v9204_v1 }
 0xb50   :  { %8250 = vmatmul.mubr.msk.bf16.vlgmr.msra.gmra.mrb[136].mxu0 %vm235_vm2, %v3743_v34 }
 0xb51   :  { %8266 = vmatpush3.bf16.msra.mxu0 %v10779_v17  ;;  %8273 = vmatprep.mubr.msk.bf16.mxu0 %vm9205_vm0, %v9204_v1 }
 0xb52   :  { %8267 = vmatprep.subr.bf16.mxu0 %v9204_v1 }
 0xb55   :  { %8268 = vmatpush3.bf16.msra.mxu0 %v10996_v0 }
 0xb56   :  { %8269 = vmatprep.subr.bf16.mxu0 %v9204_v1 }
 0xb59   :  { %8270 = vmatpush3.bf16.msra.mxu0 %v11003_v16 }
 0xb5a   :  { %8271 = vmatprep.subr.bf16.mxu0 %v9204_v1 }
 0xb5c   :  { %v3720_v42 = vpop.permute.xlu1 %3719 }
 0xb5d   :  { %v3737_v41 = vsel %vm146_vm1, %v10820_v10, %v3720_v42  ;;  %8272 = vmatpush3.bf16.msra.mxu0 %v10794_v8 }
 0xb5e   :  { %v3745_v13 = vpack.c.bf16 %v3737_v41, %v3737_v41  ;;  %8289 = vmatprep.subr.bf16.mxu0 %v9204_v1 }
 0xb60   :  { %8274 = vmatmul.mubr.msk.bf16.vlgmr.msra.gmra.mrb[140].mxu0 %vm235_vm2, %v3745_v13 }
 0xb61   :  { %8290 = vmatpush3.bf16.msra.mxu0 %v10564_v43  ;;  %8297 = vmatprep.mubr.msk.bf16.mxu0 %vm9205_vm0, %v9204_v1  ;;  %v9108_v43 = vld [vmem:[%s12047_s3 + $0x1] ss:$0 sm:$0xff] }
 0xb62   :  { %8291 = vmatprep.subr.bf16.mxu0 %v9204_v1 }
 0xb65   :  { %8292 = vmatpush3.bf16.msra.mxu0 %v10574_v52 }
 0xb66   :  { %8293 = vmatprep.subr.bf16.mxu0 %v9204_v1 }
 0xb69   :  { %8294 = vmatpush3.bf16.msra.mxu0 %v10581_v53 }
 0xb6a   :  { %8295 = vmatprep.subr.bf16.mxu0 %v9204_v1 }
 0xb6d   :  { %8296 = vmatpush3.bf16.msra.mxu0 %v10588_v20 }
 0xb6e   :  { %8313 = vmatprep.subr.bf16.mxu0 %v9204_v1 }
 0xb90   :  { %v3827_v10 = vpop.f32.mrb[128].mxu1 }
 0xb91   :  { %v3828_v28 = vadd.f32 %v9108_v43, %v3827_v10  ;;  %v8215_v24 = vpop.f32.mrb[129].mxu1 }
 0xb92   :  { %v3830_v2 = vpop.f32.mrb[130].mxu1 }
 0xb93   :  { %8975 = vtanh.f32 %v3828_v28  ;;  %v8216_v52 = vpop.f32.mrb[131].mxu1 }
 0xb9d   :  { %v11025_v36 = vpop.eup %8975 }
 0xb9e   :  { %4125 = vrot.lane.b32.xlu0 %v11025_v36, %s9203_s26  ;;  %6613 = vst.msk [vmem:[#allocation5 + $0x2] sm:$0x3] %vm771_vm3, %v11025_v36 }
 0xba0   :  { %v3913_v53 = vpop.f32.mrb[132].mxu1 }
 0xba1   :  { %v3914_v20 = vadd.f32 %v10600_v27, %v3913_v53  ;;  %v8239_v55 = vpop.f32.mrb[133].mxu1 }
 0xba2   :  { %v3916_v60 = vpop.f32.mrb[134].mxu1 }
 0xba3   :  { %8977 = vtanh.f32 %v3914_v20  ;;  %v8240_v11 = vpop.f32.mrb[135].mxu1 }
 0xbad   :  { %v11032_v30 = vpop.eup %8977 }
 0xbae   :  { %4129 = vrot.lane.b32.xlu1 %v11032_v30, %s9203_s26 }
 0xbb0   :  { %v3999_v35 = vpop.f32.mrb[136].mxu1 }
 0xbb1   :  { %v4000_v51 = vadd.f32 %v11039_v46, %v3999_v35  ;;  %v8263_v5 = vpop.f32.mrb[137].mxu1 }
 0xbb2   :  { %v4002_v4 = vpop.f32.mrb[138].mxu1 }
 0xbb3   :  { %8979 = vtanh.f32 %v4000_v51  ;;  %v8264_v27 = vpop.f32.mrb[139].mxu1 }
 0xbbd   :  { %v11042_v50 = vpop.eup %8979 }
 0xbbe   :  { %4133 = vrot.lane.b32.xlu0 %v11042_v50, %s9203_s26 }
 0xbc0   :  { %v4085_v63 = vpop.f32.mrb[140].mxu1 }
 0xbc1   :  { %v4086_v6 = vadd.f32 %v10827_v18, %v4085_v63  ;;  %v8287_v3 = vpop.f32.mrb[141].mxu1 }
 0xbc2   :  { %4123 = vrot.lane.b32.xlu0 %v10837_v7, %s9203_s26  ;;  %v4088_v40 = vpop.f32.mrb[142].mxu1 }
 0xbc3   :  { %8981 = vtanh.f32 %v4086_v6  ;;  %v8288_v57 = vpop.f32.mrb[143].mxu1 }
 0xbcd   :  { %v11049_v34 = vpop.eup %8981 }
 0xbce   :  { %4137 = vrot.lane.b32.xlu1 %v11049_v34, %s9203_s26 }
 0xc03   :  { %v3784_v42 = vpop.f32.mrb[128].mxu0 }
 0xc04   :  { %v8203_v41 = vpop.f32.mrb[129].mxu0  ;;  %v6771_v42 = vld [vmem:[%s12044_s0 + $0xe] sm:$0x3] }
 0xc05   :  { %v3787_v13 = vpop.f32.mrb[130].mxu0 }
 0xc06   :  { %v8204_v10 = vpop.f32.mrb[131].mxu0 }
 0xc10   :  { %v4126_v43 = vpop.permute.xlu0 %4125 }
 0xc11   :  { %v4148_v28 = vsel %vm146_vm1, %v10837_v7, %v4126_v43 }
 0xc12   :  { %v4156_v24 = vpack.c.bf16 %v4148_v28, %v4148_v28 }
 0xc13   :  { %v3870_v2 = vpop.f32.mrb[132].mxu0 }
 0xc14   :  { %v3871_v52 = vadd.f32 %v10620_v25, %v3870_v2  ;;  %v8227_v53 = vpop.f32.mrb[133].mxu0  ;;  %8310 = vmatmul.mubr.msk.bf16.vlgmr.msra.gmra.mrb[144].mxu1 %vm235_vm2, %v4156_v24 }
 0xc15   :  { %v3873_v20 = vpop.f32.mrb[134].mxu0  ;;  %8326 = vmatpush3.bf16.msra.mxu1 %v10627_v14  ;;  %8333 = vmatprep.mubr.msk.bf16.mxu1 %vm9205_vm0, %v9204_v1 }
 0xc16   :  { %8983 = vtanh.f32 %v3871_v52  ;;  %v8228_v55 = vpop.f32.mrb[135].mxu0  ;;  %8327 = vmatprep.subr.bf16.mxu1 %v9204_v1 }
 0xc19   :  { %8328 = vmatpush3.bf16.msra.mxu1 %v10854_v39 }
 0xc1a   :  { %8329 = vmatprep.subr.bf16.mxu1 %v9204_v1 }
 0xc1d   :  { %8330 = vmatpush3.bf16.msra.mxu1 %v10861_v44 }
 0xc1e   :  { %8331 = vmatprep.subr.bf16.mxu1 %v9204_v1 }
 0xc20   :  { %v8984_v25 = vpop.eup %8983  ;;  %v4130_v60 = vpop.permute.xlu1 %4129 }
 0xc21   :  { %v4150_v11 = vsel %vm146_vm1, %v8984_v25, %v4130_v60  ;;  %8332 = vmatpush3.bf16.msra.mxu1 %v10869_v47  ;;  %4127 = vrot.lane.b32.xlu1 %v8984_v25, %s9203_s26 }
 0xc22   :  { %v4158_v35 = vpack.c.bf16 %v4150_v11, %v4150_v11  ;;  %8349 = vmatprep.subr.bf16.mxu1 %v9204_v1 }
 0xc23   :  { %v3956_v51 = vpop.f32.mrb[136].mxu0 }
 0xc24   :  { %v3957_v5 = vadd.f32 %v10877_v37, %v3956_v51  ;;  %v8251_v4 = vpop.f32.mrb[137].mxu0  ;;  %8334 = vmatmul.mubr.msk.bf16.vlgmr.msra.gmra.mrb[148].mxu1 %vm235_vm2, %v4158_v35 }
 0xc25   :  { %v3959_v27 = vpop.f32.mrb[138].mxu0  ;;  %8350 = vmatpush3.bf16.msra.mxu1 %v10884_v29  ;;  %8357 = vmatprep.mubr.msk.bf16.mxu1 %vm9205_vm0, %v9204_v1  ;;  %v11169_v4 = vld [vmem:[%s12046_s2] sm:$0xff]  }
 0xc26   :  { %8985 = vtanh.f32 %v3957_v5  ;;  %v8252_v63 = vpop.f32.mrb[139].mxu0  ;;  %8351 = vmatprep.subr.bf16.mxu1 %v9204_v1  ;;  %v11193_v27 = vld [vmem:[%s12046_s2 + $0x18] sm:$0xff]  }
 0xc29   :  { %8352 = vmatpush3.bf16.msra.mxu1 %v10893_v15 }
 0xc2a   :  { %8353 = vmatprep.subr.bf16.mxu1 %v9204_v1 }
 0xc2d   :  { %8354 = vmatpush3.bf16.msra.mxu1 %v10900_v45 }
 0xc2e   :  { %8355 = vmatprep.subr.bf16.mxu1 %v9204_v1 }
 0xc30   :  { %v8986_v6 = vpop.eup %8985  ;;  %v4134_v3 = vpop.permute.xlu0 %4133 }
 0xc31   :  { %v4152_v40 = vsel %vm146_vm1, %v8986_v6, %v4134_v3  ;;  %8356 = vmatpush3.bf16.msra.mxu1 %v10908_v22  ;;  %4131 = vrot.lane.b32.xlu0 %v8986_v6, %s9203_s26 }
 0xc32   :  { %v4160_v57 = vpack.c.bf16 %v4152_v40, %v4152_v40  ;;  %8373 = vmatprep.subr.bf16.mxu1 %v9204_v1 }
 0xc33   :  { %v4042_v41 = vpop.f32.mrb[140].mxu0 }
 0xc34   :  { %v4043_v13 = vadd.f32 %v10657_v21, %v4042_v41  ;;  %v4124_v10 = vpop.permute.xlu0 %4123  ;;  %v8275_v43 = vpop.f32.mrb[141].mxu0  ;;  %8358 = vmatmul.mubr.msk.bf16.vlgmr.msra.gmra.mrb[152].mxu1 %vm235_vm2, %v4160_v57 }
 0xc35   :  { %v4147_v28 = vsel %vm146_vm1, %v6771_v42, %v4124_v10  ;;  %4541 = vrot.lane.b32.xlu0 %v11025_v36, %s9203_s26  ;;  %v4045_v24 = vpop.f32.mrb[142].mxu0  ;;  %8374 = vmatpush3.bf16.msra.mxu1 %v10918_v58  ;;  %v11200_v42 = vld [vmem:[%s12047_s3 + $0x3] ss:$0 sm:$0xff] }
 0xc36   :  { %8987 = vtanh.f32 %v4043_v13  ;;  %v4155_v2 = vpack.c.bf16 %v4147_v28, %v4147_v28  ;;  %v8276_v52 = vpop.f32.mrb[143].mxu0  ;;  %8375 = vmatprep.subr.bf16.mxu1 %v9204_v1  ;;  %8381 = vmatprep.mubr.msk.bf16.mxu1 %vm9205_vm0, %v9204_v1 }
 0xc38   :  { %8298 = vmatmul.mubr.msk.bf16.vlgmr.msra.gmra.mrb[144].mxu0 %vm235_vm2, %v4155_v2 }
 0xc39   :  { %8376 = vmatpush3.bf16.msra.mxu1 %v10927_v33  ;;  %8314 = vmatpush3.bf16.msra.mxu0 %v10713_v23 }
 0xc3a   :  { %8377 = vmatprep.subr.bf16.mxu1 %v9204_v1  ;;  %8315 = vmatprep.subr.bf16.mxu0 %v9204_v1 }
 0xc3b   :  { %8321 = vmatprep.mubr.msk.bf16.mxu0 %vm9205_vm0, %v9204_v1 }
 0xc3d   :  { %8378 = vmatpush3.bf16.msra.mxu1 %v10934_v12  ;;  %8316 = vmatpush3.bf16.msra.mxu0 %v10722_v31 }
 0xc3e   :  { %8379 = vmatprep.subr.bf16.mxu1 %v9204_v1  ;;  %8317 = vmatprep.subr.bf16.mxu0 %v9204_v1 }
 0xc40   :  { %v8988_v21 = vpop.eup %8987  ;;  %v4138_v53 = vpop.permute.xlu1 %4137 }
 0xc41   :  { %v4154_v20 = vsel %vm146_vm1, %v8988_v21, %v4138_v53  ;;  %8380 = vmatpush3.bf16.msra.mxu1 %v10942_v26  ;;  %4135 = vrot.lane.b32.xlu1 %v8988_v21, %s9203_s26 }
 0xc42   :  { %v4162_v55 = vpack.c.bf16 %v4154_v20, %v4154_v20  ;;  %8318 = vmatpush3.bf16.msra.mxu0 %v10729_v49  ;;  %8397 = vmatprep.subr.bf16.mxu1 %v9204_v1 }
 0xc43   :  { %8319 = vmatprep.subr.bf16.mxu0 %v9204_v1 }
 0xc44   :  { %8382 = vmatmul.mubr.msk.bf16.vlgmr.msra.gmra.mrb[156].mxu1 %vm235_vm2, %v4162_v55 }
 0xc45   :  { %8398 = vmatpush3.bf16.msra.mxu1 %v10678_v54  ;;  %8405 = vmatprep.mubr.msk.bf16.mxu1 %vm9205_vm0, %v9204_v1 }
 0xc46   :  { %8320 = vmatpush3.bf16.msra.mxu0 %v10738_v61  ;;  %8399 = vmatprep.subr.bf16.mxu1 %v9204_v1 }
 0xc47   :  { %8337 = vmatprep.subr.bf16.mxu0 %v9204_v1 }
 0xc49   :  { %8400 = vmatpush3.bf16.msra.mxu1 %v10687_v19 }
 0xc4a   :  { %8401 = vmatprep.subr.bf16.mxu1 %v9204_v1 }
 0xc4d   :  { %8402 = vmatpush3.bf16.msra.mxu1 %v10694_v38 }
 0xc4e   :  { %8403 = vmatprep.subr.bf16.mxu1 %v9204_v1 }
 0xc51   :  { %8404 = vmatpush3.bf16.msra.mxu1 %v10701_v48 }
 0xc52   :  { %8421 = vmatprep.subr.bf16.mxu1 %v9204_v1 }
 0xc93   :  { %v4128_v54 = vpop.permute.xlu1 %4127 }
 0xc94   :  { %v4149_v25 = vsel %vm146_vm1, %v11025_v36, %v4128_v54 }
 0xc95   :  { %v4157_v60 = vpack.c.bf16 %v4149_v25, %v4149_v25 }
 0xc97   :  { %8322 = vmatmul.mubr.msk.bf16.vlgmr.msra.gmra.mrb[148].mxu0 %vm235_vm2, %v4157_v60 }
 0xc98   :  { %8338 = vmatpush3.bf16.msra.mxu0 %v10746_v62  ;;  %8345 = vmatprep.mubr.msk.bf16.mxu0 %vm9205_vm0, %v9204_v1 }
 0xc99   :  { %8339 = vmatprep.subr.bf16.mxu0 %v9204_v1 }
 0xc9c   :  { %8340 = vmatpush3.bf16.msra.mxu0 %v10755_v9 }
 0xc9d   :  { %8341 = vmatprep.subr.bf16.mxu0 %v9204_v1 }
 0xca0   :  { %8342 = vmatpush3.bf16.msra.mxu0 %v10762_v32 }
 0xca1   :  { %8343 = vmatprep.subr.bf16.mxu0 %v9204_v1 }
 0xca3   :  { %v4132_v19 = vpop.permute.xlu0 %4131 }
 0xca4   :  { %v4151_v38 = vsel %vm146_vm1, %v11032_v30, %v4132_v19  ;;  %8344 = vmatpush3.bf16.msra.mxu0 %v10771_v56 }
 0xca5   :  { %v4159_v48 = vpack.c.bf16 %v4151_v38, %v4151_v38  ;;  %8361 = vmatprep.subr.bf16.mxu0 %v9204_v1 }
 0xca7   :  { %8346 = vmatmul.mubr.msk.bf16.vlgmr.msra.gmra.mrb[152].mxu0 %vm235_vm2, %v4159_v48  ;;  %v4542_v11 = vpop.permute.xlu0 %4541 }
 0xca8   :  { %v4564_v35 = vsel %vm146_vm1, %v10837_v7, %v4542_v11  ;;  %8362 = vmatpush3.bf16.msra.mxu0 %v10779_v17  ;;  %8369 = vmatprep.mubr.msk.bf16.mxu0 %vm9205_vm0, %v9204_v1 }
 0xca9   :  { %v4572_v51 = vpack.c.bf16 %v4564_v35, %v4564_v35  ;;  %8363 = vmatprep.subr.bf16.mxu0 %v9204_v1 }
 0xcab   :  { %8406 = vmatmul.mubr.msk.bf16.vlgmr.msra.gmra.mrb[160].mxu1 %vm235_vm2, %v4572_v51 }
 0xcac   :  { %8364 = vmatpush3.bf16.msra.mxu0 %v10996_v0  ;;  %8422 = vmatpush3.bf16.msra.mxu1 %v10627_v14 }
 0xcad   :  { %8365 = vmatprep.subr.bf16.mxu0 %v9204_v1  ;;  %8423 = vmatprep.subr.bf16.mxu1 %v9204_v1 }
 0xcae   :  { %8429 = vmatprep.mubr.msk.bf16.mxu1 %vm9205_vm0, %v9204_v1 }
 0xcb0   :  { %8366 = vmatpush3.bf16.msra.mxu0 %v11003_v16  ;;  %8424 = vmatpush3.bf16.msra.mxu1 %v10854_v39 }
 0xcb1   :  { %8367 = vmatprep.subr.bf16.mxu0 %v9204_v1  ;;  %8425 = vmatprep.subr.bf16.mxu1 %v9204_v1 }
 0xcb3   :  { %v4136_v30 = vpop.permute.xlu1 %4135 }
 0xcb4   :  { %v4153_v5 = vsel %vm146_vm1, %v11042_v50, %v4136_v30  ;;  %8368 = vmatpush3.bf16.msra.mxu0 %v10794_v8  ;;  %8426 = vmatpush3.bf16.msra.mxu1 %v10861_v44  ;;  %v11179_v8 = vld [vmem:[%s12046_s2 + $0x8] sm:$0xff]   ;;  %v11186_v50 = vld [vmem:[%s12046_s2 + $0x10] sm:$0xff]  }
 0xcb5   :  { %v4161_v14 = vpack.c.bf16 %v4153_v5, %v4153_v5  ;;  %8427 = vmatprep.subr.bf16.mxu1 %v9204_v1  ;;  %8385 = vmatprep.subr.bf16.mxu0 %v9204_v1  ;;  %v9115_v5 = vld [vmem:[%s12047_s3 + $0x2] ss:$0 sm:$0xff] }
 0xcb7   :  { %8370 = vmatmul.mubr.msk.bf16.vlgmr.msra.gmra.mrb[156].mxu0 %vm235_vm2, %v4161_v14 }
 0xcb8   :  { %8428 = vmatpush3.bf16.msra.mxu1 %v10869_v47  ;;  %8386 = vmatpush3.bf16.msra.mxu0 %v11169_v4 }
 0xcb9   :  { %8445 = vmatprep.subr.bf16.mxu1 %v9204_v1  ;;  %8387 = vmatprep.subr.bf16.mxu0 %v9204_v1 }
 0xcba   :  { %8393 = vmatprep.mubr.msk.bf16.mxu0 %vm9205_vm0, %v9204_v1 }
 0xcbc   :  { %8388 = vmatpush3.bf16.msra.mxu0 %v11179_v8 }
 0xcbd   :  { %8389 = vmatprep.subr.bf16.mxu0 %v9204_v1 }
 0xcc0   :  { %8390 = vmatpush3.bf16.msra.mxu0 %v11186_v50 }
 0xcc1   :  { %8391 = vmatprep.subr.bf16.mxu0 %v9204_v1 }
 0xcc4   :  { %8392 = vmatpush3.bf16.msra.mxu0 %v11193_v27 }
 0xcc5   :  { %8409 = vmatprep.subr.bf16.mxu0 %v9204_v1 }
 0xce7   :  { %v4243_v63 = vpop.f32.mrb[144].mxu1 }
 0xce8   :  { %v8311_v6 = vpop.f32.mrb[145].mxu1 }
 0xce9   :  { %v4246_v3 = vpop.f32.mrb[146].mxu1 }
 0xcea   :  { %v8312_v40 = vpop.f32.mrb[147].mxu1 }
 0xcf7   :  { %v4329_v57 = vpop.f32.mrb[148].mxu1 }
 0xcf8   :  { %v4330_v41 = vadd.f32 %v11200_v42, %v4329_v57  ;;  %v8335_v13 = vpop.f32.mrb[149].mxu1 }
 0xcf9   :  { %v4332_v10 = vpop.f32.mrb[150].mxu1 }
 0xcfa   :  { %8989 = vtanh.f32 %v4330_v41  ;;  %v8336_v43 = vpop.f32.mrb[151].mxu1 }
 0xd04   :  { %v11203_v28 = vpop.eup %8989 }
 0xd05   :  { %4545 = vrot.lane.b32.xlu1 %v11203_v28, %s9203_s26 }
 0xd07   :  { %v4415_v24 = vpop.f32.mrb[152].mxu1 }
 0xd08   :  { %v4416_v2 = vadd.f32 %v11039_v46, %v4415_v24  ;;  %v8359_v52 = vpop.f32.mrb[153].mxu1 }
 0xd09   :  { %v4418_v21 = vpop.f32.mrb[154].mxu1 }
 0xd0a   :  { %8991 = vtanh.f32 %v4416_v2  ;;  %v8360_v53 = vpop.f32.mrb[155].mxu1 }
 0xd0b   :  { %v4200_v20 = vpop.f32.mrb[144].mxu0 }
 0xd0c   :  { %v8299_v55 = vpop.f32.mrb[145].mxu0 }
 0xd0d   :  { %v4203_v54 = vpop.f32.mrb[146].mxu0 }
 0xd0e   :  { %v8300_v25 = vpop.f32.mrb[147].mxu0 }
 0xd14   :  { %v11208_v60 = vpop.eup %8991 }
 0xd15   :  { %4549 = vrot.lane.b32.xlu0 %v11208_v60, %s9203_s26 }
 0xd17   :  { %v4501_v19 = vpop.f32.mrb[156].mxu1 }
 0xd18   :  { %v4502_v38 = vadd.f32 %v10827_v18, %v4501_v19  ;;  %v8383_v48 = vpop.f32.mrb[157].mxu1 }
 0xd19   :  { %4539 = vrot.lane.b32.xlu0 %v10837_v7, %s9203_s26  ;;  %v4504_v11 = vpop.f32.mrb[158].mxu1 }
 0xd1a   :  { %8993 = vtanh.f32 %v4502_v38  ;;  %v8384_v35 = vpop.f32.mrb[159].mxu1  ;;  %v6780_v38 = vld [vmem:[%s12044_s0 + $0xe] sm:$0x3]  ;;  %v11250_v11 = vld [vmem:[%s12047_s3 + $0x6] ss:$0 sm:$0xff] }
 0xd24   :  { %v11215_v51 = vpop.eup %8993 }
 0xd25   :  { %4553 = vrot.lane.b32.xlu1 %v11215_v51, %s9203_s26 }
 0xd6a   :  { %v4286_v30 = vpop.f32.mrb[148].mxu0 }
 0xd6b   :  { %v4287_v14 = vadd.f32 %v9115_v5, %v4286_v30  ;;  %v8323_v63 = vpop.f32.mrb[149].mxu0 }
 0xd6c   :  { %v4289_v18 = vpop.f32.mrb[150].mxu0 }
 0xd6d   :  { %8995 = vtanh.f32 %v4287_v14  ;;  %v8324_v6 = vpop.f32.mrb[151].mxu0 }
 0xd77   :  { %v11222_v3 = vpop.eup %8995  ;;  %v4546_v40 = vpop.permute.xlu1 %4545 }
 0xd78   :  { %v4566_v57 = vsel %vm146_vm1, %v11222_v3, %v4546_v40  ;;  %4543 = vrot.lane.b32.xlu1 %v11222_v3, %s9203_s26  ;;  %6614 = vst.msk [vmem:[#allocation5 + $0x4] sm:$0x3] %vm771_vm3, %v11222_v3 }
 0xd79   :  { %v4574_v41 = vpack.c.bf16 %v4566_v57, %v4566_v57 }
 0xd7a   :  { %v4372_v13 = vpop.f32.mrb[152].mxu0 }
 0xd7b   :  { %v4373_v10 = vadd.f32 %v10877_v37, %v4372_v13  ;;  %v8347_v43 = vpop.f32.mrb[153].mxu0  ;;  %8430 = vmatmul.mubr.msk.bf16.vlgmr.msra.gmra.mrb[164].mxu1 %vm235_vm2, %v4574_v41  ;;  %v11300_v13 = vld [vmem:[%s12046_s2 + $0x30] sm:$0xff]  }
 0xd7c   :  { %v4375_v24 = vpop.f32.mrb[154].mxu0  ;;  %8446 = vmatpush3.bf16.msra.mxu1 %v10884_v29  ;;  %8453 = vmatprep.mubr.msk.bf16.mxu1 %vm9205_vm0, %v9204_v1 }
 0xd7d   :  { %8997 = vtanh.f32 %v4373_v10  ;;  %v8348_v2 = vpop.f32.mrb[155].mxu0  ;;  %8447 = vmatprep.subr.bf16.mxu1 %v9204_v1 }
 0xd7e   :  { %v4659_v52 = vpop.f32.mrb[160].mxu1 }
 0xd7f   :  { %v8407_v21 = vpop.f32.mrb[161].mxu1 }
 0xd80   :  { %v4662_v53 = vpop.f32.mrb[162].mxu1  ;;  %8448 = vmatpush3.bf16.msra.mxu1 %v10893_v15 }
 0xd81   :  { %v8408_v20 = vpop.f32.mrb[163].mxu1  ;;  %8449 = vmatprep.subr.bf16.mxu1 %v9204_v1  ;;  %v11354_v53 = vld [vmem:[%s12046_s2 + $0xd8] sm:$0xff]  }
 0xd84   :  { %8450 = vmatpush3.bf16.msra.mxu1 %v10900_v45 }
 0xd85   :  { %8451 = vmatprep.subr.bf16.mxu1 %v9204_v1 }
 0xd87   :  { %v8998_v55 = vpop.eup %8997  ;;  %v4550_v54 = vpop.permute.xlu0 %4549 }
 0xd88   :  { %v4568_v25 = vsel %vm146_vm1, %v8998_v55, %v4550_v54  ;;  %8452 = vmatpush3.bf16.msra.mxu1 %v10908_v22  ;;  %4547 = vrot.lane.b32.xlu0 %v8998_v55, %s9203_s26 }
 0xd89   :  { %v4576_v19 = vpack.c.bf16 %v4568_v25, %v4568_v25  ;;  %8469 = vmatprep.subr.bf16.mxu1 %v9204_v1 }
 0xd8a   :  { %v4458_v48 = vpop.f32.mrb[156].mxu0 }
 0xd8b   :  { %v4459_v35 = vadd.f32 %v11250_v11, %v4458_v48  ;;  %v4540_v30 = vpop.permute.xlu0 %4539  ;;  %v8371_v5 = vpop.f32.mrb[157].mxu0  ;;  %8454 = vmatmul.mubr.msk.bf16.vlgmr.msra.gmra.mrb[168].mxu1 %vm235_vm2, %v4576_v19 }
 0xd8c   :  { %v4563_v14 = vsel %vm146_vm1, %v6780_v38, %v4540_v30  ;;  %4957 = vrot.lane.b32.xlu0 %v11025_v36, %s9203_s26  ;;  %v4461_v63 = vpop.f32.mrb[158].mxu0  ;;  %8470 = vmatpush3.bf16.msra.mxu1 %v10918_v58 }
 0xd8d   :  { %8999 = vtanh.f32 %v4459_v35  ;;  %v4571_v18 = vpack.c.bf16 %v4563_v14, %v4563_v14  ;;  %v8372_v6 = vpop.f32.mrb[159].mxu0  ;;  %8471 = vmatprep.subr.bf16.mxu1 %v9204_v1  ;;  %8477 = vmatprep.mubr.msk.bf16.mxu1 %vm9205_vm0, %v9204_v1 }
 0xd8e   :  { %v11388_v6 = vld [vmem:[%s12047_s3 + $0x7] ss:$0 sm:$0xff] }
 0xd8f   :  { %8394 = vmatmul.mubr.msk.bf16.vlgmr.msra.gmra.mrb[160].mxu0 %vm235_vm2, %v4571_v18 }
 0xd90   :  { %8472 = vmatpush3.bf16.msra.mxu1 %v10927_v33  ;;  %8410 = vmatpush3.bf16.msra.mxu0 %v10713_v23 }
 0xd91   :  { %8473 = vmatprep.subr.bf16.mxu1 %v9204_v1  ;;  %8411 = vmatprep.subr.bf16.mxu0 %v9204_v1 }
 0xd92   :  { %8417 = vmatprep.mubr.msk.bf16.mxu0 %vm9205_vm0, %v9204_v1 }
 0xd94   :  { %8474 = vmatpush3.bf16.msra.mxu1 %v10934_v12  ;;  %8412 = vmatpush3.bf16.msra.mxu0 %v10722_v31  ;;  %v11282_v31 = vld [vmem:[%s12046_s2 + $0x20] sm:$0xff]  }
 0xd95   :  { %8475 = vmatprep.subr.bf16.mxu1 %v9204_v1  ;;  %8413 = vmatprep.subr.bf16.mxu0 %v9204_v1 }
 0xd97   :  { %v9000_v40 = vpop.eup %8999  ;;  %v4554_v57 = vpop.permute.xlu1 %4553 }
 0xd98   :  { %v4570_v41 = vsel %vm146_vm1, %v9000_v40, %v4554_v57  ;;  %8476 = vmatpush3.bf16.msra.mxu1 %v10942_v26  ;;  %4551 = vrot.lane.b32.xlu1 %v9000_v40, %s9203_s26 }
 0xd99   :  { %v4578_v23 = vpack.c.bf16 %v4570_v41, %v4570_v41  ;;  %8414 = vmatpush3.bf16.msra.mxu0 %v10729_v49  ;;  %8493 = vmatprep.subr.bf16.mxu1 %v9204_v1  ;;  %v11293_v49 = vld [vmem:[%s12046_s2 + $0x28] sm:$0xff]  }
 0xd9a   :  { %8415 = vmatprep.subr.bf16.mxu0 %v9204_v1 }
 0xd9b   :  { %8478 = vmatmul.mubr.msk.bf16.vlgmr.msra.gmra.mrb[172].mxu1 %vm235_vm2, %v4578_v23 }
 0xd9c   :  { %8494 = vmatpush3.bf16.msra.mxu1 %v11282_v31  ;;  %8501 = vmatprep.mubr.msk.bf16.mxu1 %vm9205_vm0, %v9204_v1 }
 0xd9d   :  { %8416 = vmatpush3.bf16.msra.mxu0 %v10738_v61  ;;  %8495 = vmatprep.subr.bf16.mxu1 %v9204_v1  ;;  %v11307_v61 = vld [vmem:[%s12046_s2 + $0x38] sm:$0xff]  }
 0xd9e   :  { %8433 = vmatprep.subr.bf16.mxu0 %v9204_v1 }
 0xda0   :  { %8496 = vmatpush3.bf16.msra.mxu1 %v11293_v49 }
 0xda1   :  { %8497 = vmatprep.subr.bf16.mxu1 %v9204_v1 }
 0xda4   :  { %8498 = vmatpush3.bf16.msra.mxu1 %v11300_v13 }
 0xda5   :  { %8499 = vmatprep.subr.bf16.mxu1 %v9204_v1 }
 0xda8   :  { %8500 = vmatpush3.bf16.msra.mxu1 %v11307_v61 }
 0xda9   :  { %8517 = vmatprep.subr.bf16.mxu1 %v9204_v1 }
 0xdea   :  { %v4544_v10 = vpop.permute.xlu1 %4543 }
 0xdeb   :  { %v4565_v43 = vsel %vm146_vm1, %v11025_v36, %v4544_v10 }
 0xdec   :  { %v4573_v24 = vpack.c.bf16 %v4565_v43, %v4565_v43 }
 0xdee   :  { %8418 = vmatmul.mubr.msk.bf16.vlgmr.msra.gmra.mrb[164].mxu0 %vm235_vm2, %v4573_v24 }
 0xdef   :  { %8434 = vmatpush3.bf16.msra.mxu0 %v10746_v62  ;;  %8441 = vmatprep.mubr.msk.bf16.mxu0 %vm9205_vm0, %v9204_v1 }
 0xdf0   :  { %8435 = vmatprep.subr.bf16.mxu0 %v9204_v1 }
 0xdf3   :  { %8436 = vmatpush3.bf16.msra.mxu0 %v10755_v9 }
 0xdf4   :  { %8437 = vmatprep.subr.bf16.mxu0 %v9204_v1 }
 0xdf7   :  { %8438 = vmatpush3.bf16.msra.mxu0 %v10762_v32 }
 0xdf8   :  { %8439 = vmatprep.subr.bf16.mxu0 %v9204_v1 }
 0xdfa   :  { %v4548_v2 = vpop.permute.xlu0 %4547 }
 0xdfb   :  { %v4567_v52 = vsel %vm146_vm1, %v11203_v28, %v4548_v2  ;;  %8440 = vmatpush3.bf16.msra.mxu0 %v10771_v56  ;;  %v11338_v56 = vld [vmem:[%s12046_s2 + $0x60] sm:$0xff]  }
 0xdfc   :  { %v4575_v62 = vpack.c.bf16 %v4567_v52, %v4567_v52  ;;  %8457 = vmatprep.subr.bf16.mxu0 %v9204_v1 }
 0xdfe   :  { %8442 = vmatmul.mubr.msk.bf16.vlgmr.msra.gmra.mrb[168].mxu0 %vm235_vm2, %v4575_v62  ;;  %v4958_v21 = vpop.permute.xlu0 %4957 }
 0xdff   :  { %v4980_v9 = vsel %vm146_vm1, %v10837_v7, %v4958_v21  ;;  %8458 = vmatpush3.bf16.msra.mxu0 %v10779_v17  ;;  %8465 = vmatprep.mubr.msk.bf16.mxu0 %vm9205_vm0, %v9204_v1 }
 0xe00   :  { %v4988_v32 = vpack.c.bf16 %v4980_v9, %v4980_v9  ;;  %8459 = vmatprep.subr.bf16.mxu0 %v9204_v1 }
 0xe02   :  { %8502 = vmatmul.mubr.msk.bf16.vlgmr.msra.gmra.mrb[176].mxu1 %vm235_vm2, %v4988_v32 }
 0xe03   :  { %8460 = vmatpush3.bf16.msra.mxu0 %v10996_v0  ;;  %8518 = vmatpush3.bf16.msra.mxu1 %v11338_v56 }
 0xe04   :  { %8461 = vmatprep.subr.bf16.mxu0 %v9204_v1  ;;  %8519 = vmatprep.subr.bf16.mxu1 %v9204_v1 }
 0xe05   :  { %8525 = vmatprep.mubr.msk.bf16.mxu1 %vm9205_vm0, %v9204_v1 }
 0xe07   :  { %8462 = vmatpush3.bf16.msra.mxu0 %v11003_v16  ;;  %8520 = vmatpush3.bf16.msra.mxu1 %v10854_v39 }
 0xe08   :  { %8463 = vmatprep.subr.bf16.mxu0 %v9204_v1  ;;  %8521 = vmatprep.subr.bf16.mxu1 %v9204_v1 }
 0xe0a   :  { %v4552_v17 = vpop.permute.xlu1 %4551 }
 0xe0b   :  { %v4569_v28 = vsel %vm146_vm1, %v11208_v60, %v4552_v17  ;;  %8464 = vmatpush3.bf16.msra.mxu0 %v11354_v53  ;;  %8522 = vmatpush3.bf16.msra.mxu1 %v10861_v44 }
 0xe0c   :  { %v4577_v20 = vpack.c.bf16 %v4569_v28, %v4569_v28  ;;  %8523 = vmatprep.subr.bf16.mxu1 %v9204_v1  ;;  %8481 = vmatprep.subr.bf16.mxu0 %v9204_v1 }
 0xe0e   :  { %8466 = vmatmul.mubr.msk.bf16.vlgmr.msra.gmra.mrb[172].mxu0 %vm235_vm2, %v4577_v20 }
 0xe0f   :  { %8524 = vmatpush3.bf16.msra.mxu1 %v10869_v47  ;;  %8482 = vmatpush3.bf16.msra.mxu0 %v11169_v4 }
 0xe10   :  { %8541 = vmatprep.subr.bf16.mxu1 %v9204_v1  ;;  %8483 = vmatprep.subr.bf16.mxu0 %v9204_v1 }
 0xe11   :  { %8489 = vmatprep.mubr.msk.bf16.mxu0 %vm9205_vm0, %v9204_v1 }
 0xe13   :  { %8484 = vmatpush3.bf16.msra.mxu0 %v11179_v8 }
 0xe14   :  { %8485 = vmatprep.subr.bf16.mxu0 %v9204_v1 }
 0xe17   :  { %8486 = vmatpush3.bf16.msra.mxu0 %v11186_v50 }
 0xe18   :  { %8487 = vmatprep.subr.bf16.mxu0 %v9204_v1 }
 0xe1b   :  { %8488 = vmatpush3.bf16.msra.mxu0 %v11193_v27 }
 0xe1c   :  { %8505 = vmatprep.subr.bf16.mxu0 %v9204_v1 }
 0xe4e   :  { %v4745_v39 = vpop.f32.mrb[164].mxu1 }
 0xe4f   :  { %v4746_v44 = vadd.f32 %v11200_v42, %v4745_v39  ;;  %v8431_v47 = vpop.f32.mrb[165].mxu1 }
 0xe50   :  { %v4748_v60 = vpop.f32.mrb[166].mxu1 }
 0xe51   :  { %9001 = vtanh.f32 %v4746_v44  ;;  %v8432_v55 = vpop.f32.mrb[167].mxu1 }
 0xe5b   :  { %v11374_v54 = vpop.eup %9001 }
 0xe5c   :  { %4961 = vrot.lane.b32.xlu1 %v11374_v54, %s9203_s26  ;;  %6615 = vst.msk [vmem:[#allocation5 + $0x6] sm:$0x3] %vm771_vm3, %v11374_v54 }
 0xe5e   :  { %v4831_v25 = vpop.f32.mrb[168].mxu1 }
 0xe5f   :  { %v4832_v19 = vadd.f32 %v11039_v46, %v4831_v25  ;;  %v8455_v38 = vpop.f32.mrb[169].mxu1 }
 0xe60   :  { %v4834_v48 = vpop.f32.mrb[170].mxu1 }
 0xe61   :  { %9003 = vtanh.f32 %v4832_v19  ;;  %v8456_v35 = vpop.f32.mrb[171].mxu1 }
 0xe62   :  { %v4616_v42 = vpop.f32.mrb[160].mxu0 }
 0xe63   :  { %v8395_v30 = vpop.f32.mrb[161].mxu0 }
 0xe64   :  { %v4619_v5 = vpop.f32.mrb[162].mxu0 }
 0xe65   :  { %v8396_v14 = vpop.f32.mrb[163].mxu0 }
 0xe66   :  { %v11431_v14 = vld [vmem:[%s12046_s2 + $0x40] sm:$0xff]  }
 0xe6b   :  { %v11381_v63 = vpop.eup %9003 }
 0xe6c   :  { %4965 = vrot.lane.b32.xlu0 %v11381_v63, %s9203_s26 }
 0xe6e   :  { %v4917_v18 = vpop.f32.mrb[172].mxu1 }
 0xe6f   :  { %v4918_v40 = vadd.f32 %v11388_v6, %v4917_v18  ;;  %v8479_v57 = vpop.f32.mrb[173].mxu1 }
 0xe70   :  { %4955 = vrot.lane.b32.xlu0 %v10837_v7, %s9203_s26  ;;  %v4920_v41 = vpop.f32.mrb[174].mxu1  ;;  %v11452_v57 = vld [vmem:[%s12046_s2 + $0x50] sm:$0xff]  }
 0xe71   :  { %9005 = vtanh.f32 %v4918_v40  ;;  %v8480_v23 = vpop.f32.mrb[175].mxu1 }
 0xe7b   :  { %v11393_v10 = vpop.eup %9005 }
 0xe7c   :  { %4969 = vrot.lane.b32.xlu1 %v11393_v10, %s9203_s26 }
 0xe80   :  { %4959 = vrot.lane.b32.xlu1 %v11222_v3, %s9203_s26 }
 0xec1   :  { %v4702_v43 = vpop.f32.mrb[164].mxu0 }
 0xec2   :  { %v8419_v24 = vpop.f32.mrb[165].mxu0  ;;  %v11465_v43 = vld [vmem:[%s12046_s2 + $0x58] sm:$0xff]  }
 0xec3   :  { %v4705_v2 = vpop.f32.mrb[166].mxu0  ;;  %v11479_v24 = vld [vmem:[%s12046_s2 + $0x80] sm:$0xff]  }
 0xec4   :  { %v8420_v52 = vpop.f32.mrb[167].mxu0  ;;  %v11490_v2 = vld [vmem:[%s12046_s2 + $0x88] sm:$0xff]  }
 0xec5   :  { %v11499_v52 = vld [vmem:[%s12046_s2 + $0x90] sm:$0xff]  }
 0xece   :  { %v4962_v62 = vpop.permute.xlu1 %4961 }
 0xecf   :  { %v4982_v21 = vsel %vm146_vm1, %v11222_v3, %v4962_v62  ;;  %v11508_v62 = vld [vmem:[%s12046_s2 + $0x98] sm:$0xff]  }
 0xed0   :  { %v4990_v9 = vpack.c.bf16 %v4982_v21, %v4982_v21 }
 0xed1   :  { %v4788_v32 = vpop.f32.mrb[168].mxu0 }
 0xed2   :  { %v4789_v17 = vadd.f32 %v10877_v37, %v4788_v32  ;;  %v8443_v28 = vpop.f32.mrb[169].mxu0  ;;  %8526 = vmatmul.mubr.msk.bf16.vlgmr.msra.gmra.mrb[180].mxu1 %vm235_vm2, %v4990_v9 }
 0xed3   :  { %v4791_v20 = vpop.f32.mrb[170].mxu0  ;;  %8542 = vmatpush3.bf16.msra.mxu1 %v10884_v29  ;;  %8549 = vmatprep.mubr.msk.bf16.mxu1 %vm9205_vm0, %v9204_v1 }
 0xed4   :  { %9007 = vtanh.f32 %v4789_v17  ;;  %v8444_v39 = vpop.f32.mrb[171].mxu0  ;;  %8543 = vmatprep.subr.bf16.mxu1 %v9204_v1  ;;  %v11520_v20 = vld [vmem:[%s12046_s2 + $0xc0] sm:$0xff]  }
 0xed5   :  { %v5075_v44 = vpop.f32.mrb[176].mxu1 }
 0xed6   :  { %v8503_v47 = vpop.f32.mrb[177].mxu1  ;;  %v11537_v44 = vld [vmem:[%s12046_s2 + $0x68] sm:$0xff]  }
 0xed7   :  { %v5078_v60 = vpop.f32.mrb[178].mxu1  ;;  %8544 = vmatpush3.bf16.msra.mxu1 %v10893_v15  ;;  %v6789_v15 = vld [vmem:[%s12044_s0 + $0xe] sm:$0x3]  ;;  %v11546_v47 = vld [vmem:[%s12046_s2 + $0x70] sm:$0xff]  }
 0xed8   :  { %v8504_v55 = vpop.f32.mrb[179].mxu1  ;;  %8545 = vmatprep.subr.bf16.mxu1 %v9204_v1 }
 0xedb   :  { %8546 = vmatpush3.bf16.msra.mxu1 %v10900_v45 }
 0xedc   :  { %8547 = vmatprep.subr.bf16.mxu1 %v9204_v1 }
 0xede   :  { %v9008_v37 = vpop.eup %9007  ;;  %v4966_v29 = vpop.permute.xlu0 %4965 }
 0xedf   :  { %v4984_v25 = vsel %vm146_vm1, %v9008_v37, %v4966_v29  ;;  %8548 = vmatpush3.bf16.msra.mxu1 %v10908_v22  ;;  %4963 = vrot.lane.b32.xlu0 %v9008_v37, %s9203_s26  ;;  %v11557_v37 = vld [vmem:[%s12046_s2 + $0x78] sm:$0xff]  }
 0xee0   :  { %v4992_v19 = vpack.c.bf16 %v4984_v25, %v4984_v25  ;;  %8565 = vmatprep.subr.bf16.mxu1 %v9204_v1  ;;  %v11571_v25 = vld [vmem:[%s12046_s2 + $0xa0] sm:$0xff]  }
 0xee1   :  { %v4874_v38 = vpop.f32.mrb[172].mxu0 }
 0xee2   :  { %v4875_v45 = vadd.f32 %v11250_v11, %v4874_v38  ;;  %v4956_v48 = vpop.permute.xlu0 %4955  ;;  %v8467_v35 = vpop.f32.mrb[173].mxu0  ;;  %8550 = vmatmul.mubr.msk.bf16.vlgmr.msra.gmra.mrb[184].mxu1 %vm235_vm2, %v4992_v19  ;;  %v11582_v19 = vld [vmem:[%s12046_s2 + $0xa8] sm:$0xff]   ;;  %v11600_v38 = vld [vmem:[%s12046_s2 + $0xb8] sm:$0xff]  }
 0xee3   :  { %v4979_v42 = vsel %vm146_vm1, %v6789_v15, %v4956_v48  ;;  %5373 = vrot.lane.b32.xlu0 %v11025_v36, %s9203_s26  ;;  %v4877_v22 = vpop.f32.mrb[174].mxu0  ;;  %8566 = vmatpush3.bf16.msra.mxu1 %v10918_v58  ;;  %v11442_v58 = vld [vmem:[%s12046_s2 + $0x48] sm:$0xff]   ;;  %v11591_v15 = vld [vmem:[%s12046_s2 + $0xb0] sm:$0xff]  }
 0xee4   :  { %9009 = vtanh.f32 %v4875_v45  ;;  %v4987_v30 = vpack.c.bf16 %v4979_v42, %v4979_v42  ;;  %v8468_v5 = vpop.f32.mrb[175].mxu0  ;;  %8567 = vmatprep.subr.bf16.mxu1 %v9204_v1  ;;  %8573 = vmatprep.mubr.msk.bf16.mxu1 %vm9205_vm0, %v9204_v1 }
 0xee6   :  { %8490 = vmatmul.mubr.msk.bf16.vlgmr.msra.gmra.mrb[176].mxu0 %vm235_vm2, %v4987_v30 }
 0xee7   :  { %8506 = vmatpush3.bf16.msra.mxu0 %v11431_v14  ;;  %8568 = vmatpush3.bf16.msra.mxu1 %v10927_v33 }
 0xee8   :  { %8507 = vmatprep.subr.bf16.mxu0 %v9204_v1  ;;  %8569 = vmatprep.subr.bf16.mxu1 %v9204_v1 }
 0xee9   :  { %8513 = vmatprep.mubr.msk.bf16.mxu0 %vm9205_vm0, %v9204_v1 }
 0xeeb   :  { %8508 = vmatpush3.bf16.msra.mxu0 %v11442_v58  ;;  %8570 = vmatpush3.bf16.msra.mxu1 %v10934_v12 }
 0xeec   :  { %8509 = vmatprep.subr.bf16.mxu0 %v9204_v1  ;;  %8571 = vmatprep.subr.bf16.mxu1 %v9204_v1 }
 0xeee   :  { %v9010_v33 = vpop.eup %9009  ;;  %v4970_v18 = vpop.permute.xlu1 %4969 }
 0xeef   :  { %v4986_v40 = vsel %vm146_vm1, %v9010_v33, %v4970_v18  ;;  %8510 = vmatpush3.bf16.msra.mxu0 %v11452_v57  ;;  %8572 = vmatpush3.bf16.msra.mxu1 %v10942_v26 }
 0xef0   :  { %v4994_v41 = vpack.c.bf16 %v4986_v40, %v4986_v40  ;;  %4967 = vrot.lane.b32.xlu1 %v9010_v33, %s9203_s26  ;;  %8511 = vmatprep.subr.bf16.mxu0 %v9204_v1 }
 0xef1   :  { %8589 = vmatprep.subr.bf16.mxu1 %v9204_v1 }
 0xef2   :  { %v4960_v12 = vpop.permute.xlu1 %4959  ;;  %8574 = vmatmul.mubr.msk.bf16.vlgmr.msra.gmra.mrb[188].mxu1 %vm235_vm2, %v4994_v41 }
 0xef3   :  { %v4981_v23 = vsel %vm146_vm1, %v11025_v36, %v4960_v12  ;;  %8512 = vmatpush3.bf16.msra.mxu0 %v11465_v43  ;;  %8590 = vmatpush3.bf16.msra.mxu1 %v11282_v31 }
 0xef4   :  { %v4989_v26 = vpack.c.bf16 %v4981_v23, %v4981_v23  ;;  %5377 = vrot.lane.b32.xlu1 %v11374_v54, %s9203_s26  ;;  %8529 = vmatprep.subr.bf16.mxu0 %v9204_v1 }
 0xef5   :  { %8591 = vmatprep.subr.bf16.mxu1 %v9204_v1  ;;  %8597 = vmatprep.mubr.msk.bf16.mxu1 %vm9205_vm0, %v9204_v1 }
 0xef6   :  { %8514 = vmatmul.mubr.msk.bf16.vlgmr.msra.gmra.mrb[180].mxu0 %vm235_vm2, %v4989_v26 }
 0xef7   :  { %8530 = vmatpush3.bf16.msra.mxu0 %v11479_v24  ;;  %8592 = vmatpush3.bf16.msra.mxu1 %v11293_v49 }
 0xef8   :  { %8531 = vmatprep.subr.bf16.mxu0 %v9204_v1  ;;  %8593 = vmatprep.subr.bf16.mxu1 %v9204_v1 }
 0xef9   :  { %8537 = vmatprep.mubr.msk.bf16.mxu0 %vm9205_vm0, %v9204_v1 }
 0xefb   :  { %8532 = vmatpush3.bf16.msra.mxu0 %v11490_v2  ;;  %8594 = vmatpush3.bf16.msra.mxu1 %v11300_v13 }
 0xefc   :  { %8533 = vmatprep.subr.bf16.mxu0 %v9204_v1  ;;  %8595 = vmatprep.subr.bf16.mxu1 %v9204_v1 }
 0xeff   :  { %8534 = vmatpush3.bf16.msra.mxu0 %v11499_v52  ;;  %8596 = vmatpush3.bf16.msra.mxu1 %v11307_v61 }
 0xf00   :  { %8535 = vmatprep.subr.bf16.mxu0 %v9204_v1  ;;  %8613 = vmatprep.subr.bf16.mxu1 %v9204_v1 }
 0xf03   :  { %8536 = vmatpush3.bf16.msra.mxu0 %v11508_v62 }
 0xf04   :  { %8553 = vmatprep.subr.bf16.mxu0 %v9204_v1 }
 0xf51   :  { %v4964_v21 = vpop.permute.xlu0 %4963 }
 0xf52   :  { %v4983_v9 = vsel %vm146_vm1, %v11374_v54, %v4964_v21 }
 0xf53   :  { %v4991_v32 = vpack.c.bf16 %v4983_v9, %v4983_v9 }
 0xf55   :  { %8538 = vmatmul.mubr.msk.bf16.vlgmr.msra.gmra.mrb[184].mxu0 %vm235_vm2, %v4991_v32  ;;  %v5374_v17 = vpop.permute.xlu0 %5373 }
 0xf56   :  { %v5396_v28 = vsel %vm146_vm1, %v10837_v7, %v5374_v17  ;;  %8554 = vmatpush3.bf16.msra.mxu0 %v11520_v20  ;;  %8561 = vmatprep.mubr.msk.bf16.mxu0 %vm9205_vm0, %v9204_v1 }
 0xf57   :  { %v5404_v39 = vpack.c.bf16 %v5396_v28, %v5396_v28  ;;  %8555 = vmatprep.subr.bf16.mxu0 %v9204_v1 }
 0xf59   :  { %8598 = vmatmul.mubr.msk.bf16.vlgmr.msra.gmra.mrb[192].mxu1 %vm235_vm2, %v5404_v39 }
 0xf5a   :  { %8556 = vmatpush3.bf16.msra.mxu0 %v10996_v0  ;;  %8614 = vmatpush3.bf16.msra.mxu1 %v11338_v56 }
 0xf5b   :  { %8557 = vmatprep.subr.bf16.mxu0 %v9204_v1  ;;  %8615 = vmatprep.subr.bf16.mxu1 %v9204_v1 }
 0xf5c   :  { %8621 = vmatprep.mubr.msk.bf16.mxu1 %vm9205_vm0, %v9204_v1 }
 0xf5e   :  { %8558 = vmatpush3.bf16.msra.mxu0 %v11003_v16  ;;  %8616 = vmatpush3.bf16.msra.mxu1 %v11537_v44 }
 0xf5f   :  { %8559 = vmatprep.subr.bf16.mxu0 %v9204_v1  ;;  %8617 = vmatprep.subr.bf16.mxu1 %v9204_v1 }
 0xf62   :  { %v4968_v0 = vpop.permute.xlu1 %4967  ;;  %8560 = vmatpush3.bf16.msra.mxu0 %v11354_v53  ;;  %8618 = vmatpush3.bf16.msra.mxu1 %v11546_v47 }
 0xf63   :  { %v4985_v16 = vsel %vm146_vm1, %v11381_v63, %v4968_v0  ;;  %8619 = vmatprep.subr.bf16.mxu1 %v9204_v1  ;;  %8577 = vmatprep.subr.bf16.mxu0 %v9204_v1 }
 0xf64   :  { %v4993_v60 = vpack.c.bf16 %v4985_v16, %v4985_v16 }
 0xf66   :  { %8562 = vmatmul.mubr.msk.bf16.vlgmr.msra.gmra.mrb[188].mxu0 %vm235_vm2, %v4993_v60  ;;  %v5378_v55 = vpop.permute.xlu1 %5377  ;;  %8620 = vmatpush3.bf16.msra.mxu1 %v11557_v37 }
 0xf67   :  { %v5398_v29 = vsel %vm146_vm1, %v11222_v3, %v5378_v55  ;;  %8637 = vmatprep.subr.bf16.mxu1 %v9204_v1  ;;  %8578 = vmatpush3.bf16.msra.mxu0 %v11169_v4 }
 0xf68   :  { %v5406_v63 = vpack.c.bf16 %v5398_v29, %v5398_v29  ;;  %8579 = vmatprep.subr.bf16.mxu0 %v9204_v1  ;;  %8585 = vmatprep.mubr.msk.bf16.mxu0 %vm9205_vm0, %v9204_v1  ;;  %v9140_v29 = vld [vmem:[%s12047_s3 + $0x4] ss:$0 sm:$0xff] }
 0xf6a   :  { %8622 = vmatmul.mubr.msk.bf16.vlgmr.msra.gmra.mrb[196].mxu1 %vm235_vm2, %v5406_v63 }
 0xf6b   :  { %8638 = vmatpush3.bf16.msra.mxu1 %v11571_v25  ;;  %8580 = vmatpush3.bf16.msra.mxu0 %v11179_v8 }
 0xf6c   :  { %8639 = vmatprep.subr.bf16.mxu1 %v9204_v1  ;;  %8581 = vmatprep.subr.bf16.mxu0 %v9204_v1 }
 0xf6d   :  { %8645 = vmatprep.mubr.msk.bf16.mxu1 %vm9205_vm0, %v9204_v1 }
 0xf6f   :  { %8640 = vmatpush3.bf16.msra.mxu1 %v11582_v19  ;;  %8582 = vmatpush3.bf16.msra.mxu0 %v11186_v50 }
 0xf70   :  { %8641 = vmatprep.subr.bf16.mxu1 %v9204_v1  ;;  %8583 = vmatprep.subr.bf16.mxu0 %v9204_v1 }
 0xf73   :  { %8642 = vmatpush3.bf16.msra.mxu1 %v11591_v15  ;;  %8584 = vmatpush3.bf16.msra.mxu0 %v11193_v27 }
 0xf74   :  { %8643 = vmatprep.subr.bf16.mxu1 %v9204_v1  ;;  %8601 = vmatprep.subr.bf16.mxu0 %v9204_v1 }
 0xf77   :  { %8644 = vmatpush3.bf16.msra.mxu1 %v11600_v38 }
 0xf78   :  { %8661 = vmatprep.subr.bf16.mxu1 %v9204_v1 }
 0xfa5   :  { %v5161_v45 = vpop.f32.mrb[180].mxu1 }
 0xfa6   :  { %v8527_v48 = vpop.f32.mrb[181].mxu1 }
 0xfa7   :  { %v5164_v35 = vpop.f32.mrb[182].mxu1 }
 0xfa8   :  { %v8528_v42 = vpop.f32.mrb[183].mxu1 }
 0xfb5   :  { %v5247_v22 = vpop.f32.mrb[184].mxu1 }
 0xfb6   :  { %v5248_v30 = vadd.f32 %v11039_v46, %v5247_v22  ;;  %v8551_v5 = vpop.f32.mrb[185].mxu1 }
 0xfb7   :  { %v5250_v33 = vpop.f32.mrb[186].mxu1 }
 0xfb8   :  { %9011 = vtanh.f32 %v5248_v30  ;;  %v8552_v18 = vpop.f32.mrb[187].mxu1 }
 0xfb9   :  { %v5032_v40 = vpop.f32.mrb[176].mxu0 }
 0xfba   :  { %v8491_v41 = vpop.f32.mrb[177].mxu0 }
 0xfbb   :  { %v5035_v12 = vpop.f32.mrb[178].mxu0 }
 0xfbc   :  { %v8492_v23 = vpop.f32.mrb[179].mxu0  ;;  %v6798_v12 = vld [vmem:[%s12044_s0 + $0xe] sm:$0x3] }
 0xfc2   :  { %v11605_v26 = vpop.eup %9011 }
 0xfc3   :  { %5381 = vrot.lane.b32.xlu0 %v11605_v26, %s9203_s26 }
 0xfc5   :  { %v5333_v21 = vpop.f32.mrb[188].mxu1 }
 0xfc6   :  { %v5334_v9 = vadd.f32 %v11388_v6, %v5333_v21  ;;  %v8575_v32 = vpop.f32.mrb[189].mxu1 }
 0xfc7   :  { %5371 = vrot.lane.b32.xlu0 %v10837_v7, %s9203_s26  ;;  %v5336_v46 = vpop.f32.mrb[190].mxu1 }
 0xfc8   :  { %9013 = vtanh.f32 %v5334_v9  ;;  %v8576_v17 = vpop.f32.mrb[191].mxu1 }
 0xfc9   :  { %v5118_v28 = vpop.f32.mrb[180].mxu0  ;;  %v11640_v17 = vld [vmem:[%s12046_s2 + $0xe0] sm:$0xff]  }
 0xfca   :  { %v8515_v39 = vpop.f32.mrb[181].mxu0 }
 0xfcb   :  { %v5121_v0 = vpop.f32.mrb[182].mxu0 }
 0xfcc   :  { %v8516_v16 = vpop.f32.mrb[183].mxu0 }
 0xfd2   :  { %v11612_v60 = vpop.eup %9013 }
 0xfd3   :  { %5385 = vrot.lane.b32.xlu1 %v11612_v60, %s9203_s26 }
 0xfd7   :  { %5375 = vrot.lane.b32.xlu1 %v11222_v3, %s9203_s26 }
0x1028   :  { %v5204_v55 = vpop.f32.mrb[184].mxu0 }
0x1029   :  { %v5205_v63 = vadd.f32 %v9140_v29, %v5204_v55  ;;  %v8539_v45 = vpop.f32.mrb[185].mxu0  ;;  %v11651_v29 = vld [vmem:[%s12046_s2 + $0xe8] sm:$0xff]  }
0x102a   :  { %v5207_v48 = vpop.f32.mrb[186].mxu0 }
0x102b   :  { %9015 = vtanh.f32 %v5205_v63  ;;  %v8540_v35 = vpop.f32.mrb[187].mxu0  ;;  %v11662_v48 = vld [vmem:[%s12046_s2 + $0xf0] sm:$0xff]  }
0x102c   :  { %v5491_v42 = vpop.f32.mrb[192].mxu1 }
0x102d   :  { %v8599_v22 = vpop.f32.mrb[193].mxu1 }
0x102e   :  { %v5494_v30 = vpop.f32.mrb[194].mxu1  ;;  %v11671_v22 = vld [vmem:[%s12046_s2 + $0xf8] sm:$0xff]  }
0x102f   :  { %v8600_v5 = vpop.f32.mrb[195].mxu1 }
0x1035   :  { %v11621_v33 = vpop.eup %9015  ;;  %v5382_v18 = vpop.permute.xlu0 %5381 }
0x1036   :  { %v5400_v40 = vsel %vm146_vm1, %v11621_v33, %v5382_v18  ;;  %5379 = vrot.lane.b32.xlu0 %v11621_v33, %s9203_s26  ;;  %6616 = vst.msk [vmem:[#allocation5 + $0x8] sm:$0x3] %vm771_vm3, %v11621_v33 }
0x1037   :  { %v5408_v41 = vpack.c.bf16 %v5400_v40, %v5400_v40 }
0x1039   :  { %v5290_v23 = vpop.f32.mrb[188].mxu0  ;;  %v5372_v21 = vpop.permute.xlu0 %5371  ;;  %8646 = vmatmul.mubr.msk.bf16.vlgmr.msra.gmra.mrb[200].mxu1 %vm235_vm2, %v5408_v41 }
0x103a   :  { %v5291_v9 = vadd.f32 %v11250_v11, %v5290_v23  ;;  %v5395_v32 = vsel %vm146_vm1, %v6798_v12, %v5372_v21  ;;  %v8563_v46 = vpop.f32.mrb[189].mxu0  ;;  %5789 = vrot.lane.b32.xlu0 %v11025_v36, %s9203_s26  ;;  %8662 = vmatpush3.bf16.msra.mxu1 %v11640_v17 }
0x103b   :  { %v5403_v28 = vpack.c.bf16 %v5395_v32, %v5395_v32  ;;  %v5293_v39 = vpop.f32.mrb[190].mxu0  ;;  %8663 = vmatprep.subr.bf16.mxu1 %v9204_v1  ;;  %8669 = vmatprep.mubr.msk.bf16.mxu1 %vm9205_vm0, %v9204_v1 }
0x103c   :  { %9017 = vtanh.f32 %v5291_v9  ;;  %v8564_v0 = vpop.f32.mrb[191].mxu0  ;;  %v11730_v39 = vld [vmem:[%s12046_s2 + $0xd0] sm:$0xff]  }
0x103d   :  { %v5577_v16 = vpop.f32.mrb[196].mxu1  ;;  %8586 = vmatmul.mubr.msk.bf16.vlgmr.msra.gmra.mrb[192].mxu0 %vm235_vm2, %v5403_v28  ;;  %v11719_v28 = vld [vmem:[%s12046_s2 + $0xc8] sm:$0xff]  }
0x103e   :  { %v8623_v55 = vpop.f32.mrb[197].mxu1  ;;  %8602 = vmatpush3.bf16.msra.mxu0 %v11431_v14  ;;  %8664 = vmatpush3.bf16.msra.mxu1 %v11651_v29 }
0x103f   :  { %v5580_v63 = vpop.f32.mrb[198].mxu1  ;;  %8603 = vmatprep.subr.bf16.mxu0 %v9204_v1  ;;  %8665 = vmatprep.subr.bf16.mxu1 %v9204_v1 }
0x1040   :  { %v8624_v45 = vpop.f32.mrb[199].mxu1  ;;  %8609 = vmatprep.mubr.msk.bf16.mxu0 %vm9205_vm0, %v9204_v1 }
0x1042   :  { %8604 = vmatpush3.bf16.msra.mxu0 %v11442_v58  ;;  %8666 = vmatpush3.bf16.msra.mxu1 %v11662_v48 }
0x1043   :  { %8605 = vmatprep.subr.bf16.mxu0 %v9204_v1  ;;  %8667 = vmatprep.subr.bf16.mxu1 %v9204_v1 }
0x1045   :  { %v5386_v35 = vpop.permute.xlu1 %5385 }
0x1046   :  { %v9018_v42 = vpop.eup %9017  ;;  %8606 = vmatpush3.bf16.msra.mxu0 %v11452_v57  ;;  %8668 = vmatpush3.bf16.msra.mxu1 %v11671_v22 }
0x1047   :  { %v5402_v30 = vsel %vm146_vm1, %v9018_v42, %v5386_v35  ;;  %5383 = vrot.lane.b32.xlu1 %v9018_v42, %s9203_s26  ;;  %8607 = vmatprep.subr.bf16.mxu0 %v9204_v1 }
0x1048   :  { %v5410_v5 = vpack.c.bf16 %v5402_v30, %v5402_v30  ;;  %8685 = vmatprep.subr.bf16.mxu1 %v9204_v1 }
0x1049   :  { %v5376_v18 = vpop.permute.xlu1 %5375 }
0x104a   :  { %v5397_v40 = vsel %vm146_vm1, %v11025_v36, %v5376_v18  ;;  %8670 = vmatmul.mubr.msk.bf16.vlgmr.msra.gmra.mrb[204].mxu1 %vm235_vm2, %v5410_v5  ;;  %8608 = vmatpush3.bf16.msra.mxu0 %v11465_v43 }
0x104b   :  { %v5405_v41 = vpack.c.bf16 %v5397_v40, %v5397_v40  ;;  %5793 = vrot.lane.b32.xlu1 %v11374_v54, %s9203_s26  ;;  %8625 = vmatprep.subr.bf16.mxu0 %v9204_v1 }
0x104c   :  { %8686 = vmatpush3.bf16.msra.mxu1 %v11282_v31  ;;  %8693 = vmatprep.mubr.msk.bf16.mxu1 %vm9205_vm0, %v9204_v1 }
0x104d   :  { %8610 = vmatmul.mubr.msk.bf16.vlgmr.msra.gmra.mrb[196].mxu0 %vm235_vm2, %v5405_v41  ;;  %8687 = vmatprep.subr.bf16.mxu1 %v9204_v1 }
0x104e   :  { %8626 = vmatpush3.bf16.msra.mxu0 %v11479_v24  ;;  %8633 = vmatprep.mubr.msk.bf16.mxu0 %vm9205_vm0, %v9204_v1 }
0x104f   :  { %8627 = vmatprep.subr.bf16.mxu0 %v9204_v1 }
0x1050   :  { %8688 = vmatpush3.bf16.msra.mxu1 %v11293_v49 }
0x1051   :  { %8689 = vmatprep.subr.bf16.mxu1 %v9204_v1 }
0x1052   :  { %8628 = vmatpush3.bf16.msra.mxu0 %v11490_v2 }
0x1053   :  { %8629 = vmatprep.subr.bf16.mxu0 %v9204_v1 }
0x1054   :  { %8690 = vmatpush3.bf16.msra.mxu1 %v11300_v13 }
0x1055   :  { %8691 = vmatprep.subr.bf16.mxu1 %v9204_v1 }
0x1056   :  { %8630 = vmatpush3.bf16.msra.mxu0 %v11499_v52 }
0x1057   :  { %8631 = vmatprep.subr.bf16.mxu0 %v9204_v1 }
0x1058   :  { %8692 = vmatpush3.bf16.msra.mxu1 %v11307_v61 }
0x1059   :  { %8709 = vmatprep.subr.bf16.mxu1 %v9204_v1 }
0x105a   :  { %8632 = vmatpush3.bf16.msra.mxu0 %v11508_v62 }
0x105b   :  { %8649 = vmatprep.subr.bf16.mxu0 %v9204_v1 }
0x10a8   :  { %v5380_v12 = vpop.permute.xlu0 %5379 }
0x10a9   :  { %v5399_v23 = vsel %vm146_vm1, %v11374_v54, %v5380_v12 }
0x10aa   :  { %v5407_v21 = vpack.c.bf16 %v5399_v23, %v5399_v23 }
0x10ac   :  { %8634 = vmatmul.mubr.msk.bf16.vlgmr.msra.gmra.mrb[200].mxu0 %vm235_vm2, %v5407_v21  ;;  %v5790_v9 = vpop.permute.xlu0 %5789 }
0x10ad   :  { %v5812_v32 = vsel %vm146_vm1, %v10837_v7, %v5790_v9  ;;  %8650 = vmatpush3.bf16.msra.mxu0 %v11520_v20  ;;  %8657 = vmatprep.mubr.msk.bf16.mxu0 %vm9205_vm0, %v9204_v1 }
0x10ae   :  { %v5820_v46 = vpack.c.bf16 %v5812_v32, %v5812_v32  ;;  %8651 = vmatprep.subr.bf16.mxu0 %v9204_v1 }
0x10b0   :  { %8694 = vmatmul.mubr.msk.bf16.vlgmr.msra.gmra.mrb[208].mxu1 %vm235_vm2, %v5820_v46 }
0x10b1   :  { %8652 = vmatpush3.bf16.msra.mxu0 %v11719_v28  ;;  %8710 = vmatpush3.bf16.msra.mxu1 %v11338_v56 }
0x10b2   :  { %8653 = vmatprep.subr.bf16.mxu0 %v9204_v1  ;;  %8711 = vmatprep.subr.bf16.mxu1 %v9204_v1 }
0x10b3   :  { %8717 = vmatprep.mubr.msk.bf16.mxu1 %vm9205_vm0, %v9204_v1 }
0x10b5   :  { %8654 = vmatpush3.bf16.msra.mxu0 %v11730_v39  ;;  %8712 = vmatpush3.bf16.msra.mxu1 %v11537_v44 }
0x10b6   :  { %8655 = vmatprep.subr.bf16.mxu0 %v9204_v1  ;;  %8713 = vmatprep.subr.bf16.mxu1 %v9204_v1 }
0x10b9   :  { %v5384_v0 = vpop.permute.xlu1 %5383  ;;  %8656 = vmatpush3.bf16.msra.mxu0 %v11354_v53  ;;  %8714 = vmatpush3.bf16.msra.mxu1 %v11546_v47 }
0x10ba   :  { %v5401_v16 = vsel %vm146_vm1, %v11605_v26, %v5384_v0  ;;  %8715 = vmatprep.subr.bf16.mxu1 %v9204_v1  ;;  %8673 = vmatprep.subr.bf16.mxu0 %v9204_v1 }
0x10bb   :  { %v5409_v55 = vpack.c.bf16 %v5401_v16, %v5401_v16 }
0x10bd   :  { %8658 = vmatmul.mubr.msk.bf16.vlgmr.msra.gmra.mrb[204].mxu0 %vm235_vm2, %v5409_v55  ;;  %v5794_v63 = vpop.permute.xlu1 %5793  ;;  %8716 = vmatpush3.bf16.msra.mxu1 %v11557_v37 }
0x10be   :  { %v5814_v45 = vsel %vm146_vm1, %v11222_v3, %v5794_v63  ;;  %8733 = vmatprep.subr.bf16.mxu1 %v9204_v1  ;;  %8674 = vmatpush3.bf16.msra.mxu0 %v11169_v4 }
0x10bf   :  { %v5822_v35 = vpack.c.bf16 %v5814_v45, %v5814_v45  ;;  %8675 = vmatprep.subr.bf16.mxu0 %v9204_v1  ;;  %8681 = vmatprep.mubr.msk.bf16.mxu0 %vm9205_vm0, %v9204_v1 }
0x10c1   :  { %8718 = vmatmul.mubr.msk.bf16.vlgmr.msra.gmra.mrb[212].mxu1 %vm235_vm2, %v5822_v35 }
0x10c2   :  { %8734 = vmatpush3.bf16.msra.mxu1 %v11571_v25  ;;  %8676 = vmatpush3.bf16.msra.mxu0 %v11179_v8  ;;  %v9147_v8 = vld [vmem:[%s12047_s3 + $0x5] ss:$0 sm:$0xff] }
0x10c3   :  { %8735 = vmatprep.subr.bf16.mxu1 %v9204_v1  ;;  %8677 = vmatprep.subr.bf16.mxu0 %v9204_v1 }
0x10c4   :  { %8741 = vmatprep.mubr.msk.bf16.mxu1 %vm9205_vm0, %v9204_v1 }
0x10c6   :  { %8736 = vmatpush3.bf16.msra.mxu1 %v11582_v19  ;;  %8678 = vmatpush3.bf16.msra.mxu0 %v11186_v50 }
0x10c7   :  { %8737 = vmatprep.subr.bf16.mxu1 %v9204_v1  ;;  %8679 = vmatprep.subr.bf16.mxu0 %v9204_v1 }
0x10ca   :  { %8738 = vmatpush3.bf16.msra.mxu1 %v11591_v15  ;;  %8680 = vmatpush3.bf16.msra.mxu0 %v11193_v27 }
0x10cb   :  { %8739 = vmatprep.subr.bf16.mxu1 %v9204_v1  ;;  %8697 = vmatprep.subr.bf16.mxu0 %v9204_v1 }
0x10ce   :  { %8740 = vmatpush3.bf16.msra.mxu1 %v11600_v38 }
0x10cf   :  { %8757 = vmatprep.subr.bf16.mxu1 %v9204_v1 }
0x110c   :  { %v5663_v4 = vpop.f32.mrb[200].mxu1 }
0x110d   :  { %v5664_v50 = vadd.f32 %v9147_v8, %v5663_v4  ;;  %v8647_v26 = vpop.f32.mrb[201].mxu1 }
0x110e   :  { %v5666_v42 = vpop.f32.mrb[202].mxu1 }
0x110f   :  { %9019 = vtanh.f32 %v5664_v50  ;;  %v8648_v30 = vpop.f32.mrb[203].mxu1 }
0x1110   :  { %v5448_v5 = vpop.f32.mrb[192].mxu0 }
0x1111   :  { %v8587_v27 = vpop.f32.mrb[193].mxu0 }
0x1112   :  { %v5451_v18 = vpop.f32.mrb[194].mxu0 }
0x1113   :  { %v8588_v40 = vpop.f32.mrb[195].mxu0 }
0x1119   :  { %v11771_v41 = vpop.eup %9019 }
0x111a   :  { %5797 = vrot.lane.b32.xlu0 %v11771_v41, %s9203_s26  ;;  %6617 = vst.msk [vmem:[#allocation5 + $0xa] sm:$0x3] %vm771_vm3, %v11771_v41 }
0x111d   :  { %v5749_v12 = vpop.f32.mrb[204].mxu1 }
0x111e   :  { %v5750_v23 = vadd.f32 %v11388_v6, %v5749_v12  ;;  %v8671_v21 = vpop.f32.mrb[205].mxu1  ;;  %5787 = vrot.lane.b32.xlu0 %v10837_v7, %s9203_s26  ;;  %v11796_v6 = vld [vmem:[%s12048_s4] ss:$0 sm:$0xff] }
0x111f   :  { %v5752_v9 = vpop.f32.mrb[206].mxu1  ;;  %v3691_v45 = vmul.f32 %v10830_v59, %v11796_v6  ;;  %v4523_v4 = vmul.f32 %v11215_v51, %v11796_v6  ;;  %v4939_v50 = vmul.f32 %v11393_v10, %v11796_v6 }
0x1120   :  { %9021 = vtanh.f32 %v5750_v23  ;;  %v8672_v32 = vpop.f32.mrb[207].mxu1  ;;  %v5534_v46 = vpop.f32.mrb[196].mxu0 }
0x1121   :  { %v8611_v0 = vpop.f32.mrb[197].mxu0  ;;  %v3692_v35 = vsel %vm771_vm3, %v3691_v45, 0.0  ;;  %v4524_v8 = vsel %vm771_vm3, %v4523_v4, 0.0  ;;  %v4940_v26 = vsel %vm771_vm3, %v4939_v50, 0.0  ;;  %v6807_v32 = vld [vmem:[%s12044_s0 + $0xe] sm:$0x3] }
0x1122   :  { %5795 = vrot.lane.b32.xlu0 %v11621_v33, %s9203_s26  ;;  %v5537_v16 = vpop.f32.mrb[198].mxu0 }
0x1123   :  { %v8612_v55 = vpop.f32.mrb[199].mxu0 }
0x1126   :  { %6205 = vrot.lane.b32.xlu0 %v11025_v36, %s9203_s26 }
0x112a   :  { %v9022_v63 = vpop.eup %9021  ;;  %6213 = vrot.lane.b32.xlu0 %v11771_v41, %s9203_s26 }
0x112b   :  { %5801 = vrot.lane.b32.xlu1 %v9022_v63, %s9203_s26  ;;  %v5771_v42 = vmul.f32 %v9022_v63, %v11796_v6 }
0x112d   :  { %v5772_v30 = vsel %vm771_vm3, %v5771_v42, 0.0 }
0x112e   :  { %6203 = vrot.lane.b32.xlu0 %v10837_v7, %s9203_s26 }
0x112f   :  { %5791 = vrot.lane.b32.xlu1 %v11222_v3, %s9203_s26 }
0x1132   :  { %6211 = vrot.lane.b32.xlu0 %v11621_v33, %s9203_s26 }
0x1151   :  { %3693 = vadd.xlane.f32.xlu0 %v3692_v35 }
0x1155   :  { %4525 = vadd.xlane.f32.xlu0 %v4524_v8 }
0x1159   :  { %4941 = vadd.xlane.f32.xlu0 %v4940_v26 }
0x115d   :  { %5773 = vadd.xlane.f32.xlu0 %v5772_v30 }
0x117f   :  { %v5620_v59 = vpop.f32.mrb[200].mxu0 }
0x1180   :  { %v8635_v5 = vpop.f32.mrb[201].mxu0 }
0x1181   :  { %v5623_v27 = vpop.f32.mrb[202].mxu0 }
0x1182   :  { %v8636_v18 = vpop.f32.mrb[203].mxu0 }
0x1183   :  { %v5907_v51 = vpop.f32.mrb[208].mxu1 }
0x1184   :  { %v8695_v40 = vpop.f32.mrb[209].mxu1 }
0x1185   :  { %v5910_v12 = vpop.f32.mrb[210].mxu1 }
0x1186   :  { %v8696_v23 = vpop.f32.mrb[211].mxu1 }
0x118c   :  { %v5798_v21 = vpop.permute.xlu0 %5797 }
0x118d   :  { %v5816_v10 = vsel %vm146_vm1, %v11621_v33, %v5798_v21 }
0x118e   :  { %v5824_v9 = vpack.c.bf16 %v5816_v10, %v5816_v10  ;;  %v9149_v10 = vld [vmem:[%s12046_s2 + $0x8] sm:$0xff]  }
0x1190   :  { %v5706_v46 = vpop.f32.mrb[204].mxu0  ;;  %v5788_v0 = vpop.permute.xlu0 %5787  ;;  %8742 = vmatmul.mubr.msk.bf16.vlgmr.msra.gmra.mrb[216].mxu1 %vm235_vm2, %v5824_v9  ;;  %v6816_v9 = vld [vmem:[%s12044_s0 + $0xe] sm:$0x3] }
0x1191   :  { %v5707_v16 = vadd.f32 %v11250_v11, %v5706_v46  ;;  %v5811_v55 = vsel %vm146_vm1, %v6807_v32, %v5788_v0  ;;  %v8659_v63 = vpop.f32.mrb[205].mxu0  ;;  %8758 = vmatpush3.bf16.msra.mxu1 %v11640_v17  ;;  %8765 = vmatprep.mubr.msk.bf16.mxu1 %vm9205_vm0, %v9204_v1  ;;  %v9150_v46 = vld [vmem:[%s12046_s2 + $0x10] sm:$0xff]   ;;  %v9151_v0 = vld [vmem:[%s12046_s2 + $0x18] sm:$0xff]  }
0x1192   :  { %v5819_v45 = vpack.c.bf16 %v5811_v55, %v5811_v55  ;;  %v5709_v35 = vpop.f32.mrb[206].mxu0  ;;  %8759 = vmatprep.subr.bf16.mxu1 %v9204_v1 }
0x1193   :  { %9023 = vtanh.f32 %v5707_v16  ;;  %v8660_v4 = vpop.f32.mrb[207].mxu0 }
0x1194   :  { %v5993_v8 = vpop.f32.mrb[212].mxu1  ;;  %8682 = vmatmul.mubr.msk.bf16.vlgmr.msra.gmra.mrb[208].mxu0 %vm235_vm2, %v5819_v45  ;;  %v5796_v51 = vpop.permute.xlu0 %5795 }
0x1195   :  { %8698 = vmatpush3.bf16.msra.mxu0 %v11431_v14  ;;  %v8719_v11 = vpop.f32.mrb[213].mxu1  ;;  %8760 = vmatpush3.bf16.msra.mxu1 %v11651_v29  ;;  %v5815_v23 = vsel %vm146_vm1, %v11374_v54, %v5796_v51 }
0x1196   :  { %v5996_v50 = vpop.f32.mrb[214].mxu1  ;;  %8699 = vmatprep.subr.bf16.mxu0 %v9204_v1  ;;  %8761 = vmatprep.subr.bf16.mxu1 %v9204_v1 }
0x1197   :  { %v8720_v26 = vpop.f32.mrb[215].mxu1  ;;  %8705 = vmatprep.mubr.msk.bf16.mxu0 %vm9205_vm0, %v9204_v1 }
0x1199   :  { %8700 = vmatpush3.bf16.msra.mxu0 %v11442_v58  ;;  %8762 = vmatpush3.bf16.msra.mxu1 %v11662_v48 }
0x119a   :  { %8701 = vmatprep.subr.bf16.mxu0 %v9204_v1  ;;  %8763 = vmatprep.subr.bf16.mxu1 %v9204_v1 }
0x119d   :  { %v9024_v42 = vpop.eup %9023  ;;  %8702 = vmatpush3.bf16.msra.mxu0 %v11452_v57  ;;  %8764 = vmatpush3.bf16.msra.mxu1 %v11671_v22  ;;  %v5802_v30 = vpop.permute.xlu1 %5801 }
0x119e   :  { %v5818_v59 = vsel %vm146_vm1, %v9024_v42, %v5802_v30  ;;  %5799 = vrot.lane.b32.xlu1 %v9024_v42, %s9203_s26  ;;  %8703 = vmatprep.subr.bf16.mxu0 %v9204_v1 }
0x119f   :  { %v5826_v5 = vpack.c.bf16 %v5818_v59, %v5818_v59  ;;  %8781 = vmatprep.subr.bf16.mxu1 %v9204_v1 }
0x11a1   :  { %8704 = vmatpush3.bf16.msra.mxu0 %v11465_v43  ;;  %v5792_v27 = vpop.permute.xlu1 %5791  ;;  %8766 = vmatmul.mubr.msk.bf16.vlgmr.msra.gmra.mrb[220].mxu1 %vm235_vm2, %v5826_v5 }
0x11a2   :  { %v5813_v18 = vsel %vm146_vm1, %v11025_v36, %v5792_v27  ;;  %8782 = vmatpush3.bf16.msra.mxu1 %v11282_v31  ;;  %6209 = vrot.lane.b32.xlu1 %v11374_v54, %s9203_s26  ;;  %v6206_v31 = vpop.permute.xlu0 %6205 }
0x11a3   :  { %v5821_v40 = vpack.c.bf16 %v5813_v18, %v5813_v18  ;;  %8721 = vmatprep.subr.bf16.mxu0 %v9204_v1  ;;  %8783 = vmatprep.subr.bf16.mxu1 %v9204_v1  ;;  %v6228_v12 = vsel %vm146_vm1, %v10837_v7, %v6206_v31 }
0x11a4   :  { %8789 = vmatprep.mubr.msk.bf16.mxu1 %vm9205_vm0, %v9204_v1 }
0x11a5   :  { %8706 = vmatmul.mubr.msk.bf16.vlgmr.msra.gmra.mrb[212].mxu0 %vm235_vm2, %v5821_v40 }
0x11a6   :  { %8722 = vmatpush3.bf16.msra.mxu0 %v11479_v24  ;;  %8784 = vmatpush3.bf16.msra.mxu1 %v11293_v49  ;;  %v6236_v49 = vpack.c.bf16 %v6228_v12, %v6228_v12  ;;  %v9153_v12 = vld [vmem:[%s12047_s3 + $0x6] ss:$0 sm:$0xff] }
0x11a7   :  { %8723 = vmatprep.subr.bf16.mxu0 %v9204_v1  ;;  %8785 = vmatprep.subr.bf16.mxu1 %v9204_v1 }
0x11a8   :  { %8729 = vmatprep.mubr.msk.bf16.mxu0 %vm9205_vm0, %v9204_v1 }
0x11aa   :  { %8724 = vmatpush3.bf16.msra.mxu0 %v11490_v2  ;;  %8786 = vmatpush3.bf16.msra.mxu1 %v11300_v13  ;;  %v5823_v13 = vpack.c.bf16 %v5815_v23, %v5815_v23 }
0x11ab   :  { %8725 = vmatprep.subr.bf16.mxu0 %v9204_v1  ;;  %8787 = vmatprep.subr.bf16.mxu1 %v9204_v1 }
0x11ae   :  { %8726 = vmatpush3.bf16.msra.mxu0 %v11499_v52  ;;  %8788 = vmatpush3.bf16.msra.mxu1 %v11307_v61 }
0x11af   :  { %8727 = vmatprep.subr.bf16.mxu0 %v9204_v1  ;;  %8805 = vmatprep.subr.bf16.mxu1 %v9204_v1 }
0x11b1   :  { %8790 = vmatmul.mubr.msk.bf16.vlgmr.msra.gmra.mrb[224].mxu1 %vm235_vm2, %v6236_v49 }
0x11b2   :  { %8728 = vmatpush3.bf16.msra.mxu0 %v11508_v62  ;;  %8806 = vmatpush3.bf16.msra.mxu1 %v11338_v56 }
0x11b3   :  { %8745 = vmatprep.subr.bf16.mxu0 %v9204_v1  ;;  %8807 = vmatprep.subr.bf16.mxu1 %v9204_v1 }
0x11b4   :  { %8813 = vmatprep.mubr.msk.bf16.mxu1 %vm9205_vm0, %v9204_v1 }
0x11b5   :  { %8730 = vmatmul.mubr.msk.bf16.vlgmr.msra.gmra.mrb[216].mxu0 %vm235_vm2, %v5823_v13 }
0x11b6   :  { %8746 = vmatpush3.bf16.msra.mxu0 %v11520_v20  ;;  %8808 = vmatpush3.bf16.msra.mxu1 %v11537_v44 }
0x11b7   :  { %8747 = vmatprep.subr.bf16.mxu0 %v9204_v1  ;;  %8809 = vmatprep.subr.bf16.mxu1 %v9204_v1 }
0x11b8   :  { %8753 = vmatprep.mubr.msk.bf16.mxu0 %vm9205_vm0, %v9204_v1 }
0x11ba   :  { %8748 = vmatpush3.bf16.msra.mxu0 %v11719_v28  ;;  %8810 = vmatpush3.bf16.msra.mxu1 %v11546_v47  ;;  %v9148_v47 = vld [vmem:[%s12046_s2] sm:$0xff]  }
0x11bb   :  { %8749 = vmatprep.subr.bf16.mxu0 %v9204_v1  ;;  %8811 = vmatprep.subr.bf16.mxu1 %v9204_v1 }
0x11be   :  { %8750 = vmatpush3.bf16.msra.mxu0 %v11730_v39  ;;  %8812 = vmatpush3.bf16.msra.mxu1 %v11557_v37 }
0x11bf   :  { %8751 = vmatprep.subr.bf16.mxu0 %v9204_v1  ;;  %8829 = vmatprep.subr.bf16.mxu1 %v9204_v1 }
0x11c2   :  { %8752 = vmatpush3.bf16.msra.mxu0 %v11354_v53  ;;  %v6214_v53 = vpop.permute.xlu0 %6213 }
0x11c3   :  { %8769 = vmatprep.subr.bf16.mxu0 %v9204_v1 }
0x11c6   :  { %v6204_v32 = vpop.permute.xlu0 %6203 }
0x1210   :  { %v5800_v7 = vpop.permute.xlu1 %5799 }
0x1211   :  { %v5817_v61 = vsel %vm146_vm1, %v11771_v41, %v5800_v7 }
0x1212   :  { %v5825_v56 = vpack.c.bf16 %v5817_v61, %v5817_v61 }
0x1214   :  { %8754 = vmatmul.mubr.msk.bf16.vlgmr.msra.gmra.mrb[220].mxu0 %vm235_vm2, %v5825_v56  ;;  %v6210_v44 = vpop.permute.xlu1 %6209 }
0x1215   :  { %8770 = vmatpush3.bf16.msra.mxu0 %v9148_v47  ;;  %v6230_v37 = vsel %vm146_vm1, %v11222_v3, %v6210_v44  ;;  %8777 = vmatprep.mubr.msk.bf16.mxu0 %vm9205_vm0, %v9204_v1 }
0x1216   :  { %v6238_v21 = vpack.c.bf16 %v6230_v37, %v6230_v37  ;;  %8771 = vmatprep.subr.bf16.mxu0 %v9204_v1 }
0x1218   :  { %8814 = vmatmul.mubr.msk.bf16.vlgmr.msra.gmra.mrb[228].mxu1 %vm235_vm2, %v6238_v21 }
0x1219   :  { %8772 = vmatpush3.bf16.msra.mxu0 %v9149_v10  ;;  %8830 = vmatpush3.bf16.msra.mxu1 %v11571_v25  ;;  %v6227_v25 = vsel %vm146_vm1, %v6816_v9, %v6204_v32 }
0x121a   :  { %8773 = vmatprep.subr.bf16.mxu0 %v9204_v1  ;;  %8831 = vmatprep.subr.bf16.mxu1 %v9204_v1  ;;  %v6235_v16 = vpack.c.bf16 %v6227_v25, %v6227_v25 }
0x121b   :  { %8837 = vmatprep.mubr.msk.bf16.mxu1 %vm9205_vm0, %v9204_v1 }
0x121d   :  { %8774 = vmatpush3.bf16.msra.mxu0 %v9150_v46  ;;  %8832 = vmatpush3.bf16.msra.mxu1 %v11582_v19  ;;  %v6232_v19 = vsel %vm146_vm1, %v11621_v33, %v6214_v53 }
0x121e   :  { %8775 = vmatprep.subr.bf16.mxu0 %v9204_v1  ;;  %8833 = vmatprep.subr.bf16.mxu1 %v9204_v1  ;;  %v6240_v55 = vpack.c.bf16 %v6232_v19, %v6232_v19 }
0x1221   :  { %8776 = vmatpush3.bf16.msra.mxu0 %v9151_v0  ;;  %8834 = vmatpush3.bf16.msra.mxu1 %v11591_v15 }
0x1222   :  { %8835 = vmatprep.subr.bf16.mxu1 %v9204_v1  ;;  %8793 = vmatprep.subr.bf16.mxu0 %v9204_v1 }
0x1224   :  { %8778 = vmatmul.mubr.msk.bf16.vlgmr.msra.gmra.mrb[224].mxu0 %vm235_vm2, %v6235_v16 }
0x1225   :  { %8836 = vmatpush3.bf16.msra.mxu1 %v11600_v38  ;;  %8794 = vmatpush3.bf16.msra.mxu0 %v11431_v14 }
0x1226   :  { %8853 = vmatprep.subr.bf16.mxu1 %v9204_v1  ;;  %8795 = vmatprep.subr.bf16.mxu0 %v9204_v1 }
0x1227   :  { %8801 = vmatprep.mubr.msk.bf16.mxu0 %vm9205_vm0, %v9204_v1 }
0x1228   :  { %8838 = vmatmul.mubr.msk.bf16.vlgmr.msra.gmra.mrb[232].mxu1 %vm235_vm2, %v6240_v55 }
0x1229   :  { %8854 = vmatpush3.bf16.msra.mxu1 %v11640_v17  ;;  %8796 = vmatpush3.bf16.msra.mxu0 %v11442_v58 }
0x122a   :  { %8855 = vmatprep.subr.bf16.mxu1 %v9204_v1  ;;  %8797 = vmatprep.subr.bf16.mxu0 %v9204_v1 }
0x122b   :  { %8861 = vmatprep.mubr.msk.bf16.mxu1 %vm9205_vm0, %v9204_v1 }
0x122d   :  { %8856 = vmatpush3.bf16.msra.mxu1 %v11651_v29  ;;  %8798 = vmatpush3.bf16.msra.mxu0 %v11452_v57 }
0x122e   :  { %8857 = vmatprep.subr.bf16.mxu1 %v9204_v1  ;;  %8799 = vmatprep.subr.bf16.mxu0 %v9204_v1 }
0x1231   :  { %8858 = vmatpush3.bf16.msra.mxu1 %v11662_v48  ;;  %8800 = vmatpush3.bf16.msra.mxu0 %v11465_v43  ;;  %v11956_v48 = vld [vmem:[%s12047_s3 + $0x7] ss:$0 sm:$0xff] }
0x1232   :  { %8859 = vmatprep.subr.bf16.mxu1 %v9204_v1  ;;  %8817 = vmatprep.subr.bf16.mxu0 %v9204_v1 }
0x1235   :  { %8860 = vmatpush3.bf16.msra.mxu1 %v11671_v22 }
0x1263   :  { %v6079_v14 = vpop.f32.mrb[216].mxu1 }
0x1264   :  { %v8743_v58 = vpop.f32.mrb[217].mxu1 }
0x1265   :  { %v6082_v15 = vpop.f32.mrb[218].mxu1 }
0x1266   :  { %v8744_v38 = vpop.f32.mrb[219].mxu1 }
0x1267   :  { %v5864_v33 = vpop.f32.mrb[208].mxu0 }
0x1268   :  { %v8683_v57 = vpop.f32.mrb[209].mxu0 }
0x1269   :  { %v5867_v17 = vpop.f32.mrb[210].mxu0 }
0x126a   :  { %v8684_v29 = vpop.f32.mrb[211].mxu0 }
0x1274   :  { %v6165_v63 = vpop.f32.mrb[220].mxu1 }
0x1275   :  { %v6166_v43 = vadd.f32 %v11956_v48, %v6165_v63  ;;  %v8767_v45 = vpop.f32.mrb[221].mxu1 }
0x1276   :  { %v6168_v35 = vpop.f32.mrb[222].mxu1 }
0x1277   :  { %9025 = vtanh.f32 %v6166_v43  ;;  %v8768_v22 = vpop.f32.mrb[223].mxu1 }
0x1278   :  { %v5950_v4 = vpop.f32.mrb[212].mxu0 }
0x1279   :  { %v8707_v8 = vpop.f32.mrb[213].mxu0 }
0x127a   :  { %v5953_v11 = vpop.f32.mrb[214].mxu0 }
0x127b   :  { %v8708_v50 = vpop.f32.mrb[215].mxu0 }
0x1281   :  { %v11959_v26 = vpop.eup %9025 }
0x1282   :  { %6217 = vrot.lane.b32.xlu1 %v11959_v26, %s9203_s26 }
0x1284   :  { %v6323_v42 = vpop.f32.mrb[224].mxu1 }
0x1285   :  { %v8791_v30 = vpop.f32.mrb[225].mxu1 }
0x1286   :  { %v6326_v59 = vpop.f32.mrb[226].mxu1  ;;  %6207 = vrot.lane.b32.xlu1 %v11222_v3, %s9203_s26 }
0x1287   :  { %v8792_v5 = vpop.f32.mrb[227].mxu1 }
0x1288   :  { %v6036_v27 = vpop.f32.mrb[216].mxu0 }
0x1289   :  { %v8731_v18 = vpop.f32.mrb[217].mxu0 }
0x128a   :  { %v6039_v51 = vpop.f32.mrb[218].mxu0 }
0x128b   :  { %v8732_v40 = vpop.f32.mrb[219].mxu0 }
0x12e7   :  { %v6122_v31 = vpop.f32.mrb[220].mxu0 }
0x12e8   :  { %v6123_v49 = vadd.f32 %v9153_v12, %v6122_v31  ;;  %v8755_v23 = vpop.f32.mrb[221].mxu0 }
0x12e9   :  { %v6125_v13 = vpop.f32.mrb[222].mxu0 }
0x12ea   :  { %9027 = vtanh.f32 %v6123_v49  ;;  %v8756_v7 = vpop.f32.mrb[223].mxu0 }
0x12eb   :  { %v6409_v61 = vpop.f32.mrb[228].mxu1 }
0x12ec   :  { %v8815_v56 = vpop.f32.mrb[229].mxu1 }
0x12ed   :  { %v6412_v44 = vpop.f32.mrb[230].mxu1 }
0x12ee   :  { %v8816_v47 = vpop.f32.mrb[231].mxu1 }
0x12f4   :  { %v9028_v3 = vpop.eup %9027  ;;  %v6218_v37 = vpop.permute.xlu1 %6217 }
0x12f5   :  { %6618 = vst.msk [vmem:[#allocation5 + $0xc] sm:$0x3] %vm771_vm3, %v9028_v3  ;;  %v6234_v53 = vsel %vm146_vm1, %v9028_v3, %v6218_v37  ;;  %6215 = vrot.lane.b32.xlu1 %v9028_v3, %s9203_s26 }
0x12f6   :  { %v6242_v21 = vpack.c.bf16 %v6234_v53, %v6234_v53 }
0x12f7   :  { %v6280_v10 = vpop.f32.mrb[224].mxu0 }
0x12f8   :  { %v8779_v9 = vpop.f32.mrb[225].mxu0  ;;  %v6208_v32 = vpop.permute.xlu1 %6207  ;;  %8862 = vmatmul.mubr.msk.bf16.vlgmr.msra.gmra.mrb[236].mxu1 %vm235_vm2, %v6242_v21 }
0x12f9   :  { %v6229_v46 = vsel %vm146_vm1, %v11025_v36, %v6208_v32  ;;  %v6283_v25 = vpop.f32.mrb[226].mxu0  ;;  %v6212_v36 = vpop.permute.xlu0 %6211 }
0x12fa   :  { %v6237_v0 = vpack.c.bf16 %v6229_v46, %v6229_v46  ;;  %v8780_v16 = vpop.f32.mrb[227].mxu0  ;;  %v6231_v15 = vsel %vm146_vm1, %v11374_v54, %v6212_v36  ;;  %v4107_v54 = vmul.f32 %v11049_v34, %v11796_v6  ;;  %v6187_v34 = vmul.f32 %v11959_v26, %v11796_v6 }
0x12fb   :  { %v6495_v19 = vpop.f32.mrb[232].mxu1 }
0x12fc   :  { %v8839_v55 = vpop.f32.mrb[233].mxu1  ;;  %8802 = vmatmul.mubr.msk.bf16.vlgmr.msra.gmra.mrb[228].mxu0 %vm235_vm2, %v6237_v0 }
0x12fd   :  { %8818 = vmatpush3.bf16.msra.mxu0 %v11479_v24  ;;  %v6498_v14 = vpop.f32.mrb[234].mxu1  ;;  %8825 = vmatprep.mubr.msk.bf16.mxu0 %vm9205_vm0, %v9204_v1  ;;  %v6239_v24 = vpack.c.bf16 %v6231_v15, %v6231_v15 }
0x12fe   :  { %v8840_v58 = vpop.f32.mrb[235].mxu1  ;;  %8819 = vmatprep.subr.bf16.mxu0 %v9204_v1 }
0x1301   :  { %8820 = vmatpush3.bf16.msra.mxu0 %v11490_v2  ;;  %v4108_v2 = vsel %vm771_vm3, %v4107_v54, 0.0 }
0x1302   :  { %8821 = vmatprep.subr.bf16.mxu0 %v9204_v1 }
0x1305   :  { %8822 = vmatpush3.bf16.msra.mxu0 %v11499_v52  ;;  %v5355_v52 = vmul.f32 %v11612_v60, %v11796_v6 }
0x1306   :  { %8823 = vmatprep.subr.bf16.mxu0 %v9204_v1 }
0x1309   :  { %8824 = vmatpush3.bf16.msra.mxu0 %v11508_v62  ;;  %v9154_v62 = vld [vmem:[%s12046_s2 + $0xd8] sm:$0xff]   ;;  %s9206_s2 = smov [#allocation5]  }
0x130a   :  { %8841 = vmatprep.subr.bf16.mxu0 %v9204_v1  ;;  %s6635_s14 = sshll.u32 %s9206_s2, 4  ;;  %s6636_s14 = int_to_ptr.vmem [resolvable:$true] %s6635_s14 }
0x130b   :  { %s9155_s15 = scalar_lea.vmem %s6636_s14, 256  ;;  %p9160_p1 = scmp.lt.s32.totalorder %s6636_s14, %s6636_s14 }
0x130c   :  { %8826 = vmatmul.mubr.msk.bf16.vlgmr.msra.gmra.mrb[232].mxu0 %vm235_vm2, %v6239_v24  ;;  %p9156_p0 = scmp.ne.s32.totalorder %s6636_s14, %s9155_s15  ;;  %p9161_p2 = scmp.lt.s32.totalorder %s9155_s15, %s9155_s15 }
0x130d   :  { %8842 = vmatpush3.bf16.msra.mxu0 %v11520_v20  ;;  %8849 = vmatprep.mubr.msk.bf16.mxu0 %vm9205_vm0, %v9204_v1  ;;  %v5356_v20 = vsel %vm771_vm3, %v5355_v52, 0.0 }
0x130e   :  { %8843 = vmatprep.subr.bf16.mxu0 %v9204_v1  ;;  %p9162_p3 = por %p9161_p2, %p9160_p1 }
0x1310   :  { %p9163_p4 = pnand %p9162_p3, %p9156_p0 }
0x1311   :  { %8844 = vmatpush3.bf16.msra.mxu0 %v11719_v28  ;;  %v6188_v28 = vsel %vm771_vm3, %v6187_v34, 0.0 }
0x1312   :  { %8845 = vmatprep.subr.bf16.mxu0 %v9204_v1 }
0x1315   :  { %8846 = vmatpush3.bf16.msra.mxu0 %v11730_v39 }
0x1316   :  { %8847 = vmatprep.subr.bf16.mxu0 %v9204_v1 }
0x1319   :  { %4109 = vadd.xlane.f32.xlu1 %v4108_v2  ;;  %8848 = vmatpush3.bf16.msra.mxu0 %v9154_v62 }
0x131d   :  { %5357 = vadd.xlane.f32.xlu1 %v5356_v20 }
0x1321   :  { %6189 = vadd.xlane.f32.xlu1 %v6188_v28 }
0x1367   :  { %v6216_v1 = vpop.permute.xlu1 %6215 }
0x1368   :  { %v6233_v39 = vsel %vm146_vm1, %v11771_v41, %v6216_v1 }
0x1369   :  { %v6241_v60 = vpack.c.bf16 %v6233_v39, %v6233_v39 }
0x136b   :  { %8850 = vmatmul.mubr.msk.bf16.vlgmr.msra.gmra.mrb[236].mxu0 %vm235_vm2, %v6241_v60 }
0x13cb   :  { %v6581_v38 = vpop.f32.mrb[236].mxu1 }
0x13cc   :  { %v6582_v33 = vadd.f32 %v11956_v48, %v6581_v38  ;;  %v8863_v57 = vpop.f32.mrb[237].mxu1 }
0x13cd   :  { %v6584_v17 = vpop.f32.mrb[238].mxu1 }
0x13ce   :  { %9029 = vtanh.f32 %v6582_v33  ;;  %v8864_v29 = vpop.f32.mrb[239].mxu1 }
0x13cf   :  { %v6366_v63 = vpop.f32.mrb[228].mxu0 }
0x13d0   :  { %v8803_v43 = vpop.f32.mrb[229].mxu0 }
0x13d1   :  { %v6369_v45 = vpop.f32.mrb[230].mxu0 }
0x13d2   :  { %v8804_v35 = vpop.f32.mrb[231].mxu0 }
0x13d8   :  { %v9030_v22 = vpop.eup %9029 }
0x13d9   :  { %6619 = vst.msk [vmem:[#allocation5 + $0xe] sm:$0x3] %vm771_vm3, %v9030_v22  ;;  %v6603_v4 = vmul.f32 %v9030_v22, %v11796_v6 }
0x13db   :  { %v6604_v41 = vsel %vm771_vm3, %v6603_v4, 0.0 }
0x13dc   :  { %6605 = vadd.xlane.f32.xlu0 %v6604_v41 }
0x13df   :  { %v6452_v8 = vpop.f32.mrb[232].mxu0 }
0x13e0   :  { %v8827_v11 = vpop.f32.mrb[233].mxu0 }
0x13e1   :  { %v6455_v50 = vpop.f32.mrb[234].mxu0 }
0x13e2   :  { %v8828_v48 = vpop.f32.mrb[235].mxu0 }
0x13e3   :  { %9166 = shalt.err (!%p9163_p4)
}
0x13e4   :  { %s9167_s18 = scalar_lea.hbm %s12051_s7, 256 }
0x13e5   :  { %p9168_p5 = scmp.ne.s32.totalorder %s12051_s7, %s9167_s18  ;;  %p9171_p6 = scmp.lt.u32.totalorder %s9167_s18, %s12051_s7 }
0x13e7   :  { %p9173_p7 = pnand %p9171_p6, %p9168_p5 }
0x13e9   :  { %9176 = shalt.err (!%p9173_p7)
}
0x13ea   :  { %s9207_s22 = smov 2   ;;  %v103_v59 = vlaneseq  ;;  %v3694_v5 = vpop.xlane.xlu0 %3693  ;;  %v775_v18 = vstv %s12049_s5  ;;  %v4110_v51 = vpop.xlane.xlu1 %4109  ;;  %s9208_s5 = smov [#allocation3]   ;;  %vm6610_vm12 = vcmask 58368  }
0x13eb   :  { %6641 = dma.vmem_to_hbm [thread:$0]  %s6636_s14, 256, %s12051_s7, [#allocation6], %s9203_s26, %s9203_s26, %s9207_s22   ;;  %v3695_v40 = vadd.f32 %v3694_v5, %v775_v18  ;;  %v4111_v12 = vadd.f32 %v4110_v51, %v775_v18 }
0x13ec   :  { %v104_v27 = vand.u32 127, %v103_v59  ;;  %s6626_s7 = sshll.u32 %s9208_s5, 4  ;;  %s6627_s7 = int_to_ptr.vmem [resolvable:$true] %s6626_s7 }
0x13ed   :  { %s9177_s26 = scalar_lea.vmem %s6627_s7, 32  ;;  %p9182_p9 = scmp.lt.s32.totalorder %s6627_s7, %s6627_s7 }
0x13ee   :  { %v4526_v31 = vpop.xlane.xlu0 %4525  ;;  %vm3696_vm4 = vcmp.eq.s32.totalorder %v104_v27, 0  ;;  %vm4112_vm5 = vcmp.eq.s32.totalorder %v104_v27, 1  ;;  %vm4528_vm6 = vcmp.eq.s32.totalorder %v104_v27, 2  ;;  %v5358_v13 = vpop.xlane.xlu1 %5357  ;;  %vm4944_vm7 = vcmp.eq.s32.totalorder %v104_v27, 3  ;;  %p9178_p8 = scmp.ne.s32.totalorder %s6627_s7, %s9177_s26  ;;  %p9183_p10 = scmp.lt.s32.totalorder %s9177_s26, %s9177_s26 }
0x13ef   :  { %v3697_v49 = vsel %vm3696_vm4, %v3695_v40, 0.0  ;;  %v4527_v7 = vadd.f32 %v4526_v31, %v775_v18  ;;  %v5359_v47 = vadd.f32 %v5358_v13, %v775_v18  ;;  %vm5360_vm8 = vcmp.eq.s32.totalorder %v104_v27, 4 }
0x13f0   :  { %v4113_v23 = vsel %vm4112_vm5, %v4111_v12, %v3697_v49  ;;  %vm5776_vm9 = vcmp.eq.s32.totalorder %v104_v27, 5  ;;  %vm6192_vm10 = vcmp.eq.s32.totalorder %v104_v27, 6  ;;  %vm6608_vm11 = vcmp.eq.s32.totalorder %v104_v27, 7  ;;  %p9184_p11 = por %p9183_p10, %p9182_p9 }
0x13f1   :  { %v4529_v56 = vsel %vm4528_vm6, %v4527_v7, %v4113_v23 }
0x13f2   :  { %v4942_v61 = vpop.xlane.xlu0 %4941  ;;  %v6190_v37 = vpop.xlane.xlu1 %6189  ;;  %p9185_p12 = pnand %p9184_p11, %p9178_p8 }
0x13f3   :  { %v4943_v44 = vadd.f32 %v4942_v61, %v775_v18  ;;  %v6191_v10 = vadd.f32 %v6190_v37, %v775_v18 }
0x13f5   :  { %v4945_v3 = vsel %vm4944_vm7, %v4943_v44, %v4529_v56 }
0x13f6   :  { %v5774_v53 = vpop.xlane.xlu0 %5773  ;;  %v5361_v21 = vsel %vm5360_vm8, %v5359_v47, %v4945_v3 }
0x13f7   :  { %v5775_v9 = vadd.f32 %v5774_v53, %v775_v18 }
0x13f9   :  { %v5777_v25 = vsel %vm5776_vm9, %v5775_v9, %v5361_v21 }
0x13fa   :  { %v6193_v0 = vsel %vm6192_vm10, %v6191_v10, %v5777_v25 }
0x143e   :  { %v6538_v6 = vpop.f32.mrb[236].mxu0 }
0x143f   :  { %v8851_v26 = vpop.f32.mrb[237].mxu0 }
0x1440   :  { %v6541_v42 = vpop.f32.mrb[238].mxu0 }
0x1441   :  { %v8852_v30 = vpop.f32.mrb[239].mxu0 }
0x1469   :  { %v6606_v32 = vpop.xlane.xlu0 %6605 }
0x146a   :  { %v6607_v46 = vadd.f32 %v6606_v32, %v775_v18 }
0x146c   :  { %v6609_v16 = vsel %vm6608_vm11, %v6607_v46, %v6193_v0 }
0x146d   :  { %6611 = vst.msk [vmem:[#allocation3] sm:$0x3] %vm6610_vm12, %v6609_v16 }
0x146e   :  { %9188 = shalt.err (!%p9185_p12)
}
0x146f   :  { %s9189_s30 = scalar_lea.hbm %s12050_s6, 32 }
0x1470   :  { %p9190_p13 = scmp.ne.s32.totalorder %s12050_s6, %s9189_s30  ;;  %p9193_p0 = scmp.lt.u32.totalorder %s9189_s30, %s12050_s6 }
0x1472   :  { %p9195_p1 = pnand %p9193_p0, %p9190_p13 }
0x1474   :  { %9198 = shalt.err (!%p9195_p1)
}
0x1475   :  { %6629 = dma.vmem_to_hbm [thread:$0]  %s6627_s7, 32, %s12050_s6, [#allocation4]  }
0x1476   :  { %9199 = dma.done.wait [#allocation4], 32  }
0x1477   :  { %9200 = vsyncadd [#allocation4], 4294967264 }
0x1478   :  { %9201 = dma.done.wait [#allocation6], 256  }
0x1479   :  { %9202 = vsyncadd [#allocation6], 4294967040 }
0x147a   :  { %6648 = vsyncpa [#allocation4], 1 }
0x147b   :  { %6649 = vsyncpa [#allocation6], 1 }

</bundles_post_ra>
